<compile_context>
chip_gen: v7x
topology: tpu7x:2x2x1
jax: 0.10.0
libtpu: 0.0.40
codegen_flags: <defaults>
</compile_context>

<pallas_src>
import functools

import jax
import jax.numpy as jnp
from jax.experimental import pallas as pl
from jax.experimental.pallas import tpu as pltpu

# Column offset of the hidden activation inside the padded VMEM scratch.  8 keeps the
# (big) store sublane-aligned; the left/right halo columns (index 7 / 8+W) stay zero.
_PADL = 8


# ----------------------------------------------------------------------------
# Fused Pallas kernel: 1x1 expand -> 3x3 depthwise -> 1x1 project, per batch item
# ----------------------------------------------------------------------------
def _fused_block_kernel(*refs, stride, has_expand, add_residual):
    """Fused InvertedResidual forward for one batch element.

    BN scales are pre-folded into the weights (only bias adds remain).  The expanded
    `hidden` activation lives in the zero-padded VMEM scratch `pad_ref` and never
    touches HBM.
    """
    if has_expand:
        (x_ref, we_ref, be_ref, wd_ref, bd_ref, wp_ref, bp_ref,
         o_ref, pad_ref) = refs
    else:
        (x_ref, wd_ref, bd_ref, wp_ref, bp_ref, o_ref, pad_ref) = refs
        we_ref = be_ref = None

    _, H, W, Cin = x_ref.shape
    _, Hout, Wout, Cout = o_ref.shape
    Chid = wd_ref.shape[1]

    x = x_ref[0]                                     # (H, W, Cin), native dtype

    # -- stage 1: pointwise expand (MXU matmul) + bias + ReLU6 -> padded VMEM scratch
    pad_ref[...] = jnp.zeros_like(pad_ref)           # zero scratch => zero halo
    if has_expand:
        h = jnp.dot(x.reshape(H * W, Cin), we_ref[...],
                    preferred_element_type=jnp.float32)
        h = jnp.clip(h + be_ref[...], 0.0, 6.0)
        pad_ref[1:H + 1, _PADL:_PADL + W, :] = h.reshape(H, W, Chid)
    else:
        pad_ref[1:H + 1, _PADL:_PADL + W, :] = x.astype(pad_ref.dtype)

    # -- stage 2: 3x3 depthwise conv + bias + ReLU6 (hidden stays in VMEM)
    wd = wd_ref[...]                                 # (9, Chid), BN-folded
    acc = jnp.zeros((Hout, Wout, Chid), jnp.float32)
    for kh in range(3):                              # static unroll: 9 taps
        for kw in range(3):
            c0 = _PADL - 1 + kw                      # halo column sits at _PADL - 1
            if stride == 1:
                tap = pad_ref[kh:kh + Hout, c0:c0 + Wout, :]
            else:                                    # strided ref window (stride=2)
                tap = pad_ref[pl.ds(kh, Hout, stride),
                              pl.ds(c0, Wout, stride), :]
            acc = acc + tap * wd[kh * 3 + kw, :]
    hdw = jnp.clip(acc + bd_ref[...], 0.0, 6.0)      # (Hout, Wout, Chid)

    # -- stage 3: pointwise project (MXU matmul) + bias (+ residual), no ReLU6
    y = jnp.dot(hdw.reshape(Hout * Wout, Chid), wp_ref[...],
                preferred_element_type=jnp.float32)
    y = y + bp_ref[...]
    if add_residual:
        y = y + x.reshape(H * W, Cin).astype(jnp.float32)
    o_ref[0] = y.reshape(Hout, Wout, Cout).astype(o_ref.dtype)


# ----------------------------------------------------------------------------
# Block wrapper (NHWC in / NHWC out, one pallas_call per block)
# ----------------------------------------------------------------------------
def fold_bn(gamma, beta, mean, var, eps=1e-5):
    scale = gamma / jnp.sqrt(var + eps)
    bias = beta - mean * scale
    return scale, bias


def inverted_residual_nhwc(x_nhwc, params, *, stride, expand_ratio):
    """One InvertedResidual block as a single fused pallas_call (NHWC layout)."""
    N, H, W, Cin = x_nhwc.shape
    has_expand = expand_ratio != 1
    Chid = Cin * expand_ratio
    Cout = params["w_proj"].shape[1]
    use_shortcut = (stride == 1) and (Cin == Cout)
    Hout = (H + 2 - 3) // stride + 1
    Wout = (W + 2 - 3) // stride + 1

    # Fold eval-mode BN into the conv weights at trace time; only biases go in.
    args = [x_nhwc]
    in_specs = [pl.BlockSpec((1, H, W, Cin), lambda n: (n, 0, 0, 0))]
    if has_expand:
        s1, b1 = fold_bn(*params["bn1"])
        args += [params["w_expand"] * s1[None, :], b1.reshape(1, Chid)]
        in_specs += [pl.BlockSpec((Cin, Chid), lambda n: (0, 0)),
                     pl.BlockSpec((1, Chid), lambda n: (0, 0))]
    s2, b2 = fold_bn(*params["bn2"])
    s3, b3 = fold_bn(*params["bn3"])
    args += [(params["w_dw"] * s2[None, None, :]).reshape(9, Chid),
             b2.reshape(1, Chid),
             params["w_proj"] * s3[None, :],
             b3.reshape(1, Cout)]
    in_specs += [pl.BlockSpec((9, Chid), lambda n: (0, 0)),
                 pl.BlockSpec((1, Chid), lambda n: (0, 0)),
                 pl.BlockSpec((Chid, Cout), lambda n: (0, 0)),
                 pl.BlockSpec((1, Cout), lambda n: (0, 0))]

    kernel = functools.partial(_fused_block_kernel, stride=stride,
                               has_expand=has_expand, add_residual=use_shortcut)
    return pl.pallas_call(
        kernel,
        out_shape=jax.ShapeDtypeStruct((N, Hout, Wout, Cout), x_nhwc.dtype),
        grid_spec=pltpu.PrefetchScalarGridSpec(
            num_scalar_prefetch=0,
            grid=(N,),                               # batch-parallel (megacore)
            in_specs=in_specs,
            out_specs=pl.BlockSpec((1, Hout, Wout, Cout),
                                   lambda n: (n, 0, 0, 0)),
            scratch_shapes=[
                pltpu.VMEM((H + 2, W + 2 * _PADL, Chid), jnp.float32)],
        ),
        compiler_params=pltpu.CompilerParams(
            dimension_semantics=("parallel",),
            vmem_limit_bytes=32 * 1024 * 1024,       # explicit budget (ok on v5e/v6e/v7x)
        ),
    )(*args)


# ----------------------------------------------------------------------------
# Deterministic parameters
# ----------------------------------------------------------------------------
def _bn_params(c, idx):
    i = jnp.arange(c, dtype=jnp.float32)
    gamma = 1.0 + 0.01 * i + 0.1 * idx
    beta = 0.02 * i - 0.05 * idx
    mean = 0.03 * i * ((-1.0) ** idx)
    var = 1.0 + 0.05 * i + 0.01 * idx
    return gamma, beta, mean, var


def init_params(key, in_ch, out_ch, expand_ratio):
    hidden = in_ch * expand_ratio
    k0, k1, k2 = jax.random.split(key, 3)
    p = {}
    if expand_ratio != 1:
        p["w_expand"] = 0.1 * jax.random.normal(k0, (in_ch, hidden), jnp.float32)
        p["bn1"] = _bn_params(hidden, 1)
    p["w_dw"] = 0.1 * jax.random.normal(k1, (3, 3, hidden), jnp.float32)
    p["bn2"] = _bn_params(hidden, 2)
    p["w_proj"] = 0.1 * jax.random.normal(k2, (hidden, out_ch), jnp.float32)
    p["bn3"] = _bn_params(out_ch, 3)
    return p


# ----------------------------------------------------------------------------
# Pure-JAX reference (lax.conv, NHWC) for correctness check
# ----------------------------------------------------------------------------
def ref_inverted_residual_nhwc(x, params, *, stride, expand_ratio):
    dn = ("NHWC", "HWIO", "NHWC")
    h = x
    if expand_ratio != 1:
        w = params["w_expand"][None, None]           # (1,1,Cin,Chid)
        h = jax.lax.conv_general_dilated(h, w, (1, 1), ((0, 0), (0, 0)),
                                         dimension_numbers=dn)
        s, b = fold_bn(*params["bn1"])
        h = jnp.clip(h * s + b, 0.0, 6.0)
    C = h.shape[-1]
    wdw = params["w_dw"].reshape(3, 3, 1, C)
    h = jax.lax.conv_general_dilated(h, wdw, (stride, stride), ((1, 1), (1, 1)),
                                     dimension_numbers=dn, feature_group_count=C)
    s, b = fold_bn(*params["bn2"])
    h = jnp.clip(h * s + b, 0.0, 6.0)
    wp = params["w_proj"][None, None]
    h = jax.lax.conv_general_dilated(h, wp, (1, 1), ((0, 0), (0, 0)),
                                     dimension_numbers=dn)
    s, b = fold_bn(*params["bn3"])
    h = h * s + b
    if stride == 1 and x.shape[-1] == h.shape[-1]:
        h = x + h
    return h


# ----------------------------------------------------------------------------
if __name__ == "__main__":
    N, H, W, Cin = 2, 16, 16, 16

    key = jax.random.PRNGKey(0)
    kx, k1, k2 = jax.random.split(key, 3)
    x_nchw = jax.random.normal(kx, (N, Cin, H, W), jnp.float32)  # PyTorch NCHW

    # Two-block stack: (16->16, t=6, s=1, shortcut) then (16->24, t=1, s=1, no shortcut)
    p1 = init_params(k1, 16, 16, 6)
    p2 = init_params(k2, 16, 24, 1)

    @jax.jit
    def forward(x):
        xh = jnp.transpose(x, (0, 2, 3, 1))          # NCHW -> NHWC once at ingress
        h = inverted_residual_nhwc(xh, p1, stride=1, expand_ratio=6)
        h = inverted_residual_nhwc(h, p2, stride=1, expand_ratio=1)
        return jnp.transpose(h, (0, 3, 1, 2))        # NHWC -> NCHW once at egress

    out = jax.block_until_ready(forward(x_nchw))

    xh = jnp.transpose(x_nchw, (0, 2, 3, 1))
    rh = ref_inverted_residual_nhwc(xh, p1, stride=1, expand_ratio=6)
    rh = ref_inverted_residual_nhwc(rh, p2, stride=1, expand_ratio=1)
    ref = jax.block_until_ready(jnp.transpose(rh, (0, 3, 1, 2)))

    assert out.shape == (N, 24, H, W), out.shape
    # Both paths use the TPU's default (bf16-pass) matmul/conv precision for f32
    # operands, so allow a 1e-2 tolerance on O(1-6) activations.
    max_err = float(jnp.max(jnp.abs(out - ref)))
    assert jnp.allclose(out, ref, atol=1e-2, rtol=1e-2), max_err
    print("KERNEL_OK")
</pallas_src>

<mosaic_0001>
module attributes {stable_mosaic.version = 11 : i64} {
  func.func @_fused_block_kernel(%arg0: i32, %arg1: memref<1x16x16x16xf32, #tpu.memory_space<vmem>>, %arg2: memref<9x16xf32, #tpu.memory_space<vmem>>, %arg3: memref<1x16xf32, #tpu.memory_space<vmem>>, %arg4: memref<16x24xf32, #tpu.memory_space<vmem>>, %arg5: memref<1x24xf32, #tpu.memory_space<vmem>>, %arg6: memref<1x16x16x24xf32, #tpu.memory_space<vmem>>, %arg7: memref<18x32x16xf32, #tpu.memory_space<vmem>>) attributes {dimension_semantics = [#tpu.dimension_semantics<parallel>], iteration_bounds = array<i64: 2>, scalar_prefetch = 0 : i64, scratch_operands = 1 : i64, tpu.core_type = #tpu.core_type<tc>, window_params = [{transform_indices = @transform_0, window_bounds = array<i64: 1, 16, 16, 16>}, {pipeline_mode = #tpu.pipeline_mode<synchronous>, transform_indices = @transform_1, window_bounds = array<i64: 9, 16>}, {pipeline_mode = #tpu.pipeline_mode<synchronous>, transform_indices = @transform_2, window_bounds = array<i64: 1, 16>}, {pipeline_mode = #tpu.pipeline_mode<synchronous>, transform_indices = @transform_3, window_bounds = array<i64: 16, 24>}, {pipeline_mode = #tpu.pipeline_mode<synchronous>, transform_indices = @transform_4, window_bounds = array<i64: 1, 24>}, {transform_indices = @transform_5, window_bounds = array<i64: 1, 16, 16, 24>}]} {
    %c0 = arith.constant 0 : index
    %c0_0 = arith.constant 0 : index
    %c0_1 = arith.constant 0 : index
    %c0_2 = arith.constant 0 : index
    %0 = vector.load %arg1[%c0, %c0_0, %c0_1, %c0_2] : memref<1x16x16x16xf32, #tpu.memory_space<vmem>>, vector<1x16x16x16xf32>
    %1 = vector.shape_cast %0 : vector<1x16x16x16xf32> to vector<16x16x16xf32>
    %cst = arith.constant 0.000000e+00 : f32
    %2 = vector.broadcast %cst : f32 to vector<18x32x16xf32>
    %c0_3 = arith.constant 0 : index
    %c0_4 = arith.constant 0 : index
    %c0_5 = arith.constant 0 : index
    %3 = vector.load %arg7[%c0_3, %c0_4, %c0_5] : memref<18x32x16xf32, #tpu.memory_space<vmem>>, vector<18x32x16xf32>
    tpu.vector_store %arg7[%c0_3, %c0_4, %c0_5], %2 {strides = array<i32>} : memref<18x32x16xf32, #tpu.memory_space<vmem>>, vector<18x32x16xf32>,
    %c1 = arith.constant 1 : index
    %c8 = arith.constant 8 : index
    %c0_6 = arith.constant 0 : index
    %4 = vector.load %arg7[%c1, %c8, %c0_6] : memref<18x32x16xf32, #tpu.memory_space<vmem>>, vector<16x16x16xf32>
    tpu.vector_store %arg7[%c1, %c8, %c0_6], %1 {strides = array<i32>} : memref<18x32x16xf32, #tpu.memory_space<vmem>>, vector<16x16x16xf32>,
    %c0_7 = arith.constant 0 : index
    %c0_8 = arith.constant 0 : index
    %5 = vector.load %arg2[%c0_7, %c0_8] : memref<9x16xf32, #tpu.memory_space<vmem>>, vector<9x16xf32>
    %cst_9 = arith.constant 0.000000e+00 : f32
    %6 = vector.broadcast %cst_9 : f32 to vector<16x16x16xf32>
    %c0_10 = arith.constant 0 : index
    %c7 = arith.constant 7 : index
    %c0_11 = arith.constant 0 : index
    %7 = vector.load %arg7[%c0_10, %c7, %c0_11] : memref<18x32x16xf32, #tpu.memory_space<vmem>>, vector<16x16x16xf32>
    %8 = vector.extract_strided_slice %5 {offsets = [0, 0], sizes = [1, 16], strides = [1, 1]} : vector<9x16xf32> to vector<1x16xf32>
    %9 = vector.shape_cast %8 : vector<1x16xf32> to vector<16xf32>
    %10 = vector.shape_cast %9 : vector<16xf32> to vector<1x1x16xf32>
    %11 = vector.broadcast %10 : vector<1x1x16xf32> to vector<16x16x16xf32>
    %12 = arith.mulf %7, %11 : vector<16x16x16xf32>
    %13 = arith.addf %6, %12 : vector<16x16x16xf32>
    %c0_12 = arith.constant 0 : index
    %c8_13 = arith.constant 8 : index
    %c0_14 = arith.constant 0 : index
    %14 = vector.load %arg7[%c0_12, %c8_13, %c0_14] : memref<18x32x16xf32, #tpu.memory_space<vmem>>, vector<16x16x16xf32>
    %15 = vector.extract_strided_slice %5 {offsets = [1, 0], sizes = [1, 16], strides = [1, 1]} : vector<9x16xf32> to vector<1x16xf32>
    %16 = vector.shape_cast %15 : vector<1x16xf32> to vector<16xf32>
    %17 = vector.shape_cast %16 : vector<16xf32> to vector<1x1x16xf32>
    %18 = vector.broadcast %17 : vector<1x1x16xf32> to vector<16x16x16xf32>
    %19 = arith.mulf %14, %18 : vector<16x16x16xf32>
    %20 = arith.addf %13, %19 : vector<16x16x16xf32>
    %c0_15 = arith.constant 0 : index
    %c9 = arith.constant 9 : index
    %c0_16 = arith.constant 0 : index
    %21 = vector.load %arg7[%c0_15, %c9, %c0_16] : memref<18x32x16xf32, #tpu.memory_space<vmem>>, vector<16x16x16xf32>
    %22 = vector.extract_strided_slice %5 {offsets = [2, 0], sizes = [1, 16], strides = [1, 1]} : vector<9x16xf32> to vector<1x16xf32>
    %23 = vector.shape_cast %22 : vector<1x16xf32> to vector<16xf32>
    %24 = vector.shape_cast %23 : vector<16xf32> to vector<1x1x16xf32>
    %25 = vector.broadcast %24 : vector<1x1x16xf32> to vector<16x16x16xf32>
    %26 = arith.mulf %21, %25 : vector<16x16x16xf32>
    %27 = arith.addf %20, %26 : vector<16x16x16xf32>
    %c1_17 = arith.constant 1 : index
    %c7_18 = arith.constant 7 : index
    %c0_19 = arith.constant 0 : index
    %28 = vector.load %arg7[%c1_17, %c7_18, %c0_19] : memref<18x32x16xf32, #tpu.memory_space<vmem>>, vector<16x16x16xf32>
    %29 = vector.extract_strided_slice %5 {offsets = [3, 0], sizes = [1, 16], strides = [1, 1]} : vector<9x16xf32> to vector<1x16xf32>
    %30 = vector.shape_cast %29 : vector<1x16xf32> to vector<16xf32>
    %31 = vector.shape_cast %30 : vector<16xf32> to vector<1x1x16xf32>
    %32 = vector.broadcast %31 : vector<1x1x16xf32> to vector<16x16x16xf32>
    %33 = arith.mulf %28, %32 : vector<16x16x16xf32>
    %34 = arith.addf %27, %33 : vector<16x16x16xf32>
    %c1_20 = arith.constant 1 : index
    %c8_21 = arith.constant 8 : index
    %c0_22 = arith.constant 0 : index
    %35 = vector.load %arg7[%c1_20, %c8_21, %c0_22] : memref<18x32x16xf32, #tpu.memory_space<vmem>>, vector<16x16x16xf32>
    %36 = vector.extract_strided_slice %5 {offsets = [4, 0], sizes = [1, 16], strides = [1, 1]} : vector<9x16xf32> to vector<1x16xf32>
    %37 = vector.shape_cast %36 : vector<1x16xf32> to vector<16xf32>
    %38 = vector.shape_cast %37 : vector<16xf32> to vector<1x1x16xf32>
    %39 = vector.broadcast %38 : vector<1x1x16xf32> to vector<16x16x16xf32>
    %40 = arith.mulf %35, %39 : vector<16x16x16xf32>
    %41 = arith.addf %34, %40 : vector<16x16x16xf32>
    %c1_23 = arith.constant 1 : index
    %c9_24 = arith.constant 9 : index
    %c0_25 = arith.constant 0 : index
    %42 = vector.load %arg7[%c1_23, %c9_24, %c0_25] : memref<18x32x16xf32, #tpu.memory_space<vmem>>, vector<16x16x16xf32>
    %43 = vector.extract_strided_slice %5 {offsets = [5, 0], sizes = [1, 16], strides = [1, 1]} : vector<9x16xf32> to vector<1x16xf32>
    %44 = vector.shape_cast %43 : vector<1x16xf32> to vector<16xf32>
    %45 = vector.shape_cast %44 : vector<16xf32> to vector<1x1x16xf32>
    %46 = vector.broadcast %45 : vector<1x1x16xf32> to vector<16x16x16xf32>
    %47 = arith.mulf %42, %46 : vector<16x16x16xf32>
    %48 = arith.addf %41, %47 : vector<16x16x16xf32>
    %c2 = arith.constant 2 : index
    %c7_26 = arith.constant 7 : index
    %c0_27 = arith.constant 0 : index
    %49 = vector.load %arg7[%c2, %c7_26, %c0_27] : memref<18x32x16xf32, #tpu.memory_space<vmem>>, vector<16x16x16xf32>
    %50 = vector.extract_strided_slice %5 {offsets = [6, 0], sizes = [1, 16], strides = [1, 1]} : vector<9x16xf32> to vector<1x16xf32>
    %51 = vector.shape_cast %50 : vector<1x16xf32> to vector<16xf32>
    %52 = vector.shape_cast %51 : vector<16xf32> to vector<1x1x16xf32>
    %53 = vector.broadcast %52 : vector<1x1x16xf32> to vector<16x16x16xf32>
    %54 = arith.mulf %49, %53 : vector<16x16x16xf32>
    %55 = arith.addf %48, %54 : vector<16x16x16xf32>
    %c2_28 = arith.constant 2 : index
    %c8_29 = arith.constant 8 : index
    %c0_30 = arith.constant 0 : index
    %56 = vector.load %arg7[%c2_28, %c8_29, %c0_30] : memref<18x32x16xf32, #tpu.memory_space<vmem>>, vector<16x16x16xf32>
    %57 = vector.extract_strided_slice %5 {offsets = [7, 0], sizes = [1, 16], strides = [1, 1]} : vector<9x16xf32> to vector<1x16xf32>
    %58 = vector.shape_cast %57 : vector<1x16xf32> to vector<16xf32>
    %59 = vector.shape_cast %58 : vector<16xf32> to vector<1x1x16xf32>
    %60 = vector.broadcast %59 : vector<1x1x16xf32> to vector<16x16x16xf32>
    %61 = arith.mulf %56, %60 : vector<16x16x16xf32>
    %62 = arith.addf %55, %61 : vector<16x16x16xf32>
    %c2_31 = arith.constant 2 : index
    %c9_32 = arith.constant 9 : index
    %c0_33 = arith.constant 0 : index
    %63 = vector.load %arg7[%c2_31, %c9_32, %c0_33] : memref<18x32x16xf32, #tpu.memory_space<vmem>>, vector<16x16x16xf32>
    %64 = vector.extract_strided_slice %5 {offsets = [8, 0], sizes = [1, 16], strides = [1, 1]} : vector<9x16xf32> to vector<1x16xf32>
    %65 = vector.shape_cast %64 : vector<1x16xf32> to vector<16xf32>
    %66 = vector.shape_cast %65 : vector<16xf32> to vector<1x1x16xf32>
    %67 = vector.broadcast %66 : vector<1x1x16xf32> to vector<16x16x16xf32>
    %68 = arith.mulf %63, %67 : vector<16x16x16xf32>
    %69 = arith.addf %62, %68 : vector<16x16x16xf32>
    %c0_34 = arith.constant 0 : index
    %c0_35 = arith.constant 0 : index
    %70 = vector.load %arg3[%c0_34, %c0_35] : memref<1x16xf32, #tpu.memory_space<vmem>>, vector<1x16xf32>
    %71 = vector.shape_cast %70 : vector<1x16xf32> to vector<1x1x16xf32>
    %72 = vector.broadcast %71 : vector<1x1x16xf32> to vector<16x16x16xf32>
    %73 = arith.addf %69, %72 : vector<16x16x16xf32>
    %cst_36 = arith.constant 0.000000e+00 : f32
    %cst_37 = arith.constant 6.000000e+00 : f32
    %74 = vector.broadcast %cst_36 : f32 to vector<16x16x16xf32>
    %75 = arith.maximumf %74, %73 : vector<16x16x16xf32>
    %76 = vector.broadcast %cst_37 : f32 to vector<16x16x16xf32>
    %77 = arith.minimumf %76, %75 : vector<16x16x16xf32>
    %78 = vector.shape_cast %77 : vector<16x16x16xf32> to vector<256x16xf32>
    %c0_38 = arith.constant 0 : index
    %c0_39 = arith.constant 0 : index
    %79 = vector.load %arg4[%c0_38, %c0_39] : memref<16x24xf32, #tpu.memory_space<vmem>>, vector<16x24xf32>
    %cst_40 = arith.constant dense<0.000000e+00> : vector<256x24xf32>
    %80 = tpu.matmul %78, %79, %cst_40 {dimension_numbers = #tpu.dot_dimension_numbers<[1], [0], [0], [1], [0, 0, 1, 1], [], []>} : vector<256x16xf32>, vector<16x24xf32>, vector<256x24xf32> -> vector<256x24xf32>
    %c0_41 = arith.constant 0 : index
    %c0_42 = arith.constant 0 : index
    %81 = vector.load %arg5[%c0_41, %c0_42] : memref<1x24xf32, #tpu.memory_space<vmem>>, vector<1x24xf32>
    %82 = vector.broadcast %81 : vector<1x24xf32> to vector<256x24xf32>
    %83 = arith.addf %80, %82 : vector<256x24xf32>
    %84 = vector.shape_cast %83 : vector<256x24xf32> to vector<16x16x24xf32>
    %c0_43 = arith.constant 0 : index
    %c0_44 = arith.constant 0 : index
    %c0_45 = arith.constant 0 : index
    %c0_46 = arith.constant 0 : index
    %85 = vector.load %arg6[%c0_43, %c0_44, %c0_45, %c0_46] : memref<1x16x16x24xf32, #tpu.memory_space<vmem>>, vector<1x16x16x24xf32>
    %86 = vector.shape_cast %85 : vector<1x16x16x24xf32> to vector<16x16x24xf32>
    %87 = vector.shape_cast %84 : vector<16x16x24xf32> to vector<1x16x16x24xf32>
    tpu.vector_store %arg6[%c0_43, %c0_44, %c0_45, %c0_46], %87 {strides = array<i32>} : memref<1x16x16x24xf32, #tpu.memory_space<vmem>>, vector<1x16x16x24xf32>,
    return
  }
  func.func @transform_0(%arg0: i32) -> (i32, i32, i32, i32) {
    %c0_i32 = arith.constant 0 : i32
    %c0_i32_0 = arith.constant 0 : i32
    %c0_i32_1 = arith.constant 0 : i32
    %c0_i32_2 = arith.constant 0 : i32
    return %arg0, %c0_i32, %c0_i32_0, %c0_i32_1 : i32, i32, i32, i32
  }
  func.func @transform_1(%arg0: i32) -> (i32, i32) {
    %c0_i32 = arith.constant 0 : i32
    %c0_i32_0 = arith.constant 0 : i32
    %c0_i32_1 = arith.constant 0 : i32
    return %c0_i32, %c0_i32_0 : i32, i32
  }
  func.func @transform_2(%arg0: i32) -> (i32, i32) {
    %c0_i32 = arith.constant 0 : i32
    %c0_i32_0 = arith.constant 0 : i32
    %c0_i32_1 = arith.constant 0 : i32
    return %c0_i32, %c0_i32_0 : i32, i32
  }
  func.func @transform_3(%arg0: i32) -> (i32, i32) {
    %c0_i32 = arith.constant 0 : i32
    %c0_i32_0 = arith.constant 0 : i32
    %c0_i32_1 = arith.constant 0 : i32
    return %c0_i32, %c0_i32_0 : i32, i32
  }
  func.func @transform_4(%arg0: i32) -> (i32, i32) {
    %c0_i32 = arith.constant 0 : i32
    %c0_i32_0 = arith.constant 0 : i32
    %c0_i32_1 = arith.constant 0 : i32
    return %c0_i32, %c0_i32_0 : i32, i32
  }
  func.func @transform_5(%arg0: i32) -> (i32, i32, i32, i32) {
    %c0_i32 = arith.constant 0 : i32
    %c0_i32_0 = arith.constant 0 : i32
    %c0_i32_1 = arith.constant 0 : i32
    %c0_i32_2 = arith.constant 0 : i32
    return %arg0, %c0_i32, %c0_i32_0, %c0_i32_1 : i32, i32, i32, i32
  }
}

module attributes {stable_mosaic.version = 11 : i64} {
  func.func @_fused_block_kernel(%arg0: i32, %arg1: memref<1x16x16x16xf32, #tpu.memory_space<vmem>>, %arg2: memref<16x96xf32, #tpu.memory_space<vmem>>, %arg3: memref<1x96xf32, #tpu.memory_space<vmem>>, %arg4: memref<9x96xf32, #tpu.memory_space<vmem>>, %arg5: memref<1x96xf32, #tpu.memory_space<vmem>>, %arg6: memref<96x16xf32, #tpu.memory_space<vmem>>, %arg7: memref<1x16xf32, #tpu.memory_space<vmem>>, %arg8: memref<1x16x16x16xf32, #tpu.memory_space<vmem>>, %arg9: memref<18x32x96xf32, #tpu.memory_space<vmem>>) attributes {dimension_semantics = [#tpu.dimension_semantics<parallel>], iteration_bounds = array<i64: 2>, scalar_prefetch = 0 : i64, scratch_operands = 1 : i64, tpu.core_type = #tpu.core_type<tc>, window_params = [{transform_indices = @transform_0, window_bounds = array<i64: 1, 16, 16, 16>}, {pipeline_mode = #tpu.pipeline_mode<synchronous>, transform_indices = @transform_1, window_bounds = array<i64: 16, 96>}, {pipeline_mode = #tpu.pipeline_mode<synchronous>, transform_indices = @transform_2, window_bounds = array<i64: 1, 96>}, {pipeline_mode = #tpu.pipeline_mode<synchronous>, transform_indices = @transform_3, window_bounds = array<i64: 9, 96>}, {pipeline_mode = #tpu.pipeline_mode<synchronous>, transform_indices = @transform_4, window_bounds = array<i64: 1, 96>}, {pipeline_mode = #tpu.pipeline_mode<synchronous>, transform_indices = @transform_5, window_bounds = array<i64: 96, 16>}, {pipeline_mode = #tpu.pipeline_mode<synchronous>, transform_indices = @transform_6, window_bounds = array<i64: 1, 16>}, {transform_indices = @transform_7, window_bounds = array<i64: 1, 16, 16, 16>}]} {
    %c0 = arith.constant 0 : index
    %c0_0 = arith.constant 0 : index
    %c0_1 = arith.constant 0 : index
    %c0_2 = arith.constant 0 : index
    %0 = vector.load %arg1[%c0, %c0_0, %c0_1, %c0_2] : memref<1x16x16x16xf32, #tpu.memory_space<vmem>>, vector<1x16x16x16xf32>
    %1 = vector.shape_cast %0 : vector<1x16x16x16xf32> to vector<16x16x16xf32>
    %cst = arith.constant 0.000000e+00 : f32
    %2 = vector.broadcast %cst : f32 to vector<18x32x96xf32>
    %c0_3 = arith.constant 0 : index
    %c0_4 = arith.constant 0 : index
    %c0_5 = arith.constant 0 : index
    %3 = vector.load %arg9[%c0_3, %c0_4, %c0_5] : memref<18x32x96xf32, #tpu.memory_space<vmem>>, vector<18x32x96xf32>
    tpu.vector_store %arg9[%c0_3, %c0_4, %c0_5], %2 {strides = array<i32>} : memref<18x32x96xf32, #tpu.memory_space<vmem>>, vector<18x32x96xf32>,
    %4 = vector.shape_cast %1 : vector<16x16x16xf32> to vector<256x16xf32>
    %c0_6 = arith.constant 0 : index
    %c0_7 = arith.constant 0 : index
    %5 = vector.load %arg2[%c0_6, %c0_7] : memref<16x96xf32, #tpu.memory_space<vmem>>, vector<16x96xf32>
    %cst_8 = arith.constant dense<0.000000e+00> : vector<256x96xf32>
    %6 = tpu.matmul %4, %5, %cst_8 {dimension_numbers = #tpu.dot_dimension_numbers<[1], [0], [0], [1], [0, 0, 1, 1], [], []>} : vector<256x16xf32>, vector<16x96xf32>, vector<256x96xf32> -> vector<256x96xf32>
    %c0_9 = arith.constant 0 : index
    %c0_10 = arith.constant 0 : index
    %7 = vector.load %arg3[%c0_9, %c0_10] : memref<1x96xf32, #tpu.memory_space<vmem>>, vector<1x96xf32>
    %8 = vector.broadcast %7 : vector<1x96xf32> to vector<256x96xf32>
    %9 = arith.addf %6, %8 : vector<256x96xf32>
    %cst_11 = arith.constant 0.000000e+00 : f32
    %cst_12 = arith.constant 6.000000e+00 : f32
    %10 = vector.broadcast %cst_11 : f32 to vector<256x96xf32>
    %11 = arith.maximumf %10, %9 : vector<256x96xf32>
    %12 = vector.broadcast %cst_12 : f32 to vector<256x96xf32>
    %13 = arith.minimumf %12, %11 : vector<256x96xf32>
    %14 = vector.shape_cast %13 : vector<256x96xf32> to vector<16x16x96xf32>
    %c1 = arith.constant 1 : index
    %c8 = arith.constant 8 : index
    %c0_13 = arith.constant 0 : index
    %15 = vector.load %arg9[%c1, %c8, %c0_13] : memref<18x32x96xf32, #tpu.memory_space<vmem>>, vector<16x16x96xf32>
    tpu.vector_store %arg9[%c1, %c8, %c0_13], %14 {strides = array<i32>} : memref<18x32x96xf32, #tpu.memory_space<vmem>>, vector<16x16x96xf32>,
    %c0_14 = arith.constant 0 : index
    %c0_15 = arith.constant 0 : index
    %16 = vector.load %arg4[%c0_14, %c0_15] : memref<9x96xf32, #tpu.memory_space<vmem>>, vector<9x96xf32>
    %cst_16 = arith.constant 0.000000e+00 : f32
    %17 = vector.broadcast %cst_16 : f32 to vector<16x16x96xf32>
    %c0_17 = arith.constant 0 : index
    %c7 = arith.constant 7 : index
    %c0_18 = arith.constant 0 : index
    %18 = vector.load %arg9[%c0_17, %c7, %c0_18] : memref<18x32x96xf32, #tpu.memory_space<vmem>>, vector<16x16x96xf32>
    %19 = vector.extract_strided_slice %16 {offsets = [0, 0], sizes = [1, 96], strides = [1, 1]} : vector<9x96xf32> to vector<1x96xf32>
    %20 = vector.shape_cast %19 : vector<1x96xf32> to vector<96xf32>
    %21 = vector.shape_cast %20 : vector<96xf32> to vector<1x1x96xf32>
    %22 = vector.broadcast %21 : vector<1x1x96xf32> to vector<16x16x96xf32>
    %23 = arith.mulf %18, %22 : vector<16x16x96xf32>
    %24 = arith.addf %17, %23 : vector<16x16x96xf32>
    %c0_19 = arith.constant 0 : index
    %c8_20 = arith.constant 8 : index
    %c0_21 = arith.constant 0 : index
    %25 = vector.load %arg9[%c0_19, %c8_20, %c0_21] : memref<18x32x96xf32, #tpu.memory_space<vmem>>, vector<16x16x96xf32>
    %26 = vector.extract_strided_slice %16 {offsets = [1, 0], sizes = [1, 96], strides = [1, 1]} : vector<9x96xf32> to vector<1x96xf32>
    %27 = vector.shape_cast %26 : vector<1x96xf32> to vector<96xf32>
    %28 = vector.shape_cast %27 : vector<96xf32> to vector<1x1x96xf32>
    %29 = vector.broadcast %28 : vector<1x1x96xf32> to vector<16x16x96xf32>
    %30 = arith.mulf %25, %29 : vector<16x16x96xf32>
    %31 = arith.addf %24, %30 : vector<16x16x96xf32>
    %c0_22 = arith.constant 0 : index
    %c9 = arith.constant 9 : index
    %c0_23 = arith.constant 0 : index
    %32 = vector.load %arg9[%c0_22, %c9, %c0_23] : memref<18x32x96xf32, #tpu.memory_space<vmem>>, vector<16x16x96xf32>
    %33 = vector.extract_strided_slice %16 {offsets = [2, 0], sizes = [1, 96], strides = [1, 1]} : vector<9x96xf32> to vector<1x96xf32>
    %34 = vector.shape_cast %33 : vector<1x96xf32> to vector<96xf32>
    %35 = vector.shape_cast %34 : vector<96xf32> to vector<1x1x96xf32>
    %36 = vector.broadcast %35 : vector<1x1x96xf32> to vector<16x16x96xf32>
    %37 = arith.mulf %32, %36 : vector<16x16x96xf32>
    %38 = arith.addf %31, %37 : vector<16x16x96xf32>
    %c1_24 = arith.constant 1 : index
    %c7_25 = arith.constant 7 : index
    %c0_26 = arith.constant 0 : index
    %39 = vector.load %arg9[%c1_24, %c7_25, %c0_26] : memref<18x32x96xf32, #tpu.memory_space<vmem>>, vector<16x16x96xf32>
    %40 = vector.extract_strided_slice %16 {offsets = [3, 0], sizes = [1, 96], strides = [1, 1]} : vector<9x96xf32> to vector<1x96xf32>
    %41 = vector.shape_cast %40 : vector<1x96xf32> to vector<96xf32>
    %42 = vector.shape_cast %41 : vector<96xf32> to vector<1x1x96xf32>
    %43 = vector.broadcast %42 : vector<1x1x96xf32> to vector<16x16x96xf32>
    %44 = arith.mulf %39, %43 : vector<16x16x96xf32>
    %45 = arith.addf %38, %44 : vector<16x16x96xf32>
    %c1_27 = arith.constant 1 : index
    %c8_28 = arith.constant 8 : index
    %c0_29 = arith.constant 0 : index
    %46 = vector.load %arg9[%c1_27, %c8_28, %c0_29] : memref<18x32x96xf32, #tpu.memory_space<vmem>>, vector<16x16x96xf32>
    %47 = vector.extract_strided_slice %16 {offsets = [4, 0], sizes = [1, 96], strides = [1, 1]} : vector<9x96xf32> to vector<1x96xf32>
    %48 = vector.shape_cast %47 : vector<1x96xf32> to vector<96xf32>
    %49 = vector.shape_cast %48 : vector<96xf32> to vector<1x1x96xf32>
    %50 = vector.broadcast %49 : vector<1x1x96xf32> to vector<16x16x96xf32>
    %51 = arith.mulf %46, %50 : vector<16x16x96xf32>
    %52 = arith.addf %45, %51 : vector<16x16x96xf32>
    %c1_30 = arith.constant 1 : index
    %c9_31 = arith.constant 9 : index
    %c0_32 = arith.constant 0 : index
    %53 = vector.load %arg9[%c1_30, %c9_31, %c0_32] : memref<18x32x96xf32, #tpu.memory_space<vmem>>, vector<16x16x96xf32>
    %54 = vector.extract_strided_slice %16 {offsets = [5, 0], sizes = [1, 96], strides = [1, 1]} : vector<9x96xf32> to vector<1x96xf32>
    %55 = vector.shape_cast %54 : vector<1x96xf32> to vector<96xf32>
    %56 = vector.shape_cast %55 : vector<96xf32> to vector<1x1x96xf32>
    %57 = vector.broadcast %56 : vector<1x1x96xf32> to vector<16x16x96xf32>
    %58 = arith.mulf %53, %57 : vector<16x16x96xf32>
    %59 = arith.addf %52, %58 : vector<16x16x96xf32>
    %c2 = arith.constant 2 : index
    %c7_33 = arith.constant 7 : index
    %c0_34 = arith.constant 0 : index
    %60 = vector.load %arg9[%c2, %c7_33, %c0_34] : memref<18x32x96xf32, #tpu.memory_space<vmem>>, vector<16x16x96xf32>
    %61 = vector.extract_strided_slice %16 {offsets = [6, 0], sizes = [1, 96], strides = [1, 1]} : vector<9x96xf32> to vector<1x96xf32>
    %62 = vector.shape_cast %61 : vector<1x96xf32> to vector<96xf32>
    %63 = vector.shape_cast %62 : vector<96xf32> to vector<1x1x96xf32>
    %64 = vector.broadcast %63 : vector<1x1x96xf32> to vector<16x16x96xf32>
    %65 = arith.mulf %60, %64 : vector<16x16x96xf32>
    %66 = arith.addf %59, %65 : vector<16x16x96xf32>
    %c2_35 = arith.constant 2 : index
    %c8_36 = arith.constant 8 : index
    %c0_37 = arith.constant 0 : index
    %67 = vector.load %arg9[%c2_35, %c8_36, %c0_37] : memref<18x32x96xf32, #tpu.memory_space<vmem>>, vector<16x16x96xf32>
    %68 = vector.extract_strided_slice %16 {offsets = [7, 0], sizes = [1, 96], strides = [1, 1]} : vector<9x96xf32> to vector<1x96xf32>
    %69 = vector.shape_cast %68 : vector<1x96xf32> to vector<96xf32>
    %70 = vector.shape_cast %69 : vector<96xf32> to vector<1x1x96xf32>
    %71 = vector.broadcast %70 : vector<1x1x96xf32> to vector<16x16x96xf32>
    %72 = arith.mulf %67, %71 : vector<16x16x96xf32>
    %73 = arith.addf %66, %72 : vector<16x16x96xf32>
    %c2_38 = arith.constant 2 : index
    %c9_39 = arith.constant 9 : index
    %c0_40 = arith.constant 0 : index
    %74 = vector.load %arg9[%c2_38, %c9_39, %c0_40] : memref<18x32x96xf32, #tpu.memory_space<vmem>>, vector<16x16x96xf32>
    %75 = vector.extract_strided_slice %16 {offsets = [8, 0], sizes = [1, 96], strides = [1, 1]} : vector<9x96xf32> to vector<1x96xf32>
    %76 = vector.shape_cast %75 : vector<1x96xf32> to vector<96xf32>
    %77 = vector.shape_cast %76 : vector<96xf32> to vector<1x1x96xf32>
    %78 = vector.broadcast %77 : vector<1x1x96xf32> to vector<16x16x96xf32>
    %79 = arith.mulf %74, %78 : vector<16x16x96xf32>
    %80 = arith.addf %73, %79 : vector<16x16x96xf32>
    %c0_41 = arith.constant 0 : index
    %c0_42 = arith.constant 0 : index
    %81 = vector.load %arg5[%c0_41, %c0_42] : memref<1x96xf32, #tpu.memory_space<vmem>>, vector<1x96xf32>
    %82 = vector.shape_cast %81 : vector<1x96xf32> to vector<1x1x96xf32>
    %83 = vector.broadcast %82 : vector<1x1x96xf32> to vector<16x16x96xf32>
    %84 = arith.addf %80, %83 : vector<16x16x96xf32>
    %cst_43 = arith.constant 0.000000e+00 : f32
    %cst_44 = arith.constant 6.000000e+00 : f32
    %85 = vector.broadcast %cst_43 : f32 to vector<16x16x96xf32>
    %86 = arith.maximumf %85, %84 : vector<16x16x96xf32>
    %87 = vector.broadcast %cst_44 : f32 to vector<16x16x96xf32>
    %88 = arith.minimumf %87, %86 : vector<16x16x96xf32>
    %89 = vector.shape_cast %88 : vector<16x16x96xf32> to vector<256x96xf32>
    %c0_45 = arith.constant 0 : index
    %c0_46 = arith.constant 0 : index
    %90 = vector.load %arg6[%c0_45, %c0_46] : memref<96x16xf32, #tpu.memory_space<vmem>>, vector<96x16xf32>
    %cst_47 = arith.constant dense<0.000000e+00> : vector<256x16xf32>
    %91 = tpu.matmul %89, %90, %cst_47 {dimension_numbers = #tpu.dot_dimension_numbers<[1], [0], [0], [1], [0, 0, 1, 1], [], []>} : vector<256x96xf32>, vector<96x16xf32>, vector<256x16xf32> -> vector<256x16xf32>
    %c0_48 = arith.constant 0 : index
    %c0_49 = arith.constant 0 : index
    %92 = vector.load %arg7[%c0_48, %c0_49] : memref<1x16xf32, #tpu.memory_space<vmem>>, vector<1x16xf32>
    %93 = vector.broadcast %92 : vector<1x16xf32> to vector<256x16xf32>
    %94 = arith.addf %91, %93 : vector<256x16xf32>
    %95 = vector.shape_cast %1 : vector<16x16x16xf32> to vector<256x16xf32>
    %96 = arith.addf %94, %95 : vector<256x16xf32>
    %97 = vector.shape_cast %96 : vector<256x16xf32> to vector<16x16x16xf32>
    %c0_50 = arith.constant 0 : index
    %c0_51 = arith.constant 0 : index
    %c0_52 = arith.constant 0 : index
    %c0_53 = arith.constant 0 : index
    %98 = vector.load %arg8[%c0_50, %c0_51, %c0_52, %c0_53] : memref<1x16x16x16xf32, #tpu.memory_space<vmem>>, vector<1x16x16x16xf32>
    %99 = vector.shape_cast %98 : vector<1x16x16x16xf32> to vector<16x16x16xf32>
    %100 = vector.shape_cast %97 : vector<16x16x16xf32> to vector<1x16x16x16xf32>
    tpu.vector_store %arg8[%c0_50, %c0_51, %c0_52, %c0_53], %100 {strides = array<i32>} : memref<1x16x16x16xf32, #tpu.memory_space<vmem>>, vector<1x16x16x16xf32>,
    return
  }
  func.func @transform_0(%arg0: i32) -> (i32, i32, i32, i32) {
    %c0_i32 = arith.constant 0 : i32
    %c0_i32_0 = arith.constant 0 : i32
    %c0_i32_1 = arith.constant 0 : i32
    %c0_i32_2 = arith.constant 0 : i32
    return %arg0, %c0_i32, %c0_i32_0, %c0_i32_1 : i32, i32, i32, i32
  }
  func.func @transform_1(%arg0: i32) -> (i32, i32) {
    %c0_i32 = arith.constant 0 : i32
    %c0_i32_0 = arith.constant 0 : i32
    %c0_i32_1 = arith.constant 0 : i32
    return %c0_i32, %c0_i32_0 : i32, i32
  }
  func.func @transform_2(%arg0: i32) -> (i32, i32) {
    %c0_i32 = arith.constant 0 : i32
    %c0_i32_0 = arith.constant 0 : i32
    %c0_i32_1 = arith.constant 0 : i32
    return %c0_i32, %c0_i32_0 : i32, i32
  }
  func.func @transform_3(%arg0: i32) -> (i32, i32) {
    %c0_i32 = arith.constant 0 : i32
    %c0_i32_0 = arith.constant 0 : i32
    %c0_i32_1 = arith.constant 0 : i32
    return %c0_i32, %c0_i32_0 : i32, i32
  }
  func.func @transform_4(%arg0: i32) -> (i32, i32) {
    %c0_i32 = arith.constant 0 : i32
    %c0_i32_0 = arith.constant 0 : i32
    %c0_i32_1 = arith.constant 0 : i32
    return %c0_i32, %c0_i32_0 : i32, i32
  }
  func.func @transform_5(%arg0: i32) -> (i32, i32) {
    %c0_i32 = arith.constant 0 : i32
    %c0_i32_0 = arith.constant 0 : i32
    %c0_i32_1 = arith.constant 0 : i32
    return %c0_i32, %c0_i32_0 : i32, i32
  }
  func.func @transform_6(%arg0: i32) -> (i32, i32) {
    %c0_i32 = arith.constant 0 : i32
    %c0_i32_0 = arith.constant 0 : i32
    %c0_i32_1 = arith.constant 0 : i32
    return %c0_i32, %c0_i32_0 : i32, i32
  }
  func.func @transform_7(%arg0: i32) -> (i32, i32, i32, i32) {
    %c0_i32 = arith.constant 0 : i32
    %c0_i32_0 = arith.constant 0 : i32
    %c0_i32_1 = arith.constant 0 : i32
    %c0_i32_2 = arith.constant 0 : i32
    return %arg0, %c0_i32, %c0_i32_0, %c0_i32_1 : i32, i32, i32, i32
  }
}

</mosaic_0001>

<bundles_post_ra>
// kernel: forward.3
= control target key start
LH: loop header
LB: loop body
LE: loop exit
PB: predicated region body
PF: predicated region fallthrough
CT: control target
= control target key end

     0   :  { %10 = vsyncpa [#allocation4], 0  ;;  %s3377_s0 = inlined_call_operand.vmem [shape: f32[2,16,16,16], index: 0, kind: input, shape index: {}]   ;;  %s3378_s1 = inlined_call_operand.vmem [shape: f32[9,16], index: 1, kind: input, shape index: {}]   ;;  %s3379_s2 = inlined_call_operand.vmem [shape: f32[1,16], index: 2, kind: input, shape index: {}]   ;;  %s3380_s3 = inlined_call_operand.vmem [shape: f32[16,24], index: 3, kind: input, shape index: {}]   ;;  %s3381_s4 = inlined_call_operand.vmem [shape: f32[1,24], index: 4, kind: input, shape index: {}]   ;;  %s3382_s5 = inlined_call_operand.hbm [shape: f32[2,16,16,24], index: 5, kind: output, shape index: {}]  }
   0x1   :  { %12 = vsyncpa [#allocation4 + $0x1], 0  ;;  %s2089_s18 = smov 0   ;;  %s2091_s19 = smov 0  }
   0x2   :  { %s2093_s20 = smov 0   ;;  %s2095_s21 = smov 0  }
   0x3 LB: > { %s2110_s22 = sadd.s32 4294967295, %s2053_s21   ;;  %s1806_s23 = sadd.s32 4294967294, %s2053_s21   ;;  %s2053_s21 = sphi %s2095_s21, %s3388_s21   ;;  %s2049_s20 = sphi %s2093_s20, %s3387_s20   ;;  %s2045_s19 = sphi %s2091_s19, %s3386_s19   ;;  %s2041_s18 = sphi %s2089_s18, %s3385_s18  }
   0x4   : > { %s2114_s24 = sadd.s32 1, %s2053_s21   ;;  %s135_s25 = sadd.s32 1, %s2049_s20 }
   0x5   : > { %s132_s26 = ssub.s32 %s2053_s21, %s2114_s24  ;;  %p145_p0 = scmp.ne.s32.totalorder %s2049_s20, %s2045_s19 }
   0x6   : > { %p133_p1 = scmp.eq.s32.totalorder %s132_s26, 0  ;;  %p146_p2 = scmp.eq.s32.totalorder %s2110_s22, 1 }
   0x7   : > { %p151_p3 = scmp.ne.s32.totalorder %s2045_s19, %s2041_s18  ;;  %p152_p4 = scmp.eq.s32.totalorder %s1806_s23, 1 }
   0x8   : > { %s2125_s27 = scalar_select %p133_p1, %s2049_s20, %s135_s25  }
   0x9   : > { %p2127_p5 = por %p146_p2, %p145_p0  ;;  %p2131_p6 = por %p152_p4, %p151_p3 }
   0xa   : > { %p1809_p7 = scmp.ge.s32.totalorder %s2053_s21, 1  ;;  %p190_p8 = scmp.lt.s32.totalorder %s2053_s21, 3 }
   0xc   : > { %p191_p9 = pnand %p1809_p7, %p190_p8 }
   0xd   : > { %v1367_v0 = vld [vmem:[%s3380_s3] sm:$0xff] (!%p191_p9)  ;;  %v1368_v1 = vld [vmem:[%s3380_s3 + $0x8] sm:$0xff] (!%p191_p9)  ;;  %p218_p10 = scmp.lt.s32.totalorder (!%p191_p9), %s2110_s22, 1  ;;  %vm255_vm0 = vcmask (!%p191_p9), 130048   ;;  %v395_v2 = vlaneseq (!%p191_p9)  ;;  %v2055_v4 = vmov (!%p191_p9), 0.0   ;;  %s215_s8 = sand.u32 (!%p191_p9), 1, %s2045_s19  }
   0xe   : > { %194 = sbr.rel (%p191_p9) target bundleno = 461 (0x1cd), region = 40  ;;  %v2144_v3 = vpack.c.bf16 (!%p191_p9), %v1368_v1, %v1367_v0  ;;  %256 = vst.msk [vmem:[#allocation2] sm:$0xff] (!%p191_p9), %vm255_vm0, %v2055_v4  ;;  %257 = vst.msk [vmem:[#allocation2 + $0x8] sm:$0xff] (!%p191_p9), %vm255_vm0, %v2055_v4  ;;  %v361_v6 = vld [vmem:[%s3378_s1] sm:$0xff] (!%p191_p9)  ;;  %v2374_v56 = vld [vmem:[%s3378_s1 + $0x8] ss:$0 sm:$0xff] (!%p191_p9) }
   0xf   : > { %258 = vst.msk [vmem:[#allocation2 + $0x10] sm:$0xff] (!%p191_p9), %vm255_vm0, %v2055_v4  ;;  %260 = vst.msk [vmem:[#allocation2 + $0x20] sm:$0xff] (!%p191_p9), %vm255_vm0, %v2055_v4  ;;  %v2294_v5 = vshrl.u32 (!%p191_p9), %v395_v2, 7  ;;  %vm1697_vm1 = vcmask (!%p191_p9), 195584   ;;  %s1854_s13 = sshll.u32 (!%p191_p9), %s2110_s22, 12  ;;  %s2056_s25 = smov (!%p191_p9), [#allocation3]  }
  0x10   : > { %261 = vst.msk [vmem:[#allocation2 + $0x28] sm:$0xff] (!%p191_p9), %vm255_vm0, %v2055_v4  ;;  %262 = vst.msk [vmem:[#allocation2 + $0x30] sm:$0xff] (!%p191_p9), %vm255_vm0, %v2055_v4  ;;  %1942 = vmatprep.subr.bf16.mxu0 (!%p191_p9), %v2144_v3  ;;  %1945 = vmatprep.subr.bf16.mxu1 (!%p191_p9), %v2144_v3  ;;  %s3325_s17 = scalar_lea.hbm (!%p191_p9), %s3382_s5, %s1854_s13  ;;  %s1995_s26 = sshll.u32 (!%p191_p9), %s2056_s25, 4  ;;  %s1996_s26 = int_to_ptr.vmem [resolvable:$false] %s1995_s26 }
  0x11   : > { %264 = vst.msk [vmem:[#allocation2 + $0x40] sm:$0xff] (!%p191_p9), %vm255_vm0, %v2055_v4  ;;  %265 = vst.msk [vmem:[#allocation2 + $0x48] sm:$0xff] (!%p191_p9), %vm255_vm0, %v2055_v4  ;;  %1944 = vmatpush3.bf16.msra.mxu0 (!%p191_p9), %v2144_v3  ;;  %1946 = vmatpush3.bf16.msra.mxu1 (!%p191_p9), %v2144_v3  ;;  %v397_v7 = vsub.s32 (!%p191_p9), 0, %v2294_v5  ;;  %v497_v8 = vsub.s32 (!%p191_p9), 1, %v2294_v5  ;;  %v597_v9 = vsub.s32 (!%p191_p9), 2, %v2294_v5  ;;  %v697_v17 = vsub.s32 (!%p191_p9), 3, %v2294_v5 }
  0x12   : > { %266 = vst.msk [vmem:[#allocation2 + $0x50] sm:$0xff] (!%p191_p9), %vm255_vm0, %v2055_v4  ;;  %259 = vst.msk [vmem:[#allocation2 + $0x18] sm:$0xff] (!%p191_p9), %vm255_vm0, %v2055_v4  ;;  %v797_v18 = vsub.s32 (!%p191_p9), 4, %v2294_v5  ;;  %v897_v24 = vsub.s32 (!%p191_p9), 5, %v2294_v5  ;;  %v998_v25 = vsub.s32 (!%p191_p9), 6, %v2294_v5  ;;  %v1098_v29 = vsub.s32 (!%p191_p9), 7, %v2294_v5 }
  0x13   : > { %263 = vst.msk [vmem:[#allocation2 + $0x38] sm:$0xff] (!%p191_p9), %vm255_vm0, %v2055_v4  ;;  %267 = vst.msk [vmem:[#allocation2 + $0x58] sm:$0xff] (!%p191_p9), %vm255_vm0, %v2055_v4  ;;  %v2314_v13 = vrot.slane (!%p191_p9), %v361_v6, %v397_v7  ;;  %v2316_v14 = vrot.slane (!%p191_p9), %v361_v6, %v497_v8  ;;  %v2318_v15 = vrot.slane (!%p191_p9), %v361_v6, %v597_v9  ;;  %s1997_s30 = scalar_lea.vmem (!%p191_p9), %s1996_s26, 8192 }
  0x14   : > { %268 = vst.msk [vmem:[#allocation2 + $0x60] sm:$0xff] (!%p191_p9), %vm255_vm0, %v2055_v4  ;;  %269 = vst.msk [vmem:[#allocation2 + $0x68] sm:$0xff] (!%p191_p9), %vm255_vm0, %v2055_v4  ;;  %v2342_v39 = vrot.slane (!%p191_p9), %v361_v6, %v697_v17  ;;  %v2344_v40 = vrot.slane (!%p191_p9), %v361_v6, %v797_v18  ;;  %v2353_v45 = vrot.slane (!%p191_p9), %v361_v6, %v897_v24 }
  0x15   : > { %270 = vst.msk [vmem:[#allocation2 + $0x70] sm:$0xff] %vm255_vm0, %v2055_v4  ;;  %271 = vst.msk [vmem:[#allocation2 + $0x78] sm:$0xff] %vm255_vm0, %v2055_v4  ;;  %s219_s9 = scalar_select %p218_p10, %s2110_s22, 1  ;;  %v363_v21 = vld [vmem:[#allocation2 + $0x7] sm:$0xff]  ;;  %v2355_v46 = vrot.slane %v361_v6, %v998_v25  ;;  %v2363_v52 = vrot.slane %v361_v6, %v1098_v29 }
  0x16   : > { %272 = vst.msk [vmem:[#allocation2 + $0x80] sm:$0xff] %vm255_vm0, %v2055_v4  ;;  %273 = vst.msk [vmem:[#allocation2 + $0x88] sm:$0xff] %vm255_vm0, %v2055_v4  ;;  %v463_v22 = vld [vmem:[#allocation2 + $0x8] sm:$0xff]  ;;  %v399_v26 = vmul.f32 %v2314_v13, %v363_v21  ;;  %v464_v31 = vld [vmem:[#allocation2 + $0x10] sm:$0xff]  ;;  %s3336_s22 = scalar_lea.sflag [#allocation4], %s215_s8 }
  0x17   : > { %274 = vst.msk [vmem:[#allocation2 + $0x90] sm:$0xff] %vm255_vm0, %v2055_v4  ;;  %275 = vst.msk [vmem:[#allocation2 + $0x98] sm:$0xff] %vm255_vm0, %v2055_v4  ;;  %s1853_s12 = sshll.u32 %s219_s9, 8  ;;  %v563_v23 = vld [vmem:[#allocation2 + $0x9] sm:$0xff]  ;;  %v499_v27 = vmul.f32 %v2316_v14, %v463_v22  ;;  %v500_v34 = vmul.f32 %v2316_v14, %v464_v31  ;;  %s1810_s9 = sshll.u32 %s215_s8, 8 }
  0x18   : > { %276 = vst.msk [vmem:[#allocation2 + $0xa0] sm:$0xff] %vm255_vm0, %v2055_v4  ;;  %277 = vst.msk [vmem:[#allocation2 + $0xa8] sm:$0xff] %vm255_vm0, %v2055_v4  ;;  %s2309_s15 = scalar_lea.vmem %s3377_s0, %s1853_s12  ;;  %v599_v28 = vmul.f32 %v2318_v15, %v563_v23  ;;  %v364_v30 = vld [vmem:[#allocation2 + $0xf] sm:$0xff]  ;;  %s3229_s12 = scalar_lea.vmem [#allocation3], %s1810_s9 }
  0x19   : > { %278 = vst.msk [vmem:[#allocation2 + $0xb0] sm:$0xff] %vm255_vm0, %v2055_v4  ;;  %279 = vst.msk [vmem:[#allocation2 + $0xb8] sm:$0xff] %vm255_vm0, %v2055_v4  ;;  %v223_v10 = vld [vmem:[%s2309_s15] sm:$0xff]  ;;  %v224_v11 = vld [vmem:[%s2309_s15 + $0x8] sm:$0xff]  ;;  %v400_v33 = vmul.f32 %v2314_v13, %v364_v30  ;;  %v531_v38 = vadd.f32 %v499_v27, %v399_v26  ;;  %s1744_s14 = sshll.u32 %s3229_s12, 4  ;;  %s3327_s14 = int_to_ptr.vmem [resolvable:$true] %s1744_s14 }
  0x1a   : > { %280 = vst.msk [vmem:[#allocation2 + $0xc0] sm:$0xff] %vm255_vm0, %v2055_v4  ;;  %281 = vst.msk [vmem:[#allocation2 + $0xc8] sm:$0xff] %vm255_vm0, %v2055_v4  ;;  %v225_v12 = vld [vmem:[%s2309_s15 + $0x10] sm:$0xff]  ;;  %v226_v16 = vld [vmem:[%s2309_s15 + $0x18] sm:$0xff]  ;;  %s1991_s23 = scalar_lea.vmem %s3327_s14, 4096  ;;  %p1998_p0 = scmp.lt.s32.totalorder %s3327_s14, %s1996_s26 }
  0x1b   : > { %282 = vst.msk [vmem:[#allocation2 + $0xd0] sm:$0xff] %vm255_vm0, %v2055_v4  ;;  %283 = vst.msk [vmem:[#allocation2 + $0xd8] sm:$0xff] %vm255_vm0, %v2055_v4  ;;  %v237_v19 = vld [vmem:[%s2309_s15 + $0x70] sm:$0xff]  ;;  %v238_v20 = vld [vmem:[%s2309_s15 + $0x78] sm:$0xff]  ;;  %v532_v47 = vadd.f32 %v500_v34, %v400_v33  ;;  %v631_v51 = vadd.f32 %v599_v28, %v531_v38  ;;  %p1992_p11 = scmp.ne.s32.totalorder %s3327_s14, %s1991_s23  ;;  %p1999_p1 = scmp.lt.s32.totalorder %s1997_s30, %s1991_s23 }
  0x1c   : > { %284 = vst.msk [vmem:[#allocation2 + $0xe0] sm:$0xff] %vm255_vm0, %v2055_v4  ;;  %285 = vst.msk [vmem:[#allocation2 + $0xe8] sm:$0xff] %vm255_vm0, %v2055_v4  ;;  %v564_v32 = vld [vmem:[#allocation2 + $0x11] sm:$0xff]  ;;  %v239_v35 = vld [vmem:[%s2309_s15 + $0x80] sm:$0xff] }
  0x1d   : > { %286 = vst.msk [vmem:[#allocation2 + $0xf0] sm:$0xff] %vm255_vm0, %v2055_v4  ;;  %287 = vst.msk [vmem:[#allocation2 + $0xf8] sm:$0xff] %vm255_vm0, %v2055_v4  ;;  %v240_v36 = vld [vmem:[%s2309_s15 + $0x88] sm:$0xff]  ;;  %v241_v37 = vld [vmem:[%s2309_s15 + $0x90] sm:$0xff]  ;;  %v600_v41 = vmul.f32 %v2318_v15, %v564_v32  ;;  %p1993_p12 = pnand %p1992_p11, %p2127_p5  ;;  %p2000_p2 = por %p1999_p1, %p1998_p0 }
  0x1e   : > { %288 = vst.msk [vmem:[#allocation2 + $0x100] sm:$0xff] %vm255_vm0, %v2055_v4  ;;  %289 = vst.msk [vmem:[#allocation2 + $0x108] sm:$0xff] %vm255_vm0, %v2055_v4  ;;  %v242_v42 = vld [vmem:[%s2309_s15 + $0x98] sm:$0xff]  ;;  %v227_v43 = vld [vmem:[%s2309_s15 + $0x20] sm:$0xff] }
  0x1f   : > { %290 = vst.msk [vmem:[#allocation2 + $0x110] sm:$0xff] %vm255_vm0, %v2055_v4  ;;  %291 = vst.msk [vmem:[#allocation2 + $0x118] sm:$0xff] %vm255_vm0, %v2055_v4  ;;  %v228_v44 = vld [vmem:[%s2309_s15 + $0x28] sm:$0xff]  ;;  %v243_v48 = vld [vmem:[%s2309_s15 + $0xa0] sm:$0xff]  ;;  %v632_v0 = vadd.f32 %v600_v41, %v532_v47  ;;  %p1994_p13 = pneg %p1993_p12 }
  0x20   : > { %292 = vst.msk [vmem:[#allocation2 + $0x120] sm:$0xff] %vm255_vm0, %v2055_v4  ;;  %293 = vst.msk [vmem:[#allocation2 + $0x128] sm:$0xff] %vm255_vm0, %v2055_v4  ;;  %v244_v49 = vld [vmem:[%s2309_s15 + $0xa8] sm:$0xff]  ;;  %v229_v50 = vld [vmem:[%s2309_s15 + $0x30] sm:$0xff] }
  0x21   : > { %294 = vst.msk [vmem:[#allocation2 + $0x130] sm:$0xff] %vm255_vm0, %v2055_v4  ;;  %295 = vst.msk [vmem:[#allocation2 + $0x138] sm:$0xff] %vm255_vm0, %v2055_v4  ;;  %v230_v53 = vld [vmem:[%s2309_s15 + $0x38] sm:$0xff]  ;;  %v245_v54 = vld [vmem:[%s2309_s15 + $0xb0] sm:$0xff]  ;;  %p2001_p3 = pnand %p2000_p2, %p1994_p13 }
  0x22   : > { %296 = vst.msk [vmem:[#allocation2 + $0x140] sm:$0xff] %vm255_vm0, %v2055_v4  ;;  %297 = vst.msk [vmem:[#allocation2 + $0x148] sm:$0xff] %vm255_vm0, %v2055_v4  ;;  %v246_v55 = vld [vmem:[%s2309_s15 + $0xb8] sm:$0xff] }
  0x23   : > { %298 = vst.msk [vmem:[#allocation2 + $0x150] sm:$0xff] %vm255_vm0, %v2055_v4  ;;  %299 = vst.msk [vmem:[#allocation2 + $0x158] sm:$0xff] %vm255_vm0, %v2055_v4 }
  0x24   : > { %300 = vst.msk [vmem:[#allocation2 + $0x160] sm:$0xff] %vm255_vm0, %v2055_v4  ;;  %301 = vst.msk [vmem:[#allocation2 + $0x168] sm:$0xff] %vm255_vm0, %v2055_v4 }
  0x25   : > { %302 = vst.msk [vmem:[#allocation2 + $0x170] sm:$0xff] %vm255_vm0, %v2055_v4  ;;  %303 = vst.msk [vmem:[#allocation2 + $0x178] sm:$0xff] %vm255_vm0, %v2055_v4 }
  0x26   : > { %304 = vst.msk [vmem:[#allocation2 + $0x180] sm:$0xff] %vm255_vm0, %v2055_v4  ;;  %305 = vst.msk [vmem:[#allocation2 + $0x188] sm:$0xff] %vm255_vm0, %v2055_v4 }
  0x27   : > { %306 = vst.msk [vmem:[#allocation2 + $0x190] sm:$0xff] %vm255_vm0, %v2055_v4  ;;  %307 = vst.msk [vmem:[#allocation2 + $0x198] sm:$0xff] %vm255_vm0, %v2055_v4 }
  0x28   : > { %308 = vst.msk [vmem:[#allocation2 + $0x1a0] sm:$0xff] %vm255_vm0, %v2055_v4  ;;  %309 = vst.msk [vmem:[#allocation2 + $0x1a8] sm:$0xff] %vm255_vm0, %v2055_v4 }
  0x29   : > { %310 = vst.msk [vmem:[#allocation2 + $0x1b0] sm:$0xff] %vm255_vm0, %v2055_v4  ;;  %311 = vst.msk [vmem:[#allocation2 + $0x1b8] sm:$0xff] %vm255_vm0, %v2055_v4 }
  0x2a   : > { %312 = vst.msk [vmem:[#allocation2 + $0x1c0] sm:$0xff] %vm255_vm0, %v2055_v4  ;;  %313 = vst.msk [vmem:[#allocation2 + $0x1c8] sm:$0xff] %vm255_vm0, %v2055_v4 }
  0x2b   : > { %314 = vst.msk [vmem:[#allocation2 + $0x1d0] sm:$0xff] %vm255_vm0, %v2055_v4  ;;  %315 = vst.msk [vmem:[#allocation2 + $0x1d8] sm:$0xff] %vm255_vm0, %v2055_v4 }
  0x2c   : > { %316 = vst.msk [vmem:[#allocation2 + $0x1e0] sm:$0xff] %vm255_vm0, %v2055_v4  ;;  %317 = vst.msk [vmem:[#allocation2 + $0x1e8] sm:$0xff] %vm255_vm0, %v2055_v4 }
  0x2d   : > { %318 = vst.msk [vmem:[#allocation2 + $0x1f0] sm:$0xff] %vm255_vm0, %v2055_v4  ;;  %319 = vst.msk [vmem:[#allocation2 + $0x1f8] sm:$0xff] %vm255_vm0, %v2055_v4 }
  0x2e   : > { %320 = vst.msk [vmem:[#allocation2 + $0x200] sm:$0xff] %vm255_vm0, %v2055_v4  ;;  %321 = vst.msk [vmem:[#allocation2 + $0x208] sm:$0xff] %vm255_vm0, %v2055_v4 }
  0x2f   : > { %322 = vst.msk [vmem:[#allocation2 + $0x210] sm:$0xff] %vm255_vm0, %v2055_v4  ;;  %323 = vst.msk [vmem:[#allocation2 + $0x218] sm:$0xff] %vm255_vm0, %v2055_v4 }
  0x30   : > { %324 = vst.msk [vmem:[#allocation2 + $0x220] sm:$0xff] %vm255_vm0, %v2055_v4  ;;  %325 = vst.msk [vmem:[#allocation2 + $0x228] sm:$0xff] %vm255_vm0, %v2055_v4 }
  0x31   : > { %326 = vst.msk [vmem:[#allocation2 + $0x230] sm:$0xff] %vm255_vm0, %v2055_v4  ;;  %327 = vst.msk [vmem:[#allocation2 + $0x238] sm:$0xff] %vm255_vm0, %v2055_v4 }
  0x32   : > { %329 = vst.msk [vmem:[#allocation2 + $0x28] sm:$0xff] %vm255_vm0, %v223_v10  ;;  %330 = vst.msk [vmem:[#allocation2 + $0x30] sm:$0xff] %vm255_vm0, %v224_v11 }
  0x33   : > { %331 = vst.msk [vmem:[#allocation2 + $0x48] sm:$0xff] %vm255_vm0, %v225_v12  ;;  %332 = vst.msk [vmem:[#allocation2 + $0x50] sm:$0xff] %vm255_vm0, %v226_v16 }
  0x34   : > { %343 = vst.msk [vmem:[#allocation2 + $0x108] sm:$0xff] %vm255_vm0, %v237_v19  ;;  %344 = vst.msk [vmem:[#allocation2 + $0x110] sm:$0xff] %vm255_vm0, %v238_v20 }
  0x35   : > { %345 = vst.msk [vmem:[#allocation2 + $0x128] sm:$0xff] %vm255_vm0, %v239_v35  ;;  %346 = vst.msk [vmem:[#allocation2 + $0x130] sm:$0xff] %vm255_vm0, %v240_v36 }
  0x36   : > { %347 = vst.msk [vmem:[#allocation2 + $0x148] sm:$0xff] %vm255_vm0, %v241_v37  ;;  %348 = vst.msk [vmem:[#allocation2 + $0x150] sm:$0xff] %vm255_vm0, %v242_v42 }
  0x37   : > { %333 = vst.msk [vmem:[#allocation2 + $0x68] sm:$0xff] %vm255_vm0, %v227_v43  ;;  %334 = vst.msk [vmem:[#allocation2 + $0x70] sm:$0xff] %vm255_vm0, %v228_v44 }
  0x38   : > { %349 = vst.msk [vmem:[#allocation2 + $0x168] sm:$0xff] %vm255_vm0, %v243_v48  ;;  %350 = vst.msk [vmem:[#allocation2 + $0x170] sm:$0xff] %vm255_vm0, %v244_v49 }
  0x39   : > { %335 = vst.msk [vmem:[#allocation2 + $0x88] sm:$0xff] %vm255_vm0, %v229_v50  ;;  %v663_v57 = vld [vmem:[#allocation2 + $0x27] sm:$0xff]  ;;  %336 = vst.msk [vmem:[#allocation2 + $0x90] sm:$0xff] %vm255_vm0, %v230_v53  ;;  %v2393_v4 = vld [vmem:[#allocation2 + $0x2f] sm:$0xff] }
  0x3a   : > { %v763_v58 = vld [vmem:[#allocation2 + $0x28] sm:$0xff]  ;;  %351 = vst.msk [vmem:[#allocation2 + $0x188] sm:$0xff] %vm255_vm0, %v245_v54  ;;  %352 = vst.msk [vmem:[#allocation2 + $0x190] sm:$0xff] %vm255_vm0, %v246_v55  ;;  %v699_v59 = vmul.f32 %v2342_v39, %v663_v57  ;;  %v2395_v5 = vld [vmem:[#allocation2 + $0x30] sm:$0xff]  ;;  %v401_v6 = vmul.f32 %v663_v57, %v2314_v13  ;;  %v700_v10 = vmul.f32 %v2342_v39, %v2393_v4 }
  0x3b   : > { %v799_v60 = vmul.f32 %v2344_v40, %v763_v58  ;;  %v2381_v61 = vld [vmem:[#allocation2 + $0x29] sm:$0xff]  ;;  %v501_v7 = vmul.f32 %v763_v58, %v2316_v14  ;;  %v800_v11 = vmul.f32 %v2344_v40, %v2395_v5  ;;  %v2405_v12 = vld [vmem:[#allocation2 + $0x31] sm:$0xff] }
  0x3c   : > { %v2383_v62 = vld [vmem:[#allocation2 + $0x47] sm:$0xff]  ;;  %v899_v1 = vmul.f32 %v2353_v45, %v2381_v61  ;;  %v731_v8 = vadd.f32 %v699_v59, %v631_v51  ;;  %v2407_v16 = vld [vmem:[#allocation2 + $0x4f] sm:$0xff]  ;;  %v900_v19 = vmul.f32 %v2353_v45, %v2405_v12  ;;  %v732_v26 = vadd.f32 %v700_v10, %v632_v0 }
  0x3d   : > { %v2385_v63 = vld [vmem:[#allocation2 + $0x48] sm:$0xff]  ;;  %v1000_v2 = vmul.f32 %v2355_v46, %v2383_v62  ;;  %v2409_v17 = vld [vmem:[#allocation2 + $0x50] sm:$0xff]  ;;  %v1001_v20 = vmul.f32 %v2355_v46, %v2407_v16  ;;  %v533_v37 = vadd.f32 %v501_v7, %v401_v6 }
  0x3e   : > { %v2391_v3 = vld [vmem:[#allocation2 + $0x49] sm:$0xff]  ;;  %v1100_v9 = vmul.f32 %v2363_v52, %v2385_v63  ;;  %v1101_v21 = vmul.f32 %v2363_v52, %v2409_v17  ;;  %v831_v25 = vadd.f32 %v799_v60, %v731_v8  ;;  %v2419_v27 = vld [vmem:[#allocation2 + $0x51] sm:$0xff]  ;;  %v832_v41 = vadd.f32 %v800_v11, %v732_v26 }
  0x3f   : > { %v1200_v18 = vmul.f32 %v2374_v56, %v2391_v3  ;;  %v379_v22 = vld [vmem:[#allocation2 + $0x107] sm:$0xff]  ;;  %v1201_v31 = vmul.f32 %v2374_v56, %v2419_v27  ;;  %v380_v44 = vld [vmem:[#allocation2 + $0x10f] sm:$0xff] }
  0x40   : > { %v479_v23 = vld [vmem:[#allocation2 + $0x108] sm:$0xff]  ;;  %v415_v28 = vmul.f32 %v2314_v13, %v379_v22  ;;  %v931_v38 = vadd.f32 %v899_v1, %v831_v25  ;;  %v480_v47 = vld [vmem:[#allocation2 + $0x110] sm:$0xff]  ;;  %v416_v51 = vmul.f32 %v2314_v13, %v380_v44  ;;  %v932_v57 = vadd.f32 %v900_v19, %v832_v41  ;;  %v2470_v25 = vld [vmem:[%s3379_s2] ss:$0 sm:$0xff] }
  0x41   : > { %v579_v24 = vld [vmem:[#allocation2 + $0x109] sm:$0xff]  ;;  %v515_v29 = vmul.f32 %v2316_v14, %v479_v23  ;;  %v580_v48 = vld [vmem:[#allocation2 + $0x111] sm:$0xff]  ;;  %v516_v53 = vmul.f32 %v2316_v14, %v480_v47  ;;  %v701_v41 = vmul.f32 %v2383_v62, %v2342_v39 }
  0x42   : > { %v2423_v30 = vld [vmem:[#allocation2 + $0x127] sm:$0xff]  ;;  %v615_v32 = vmul.f32 %v2318_v15, %v579_v24  ;;  %v2444_v54 = vld [vmem:[#allocation2 + $0x12f] sm:$0xff]  ;;  %v1032_v55 = vadd.f32 %v1000_v2, %v931_v38  ;;  %v616_v0 = vmul.f32 %v2318_v15, %v580_v48  ;;  %v1033_v11 = vadd.f32 %v1001_v20, %v932_v57 }
  0x43   : > { %v715_v33 = vmul.f32 %v2342_v39, %v2423_v30  ;;  %v2430_v34 = vld [vmem:[#allocation2 + $0x128] sm:$0xff]  ;;  %v547_v42 = vadd.f32 %v515_v29, %v415_v28  ;;  %v548_v7 = vadd.f32 %v516_v53, %v416_v51  ;;  %v716_v8 = vmul.f32 %v2342_v39, %v2444_v54  ;;  %v2459_v2 = vld [vmem:[#allocation2 + $0x130] sm:$0xff] }
  0x44   : > { %v2432_v35 = vld [vmem:[#allocation2 + $0x129] sm:$0xff]  ;;  %v815_v43 = vmul.f32 %v2344_v40, %v2430_v34  ;;  %v1132_v10 = vadd.f32 %v1100_v9, %v1032_v55  ;;  %v816_v22 = vmul.f32 %v2344_v40, %v2459_v2  ;;  %v2463_v23 = vld [vmem:[#allocation2 + $0x131] sm:$0xff]  ;;  %v601_v20 = vmul.f32 %v2381_v61, %v2318_v15 }
  0x45   : > { %v2434_v36 = vld [vmem:[#allocation2 + $0x147] sm:$0xff]  ;;  %v915_v49 = vmul.f32 %v2353_v45, %v2432_v35  ;;  %v647_v58 = vadd.f32 %v615_v32, %v547_v42  ;;  %v2465_v24 = vld [vmem:[#allocation2 + $0x14f] sm:$0xff]  ;;  %v648_v26 = vadd.f32 %v616_v0, %v548_v7  ;;  %v916_v28 = vmul.f32 %v2353_v45, %v2463_v23 }
  0x46   : > { %v1016_v50 = vmul.f32 %v2355_v46, %v2434_v36  ;;  %v2446_v59 = vld [vmem:[#allocation2 + $0x148] sm:$0xff]  ;;  %v1017_v9 = vmul.f32 %v2355_v46, %v2465_v24  ;;  %v1232_v29 = vadd.f32 %v1200_v18, %v1132_v10  ;;  %v1133_v32 = vadd.f32 %v1101_v21, %v1033_v11  ;;  %v2478_v38 = vld [vmem:[#allocation2 + $0x150] sm:$0xff] }
  0x47   : > { %v2448_v60 = vld [vmem:[#allocation2 + $0x149] sm:$0xff]  ;;  %v1116_v1 = vmul.f32 %v2363_v52, %v2446_v59  ;;  %v747_v19 = vadd.f32 %v715_v33, %v647_v58  ;;  %v748_v42 = vadd.f32 %v716_v8, %v648_v26  ;;  %v1117_v44 = vmul.f32 %v2363_v52, %v2478_v38  ;;  %v2484_v47 = vld [vmem:[#allocation2 + $0x151] sm:$0xff] }
  0x48   : > { %v2455_v6 = vmul.f32 %v2374_v56, %v2448_v60  ;;  %v633_v48 = vadd.f32 %v601_v20, %v533_v37  ;;  %v801_v51 = vmul.f32 %v2385_v63, %v2344_v40  ;;  %v1271_v61 = vadd.f32 %v2470_v25, %v1232_v29  ;;  %v2491_v53 = vld [vmem:[#allocation2 + $0x67] sm:$0xff] }
  0x49   : > { %v847_v33 = vadd.f32 %v815_v43, %v747_v19  ;;  %v1233_v18 = vadd.f32 %v1201_v31, %v1133_v32  ;;  %v1217_v43 = vmul.f32 %v2374_v56, %v2484_v47  ;;  %v848_v55 = vadd.f32 %v816_v22, %v748_v42  ;;  %v2498_v7 = vld [vmem:[#allocation2 + $0x68] sm:$0xff]  ;;  %v231_v20 = vld [vmem:[%s2309_s15 + $0x40] sm:$0xff] }
  0x4a   : > { %v733_v57 = vadd.f32 %v701_v41, %v633_v48  ;;  %v901_v37 = vmul.f32 %v2391_v3, %v2353_v45  ;;  %v1002_v58 = vmul.f32 %v2355_v46, %v2491_v53  ;;  %v1303_v0 = vmax.f32 %v1271_v61, 0.0  ;;  %v2502_v19 = vld [vmem:[#allocation2 + $0x69] sm:$0xff]  ;;  %v247_v29 = vld [vmem:[%s2309_s15 + $0xc0] sm:$0xff]  ;;  %337 = vst.msk [vmem:[#allocation2 + $0xa8] sm:$0xff] %vm255_vm0, %v231_v20 }
  0x4b   : > { %v947_v21 = vadd.f32 %v915_v49, %v847_v33  ;;  %v1272_v31 = vadd.f32 %v2470_v25, %v1233_v18  ;;  %v402_v8 = vmul.f32 %v2393_v4, %v2314_v13  ;;  %v948_v10 = vadd.f32 %v916_v28, %v848_v55  ;;  %353 = vst.msk [vmem:[#allocation2 + $0x1a8] sm:$0xff] %vm255_vm0, %v247_v29  ;;  %v234_v28 = vld [vmem:[%s2309_s15 + $0x58] sm:$0xff]  ;;  %v249_v61 = vld [vmem:[%s2309_s15 + $0xd0] sm:$0xff] }
  0x4c   : > { %v833_v11 = vadd.f32 %v801_v51, %v733_v57  ;;  %v502_v22 = vmul.f32 %v2395_v5, %v2316_v14  ;;  %v602_v26 = vmul.f32 %v2405_v12, %v2318_v15  ;;  %v1335_v32 = vmin.f32 %v1303_v0, 6.0  ;;  %v248_v5 = vld [vmem:[%s2309_s15 + $0xc8] sm:$0xff]  ;;  %v233_v12 = vld [vmem:[%s2309_s15 + $0x50] sm:$0xff]  ;;  %340 = vst.msk [vmem:[#allocation2 + $0xd0] sm:$0xff] %vm255_vm0, %v234_v28  ;;  %v250_v18 = vld [vmem:[%s2309_s15 + $0xd8] sm:$0xff] }
  0x4d   : > { %v1048_v49 = vadd.f32 %v1016_v50, %v947_v21  ;;  %v232_v50 = vld [vmem:[%s2309_s15 + $0x48] sm:$0xff]  ;;  %v1304_v33 = vmax.f32 %v1272_v31, 0.0  ;;  %v1102_v4 = vmul.f32 %v2363_v52, %v2498_v7  ;;  %v1049_v42 = vadd.f32 %v1017_v9, %v948_v10  ;;  %354 = vst.msk [vmem:[#allocation2 + $0x1b0] sm:$0xff] %vm255_vm0, %v248_v5  ;;  %339 = vst.msk [vmem:[#allocation2 + $0xc8] sm:$0xff] %vm255_vm0, %v233_v12  ;;  %v235_v21 = vld [vmem:[%s2309_s15 + $0x60] sm:$0xff] }
  0x4e   : > { %338 = vst.msk [vmem:[#allocation2 + $0xb0] sm:$0xff] %vm255_vm0, %v232_v50  ;;  %v933_v48 = vadd.f32 %v901_v37, %v833_v11  ;;  %v534_v51 = vadd.f32 %v502_v22, %v402_v8  ;;  %1893 = vmatprep.mubr.msk.f32.mxu0 %vm255_vm0, %v1335_v32  ;;  %v1202_v57 = vmul.f32 %v2374_v56, %v2502_v19  ;;  %355 = vst.msk [vmem:[#allocation2 + $0x1c8] sm:$0xff] %vm255_vm0, %v249_v61  ;;  %v236_v37 = vld [vmem:[%s2309_s15 + $0x68] sm:$0xff]  ;;  %v251_v0 = vld [vmem:[%s2309_s15 + $0xe0] sm:$0xff] }
  0x4f   : > { %v1148_v41 = vadd.f32 %v1116_v1, %v1048_v49  ;;  %v702_v1 = vmul.f32 %v2407_v16, %v2342_v39  ;;  %v1336_v9 = vmin.f32 %v1304_v33, 6.0  ;;  %356 = vst.msk [vmem:[#allocation2 + $0x1d0] sm:$0xff] %vm255_vm0, %v250_v18  ;;  %341 = vst.msk [vmem:[#allocation2 + $0xe8] sm:$0xff] %vm255_vm0, %v235_v21  ;;  %v252_v31 = vld [vmem:[%s2309_s15 + $0xe8] sm:$0xff]  ;;  %v1149_v49 = vadd.f32 %v1117_v44, %v1049_v42  ;;  %v253_v32 = vld [vmem:[%s2309_s15 + $0xf0] sm:$0xff] }
  0x50   : > { %v1034_v8 = vadd.f32 %v1002_v58, %v933_v48  ;;  %v634_v10 = vadd.f32 %v602_v26, %v534_v51  ;;  %342 = vst.msk [vmem:[#allocation2 + $0xf0] sm:$0xff] %vm255_vm0, %v236_v37  ;;  %357 = vst.msk [vmem:[#allocation2 + $0x1e8] sm:$0xff] %vm255_vm0, %v251_v0  ;;  %v902_v44 = vmul.f32 %v2419_v27, %v2353_v45  ;;  %v254_v33 = vld [vmem:[%s2309_s15 + $0xf8] sm:$0xff]  ;;  %v2554_v5 = vld [vmem:[#allocation2 + $0x6f] sm:$0xff] }
  0x51   : > { %v1248_v55 = vadd.f32 %v2455_v6, %v1148_v41  ;;  %v802_v6 = vmul.f32 %v2409_v17, %v2344_v40  ;;  %358 = vst.msk [vmem:[#allocation2 + $0x1f0] sm:$0xff] %vm255_vm0, %v252_v31  ;;  %1894 = vmatmul.mubr.msk.f32.vlgmr.msra.gmra.mrb[0].mxu0 %vm255_vm0, %v1336_v9  ;;  %v417_v58 = vmul.f32 %v2423_v30, %v2314_v13  ;;  %359 = vst.msk [vmem:[#allocation2 + $0x208] sm:$0xff] %vm255_vm0, %v253_v32 }
  0x52   : > { %v517_v22 = vmul.f32 %v2430_v34, %v2316_v14  ;;  %v1249_v26 = vadd.f32 %v1217_v43, %v1149_v49  ;;  %v1134_v20 = vadd.f32 %v1102_v4, %v1034_v8  ;;  %v734_v50 = vadd.f32 %v702_v1, %v634_v10  ;;  %360 = vst.msk [vmem:[#allocation2 + $0x210] sm:$0xff] %vm255_vm0, %v254_v33  ;;  %v2563_v4 = vld [vmem:[#allocation2 + $0x70] sm:$0xff] }
  0x53   : > { %v1287_v11 = vadd.f32 %v2470_v25, %v1248_v55  ;;  %v617_v29 = vmul.f32 %v2432_v35, %v2318_v15  ;;  %v717_v28 = vmul.f32 %v2434_v36, %v2342_v39  ;;  %v1003_v35 = vmul.f32 %v2355_v46, %v2554_v5  ;;  %v2573_v55 = vld [vmem:[#allocation2 + $0x71] sm:$0xff] }
  0x54   : > { %v549_v12 = vadd.f32 %v517_v22, %v417_v58  ;;  %v1288_v30 = vadd.f32 %v2470_v25, %v1249_v26  ;;  %v1234_v34 = vadd.f32 %v1202_v57, %v1134_v20  ;;  %v834_v43 = vadd.f32 %v802_v6, %v734_v50  ;;  %v2587_v22 = vld [vmem:[#allocation2 + $0x168] sm:$0xff] }
  0x55   : > { %v1319_v41 = vmax.f32 %v1287_v11, 0.0  ;;  %v1103_v48 = vmul.f32 %v2363_v52, %v2563_v4  ;;  %v817_v1 = vmul.f32 %v2446_v59, %v2344_v40  ;;  %v917_v9 = vmul.f32 %v2448_v60, %v2353_v45  ;;  %v2583_v11 = vld [vmem:[#allocation2 + $0x167] sm:$0xff] }
  0x56   : > { %v649_v51 = vadd.f32 %v617_v29, %v549_v12  ;;  %v1320_v61 = vmax.f32 %v1288_v30, 0.0  ;;  %v1273_v18 = vadd.f32 %v2470_v25, %v1234_v34  ;;  %v934_v21 = vadd.f32 %v902_v44, %v834_v43  ;;  %v2605_v34 = vld [vmem:[#allocation2 + $0x16f] sm:$0xff] }
  0x57   : > { %v1351_v42 = vmin.f32 %v1319_v41, 6.0  ;;  %v418_v37 = vmul.f32 %v2444_v54, %v2314_v13  ;;  %v518_v0 = vmul.f32 %v2459_v2, %v2316_v14  ;;  %v618_v31 = vmul.f32 %v2463_v23, %v2318_v15  ;;  %v2589_v54 = vld [vmem:[#allocation2 + $0x169] sm:$0xff] }
  0x58   : > { %v749_v57 = vadd.f32 %v717_v28, %v649_v51  ;;  %v1352_v49 = vmin.f32 %v1320_v61, 6.0  ;;  %v1305_v8 = vmax.f32 %v1273_v18, 0.0  ;;  %v1035_v10 = vadd.f32 %v1003_v35, %v934_v21  ;;  %v2607_v43 = vld [vmem:[#allocation2 + $0x170] sm:$0xff] }
  0x59   : > { %1917 = vmatprep.mubr.msk.f32.mxu1 %vm255_vm0, %v1351_v42  ;;  %v1203_v6 = vmul.f32 %v2374_v56, %v2573_v55  ;;  %v1018_v58 = vmul.f32 %v2355_v46, %v2583_v11  ;;  %v550_v2 = vadd.f32 %v518_v0, %v418_v37  ;;  %v718_v23 = vmul.f32 %v2465_v24, %v2342_v39  ;;  %v2617_v61 = vld [vmem:[#allocation2 + $0x171] sm:$0xff] }
  0x5a   : > { %v849_v44 = vadd.f32 %v817_v1, %v749_v57  ;;  %1918 = vmatmul.mubr.msk.f32.vlgmr.msra.gmra.mrb[0].mxu1 %vm255_vm0, %v1352_v49  ;;  %v1337_v26 = vmin.f32 %v1305_v8, 6.0  ;;  %v1135_v20 = vadd.f32 %v1103_v48, %v1035_v10  ;;  %v1118_v50 = vmul.f32 %v2363_v52, %v2587_v22  ;;  %v2628_v8 = vld [vmem:[#allocation2 + $0x87] sm:$0xff] }
  0x5b   : > { %v1218_v29 = vmul.f32 %v2374_v56, %v2589_v54  ;;  %v650_v33 = vadd.f32 %v618_v31, %v550_v2  ;;  %v818_v41 = vmul.f32 %v2478_v38, %v2344_v40  ;;  %v403_v12 = vmul.f32 %v2383_v62, %v2314_v13 }
  0x5c   : > { %v949_v32 = vadd.f32 %v917_v9, %v849_v44  ;;  %1896 = vmatprep.mubr.msk.f32.mxu0 %vm255_vm0, %v1337_v26  ;;  %v1235_v28 = vadd.f32 %v1203_v6, %v1135_v20  ;;  %v918_v30 = vmul.f32 %v2484_v47, %v2353_v45  ;;  %v503_v35 = vmul.f32 %v2385_v63, %v2316_v14  ;;  %v2638_v20 = vld [vmem:[#allocation2 + $0x88] sm:$0xff] }
  0x5d   : > { %v603_v42 = vmul.f32 %v2391_v3, %v2318_v15  ;;  %v750_v51 = vadd.f32 %v718_v23, %v650_v33  ;;  %v1019_v62 = vmul.f32 %v2355_v46, %v2605_v34  ;;  %v1119_v1 = vmul.f32 %v2363_v52, %v2607_v43 }
  0x5e   : > { %v1050_v48 = vadd.f32 %v1018_v58, %v949_v32  ;;  %v1274_v18 = vadd.f32 %v2470_v25, %v1235_v28  ;;  %v1219_v21 = vmul.f32 %v2374_v56, %v2617_v61  ;;  %v535_v9 = vadd.f32 %v503_v35, %v403_v12 }
  0x5f   : > { %v703_v63 = vmul.f32 %v2491_v53, %v2342_v39  ;;  %v850_v57 = vadd.f32 %v818_v41, %v750_v51  ;;  %v803_v37 = vmul.f32 %v2498_v7, %v2344_v40  ;;  %v404_v0 = vmul.f32 %v2407_v16, %v2314_v13  ;;  %v2654_v51 = vld [vmem:[#allocation2 + $0x8f] sm:$0xff] }
  0x60   : > { %v1150_v3 = vadd.f32 %v1118_v50, %v1050_v48  ;;  %v1306_v31 = vmax.f32 %v1274_v18, 0.0  ;;  %v635_v49 = vadd.f32 %v603_v42, %v535_v9  ;;  %v504_v10 = vmul.f32 %v2409_v17, %v2316_v14  ;;  %v2640_v50 = vld [vmem:[#allocation2 + $0x89] sm:$0xff] }
  0x61   : > { %v604_v6 = vmul.f32 %v2419_v27, %v2318_v15  ;;  %v950_v58 = vadd.f32 %v918_v30, %v850_v57  ;;  %v903_v2 = vmul.f32 %v2502_v19, %v2353_v45  ;;  %v1004_v23 = vmul.f32 %v2355_v46, %v2628_v8 }
  0x62   : > { %v1250_v44 = vadd.f32 %v1218_v29, %v1150_v3  ;;  %v1338_v26 = vmin.f32 %v1306_v31, 6.0  ;;  %v735_v16 = vadd.f32 %v703_v63, %v635_v49  ;;  %v536_v32 = vadd.f32 %v504_v10, %v404_v0  ;;  %v2664_v0 = vld [vmem:[#allocation2 + $0x90] sm:$0xff] }
  0x63   : > { %v704_v17 = vmul.f32 %v2554_v5, %v2342_v39  ;;  %v1051_v29 = vadd.f32 %v1019_v62, %v950_v58  ;;  %v1104_v33 = vmul.f32 %v2363_v52, %v2638_v20  ;;  %v1204_v41 = vmul.f32 %v2374_v56, %v2640_v50 }
  0x64   : > { %v1289_v27 = vadd.f32 %v2470_v25, %v1250_v44  ;;  %1897 = vmatmul.mubr.msk.f32.gmra.mrb[2].mxu0 %vm255_vm0, %v1338_v26  ;;  %v835_v12 = vadd.f32 %v803_v37, %v735_v16  ;;  %v636_v28 = vadd.f32 %v604_v6, %v536_v32  ;;  %v804_v30 = vmul.f32 %v2563_v4, %v2344_v40  ;;  %v2680_v16 = vld [vmem:[#allocation2 + $0x187] sm:$0xff] }
  0x65   : > { %v419_v35 = vmul.f32 %v2434_v36, %v2314_v13  ;;  %v1151_v48 = vadd.f32 %v1119_v1, %v1051_v29  ;;  %v519_v62 = vmul.f32 %v2446_v59, %v2316_v14  ;;  %v619_v18 = vmul.f32 %v2448_v60, %v2318_v15  ;;  %v2666_v1 = vld [vmem:[#allocation2 + $0x91] sm:$0xff] }
  0x66   : > { %v1321_v42 = vmax.f32 %v1289_v27, 0.0  ;;  %v935_v9 = vadd.f32 %v903_v2, %v835_v12  ;;  %v736_v63 = vadd.f32 %v704_v17, %v636_v28  ;;  %v904_v3 = vmul.f32 %v2573_v55, %v2353_v45 }
  0x67   : > { %v1005_v57 = vmul.f32 %v2355_v46, %v2654_v51  ;;  %v1251_v36 = vadd.f32 %v1219_v21, %v1151_v48  ;;  %v551_v31 = vadd.f32 %v519_v62, %v419_v35  ;;  %v719_v59 = vmul.f32 %v2583_v11, %v2342_v39  ;;  %v2692_v35 = vld [vmem:[#allocation2 + $0x189] sm:$0xff] }
  0x68   : > { %v1353_v37 = vmin.f32 %v1321_v42, 6.0  ;;  %v1036_v49 = vadd.f32 %v1004_v23, %v935_v9  ;;  %v836_v60 = vadd.f32 %v804_v30, %v736_v63  ;;  %v1105_v10 = vmul.f32 %v2363_v52, %v2664_v0 }
  0x69   : > { %v1205_v6 = vmul.f32 %v2374_v56, %v2666_v1  ;;  %v1290_v21 = vadd.f32 %v2470_v25, %v1251_v36  ;;  %v651_v44 = vadd.f32 %v619_v18, %v551_v31  ;;  %v819_v58 = vmul.f32 %v2587_v22, %v2344_v40 }
  0x6a   : > { %1920 = vmatprep.mubr.msk.f32.mxu1 %vm255_vm0, %v1353_v37  ;;  %v420_v2 = vmul.f32 %v2465_v24, %v2314_v13  ;;  %v1136_v26 = vadd.f32 %v1104_v33, %v1036_v49  ;;  %v936_v23 = vadd.f32 %v904_v3, %v836_v60  ;;  %v520_v32 = vmul.f32 %v2478_v38, %v2316_v14  ;;  %v2690_v33 = vld [vmem:[#allocation2 + $0x188] sm:$0xff] }
  0x6b   : > { %v620_v17 = vmul.f32 %v2484_v47, %v2318_v15  ;;  %v1322_v27 = vmax.f32 %v1290_v21, 0.0  ;;  %v751_v29 = vadd.f32 %v719_v59, %v651_v44  ;;  %v919_v12 = vmul.f32 %v2589_v54, %v2353_v45  ;;  %v2712_v21 = vld [vmem:[#allocation2 + $0x18f] sm:$0xff] }
  0x6c   : > { %v1020_v28 = vmul.f32 %v2355_v46, %v2680_v16  ;;  %v1236_v30 = vadd.f32 %v1204_v41, %v1136_v26  ;;  %v1037_v24 = vadd.f32 %v1005_v57, %v936_v23  ;;  %v552_v42 = vadd.f32 %v520_v32, %v420_v2  ;;  %v2716_v2 = vld [vmem:[#allocation2 + $0x190] sm:$0xff] }
  0x6d   : > { %v720_v38 = vmul.f32 %v2605_v34, %v2342_v39  ;;  %v1354_v48 = vmin.f32 %v1322_v27, 6.0  ;;  %v851_v47 = vadd.f32 %v819_v58, %v751_v29  ;;  %v1120_v62 = vmul.f32 %v2363_v52, %v2690_v33  ;;  %v2723_v32 = vld [vmem:[#allocation2 + $0x191] sm:$0xff] }
  0x6e   : > { %v1220_v18 = vmul.f32 %v2374_v56, %v2692_v35  ;;  %v1275_v9 = vadd.f32 %v2470_v25, %v1236_v30  ;;  %v1137_v41 = vadd.f32 %v1105_v10, %v1037_v24  ;;  %v652_v63 = vadd.f32 %v620_v17, %v552_v42 }
  0x6f   : > { %v820_v3 = vmul.f32 %v2607_v43, %v2344_v40  ;;  %1921 = vmatmul.mubr.msk.f32.gmra.mrb[2].mxu1 %vm255_vm0, %v1354_v48  ;;  %v951_v57 = vadd.f32 %v919_v12, %v851_v47  ;;  %v405_v37 = vmul.f32 %v2491_v53, %v2314_v13  ;;  %v505_v36 = vmul.f32 %v2498_v7, %v2316_v14 }
  0x70   : > { %v605_v31 = vmul.f32 %v2502_v19, %v2318_v15  ;;  %v1307_v59 = vmax.f32 %v1275_v9, 0.0  ;;  %v1237_v49 = vadd.f32 %v1205_v6, %v1137_v41  ;;  %v752_v60 = vadd.f32 %v720_v38, %v652_v63  ;;  %v2738_v63 = vld [vmem:[#allocation2 + $0xa7] sm:$0xff] }
  0x71   : > { %v920_v10 = vmul.f32 %v2617_v61, %v2353_v45  ;;  %v1052_v44 = vadd.f32 %v1020_v28, %v951_v57  ;;  %v1021_v58 = vmul.f32 %v2355_v46, %v2712_v21  ;;  %v537_v53 = vadd.f32 %v505_v36, %v405_v37 }
  0x72   : > { %v705_v7 = vmul.f32 %v2628_v8, %v2342_v39  ;;  %v1339_v26 = vmin.f32 %v1307_v59, 6.0  ;;  %v1276_v19 = vadd.f32 %v2470_v25, %v1237_v49  ;;  %v852_v6 = vadd.f32 %v820_v3, %v752_v60  ;;  %v2740_v3 = vld [vmem:[#allocation2 + $0xa8] sm:$0xff] }
  0x73   : > { %v1121_v23 = vmul.f32 %v2363_v52, %v2716_v2  ;;  %v1152_v17 = vadd.f32 %v1120_v62, %v1052_v44  ;;  %v1221_v27 = vmul.f32 %v2374_v56, %v2723_v32  ;;  %v637_v29 = vadd.f32 %v605_v31, %v537_v53 }
  0x74   : > { %v805_v12 = vmul.f32 %v2638_v20, %v2344_v40  ;;  %1899 = vmatprep.mubr.msk.f32.mxu0 %vm255_vm0, %v1339_v26  ;;  %v1308_v28 = vmax.f32 %v1276_v19, 0.0  ;;  %v952_v30 = vadd.f32 %v920_v10, %v852_v6  ;;  %v406_v24 = vmul.f32 %v2554_v5, %v2314_v13 }
  0x75   : > { %v506_v42 = vmul.f32 %v2563_v4, %v2316_v14  ;;  %v1252_v38 = vadd.f32 %v1220_v18, %v1152_v17  ;;  %v737_v48 = vadd.f32 %v705_v7, %v637_v29  ;;  %v905_v47 = vmul.f32 %v2640_v50, %v2353_v45  ;;  %v2764_v29 = vld [vmem:[#allocation2 + $0xaf] sm:$0xff] }
  0x76   : > { %v606_v62 = vmul.f32 %v2573_v55, %v2318_v15  ;;  %v1340_v9 = vmin.f32 %v1308_v28, 6.0  ;;  %v1053_v41 = vadd.f32 %v1021_v58, %v952_v30  ;;  %v706_v5 = vmul.f32 %v2654_v51, %v2342_v39  ;;  %v2749_v55 = vld [vmem:[#allocation2 + $0xa9] sm:$0xff] }
  0x77   : > { %v538_v57 = vadd.f32 %v506_v42, %v406_v24  ;;  %v1291_v4 = vadd.f32 %v2470_v25, %v1252_v38  ;;  %v837_v18 = vadd.f32 %v805_v12, %v737_v48  ;;  %v1006_v37 = vmul.f32 %v2355_v46, %v2738_v63  ;;  %v2766_v12 = vld [vmem:[#allocation2 + $0xb0] sm:$0xff] }
  0x78   : > { %v1106_v36 = vmul.f32 %v2363_v52, %v2740_v3  ;;  %1900 = vmatmul.mubr.msk.f32.gmra.mrb[4].mxu0 %vm255_vm0, %v1340_v9  ;;  %v1153_v31 = vadd.f32 %v1121_v23, %v1053_v41  ;;  %v1206_v59 = vmul.f32 %v2374_v56, %v2749_v55  ;;  %v806_v60 = vmul.f32 %v2664_v0, %v2344_v40 }
  0x79   : > { %v638_v49 = vadd.f32 %v606_v62, %v538_v57  ;;  %v1323_v10 = vmax.f32 %v1291_v4, 0.0  ;;  %v937_v44 = vadd.f32 %v905_v47, %v837_v18  ;;  %v421_v58 = vmul.f32 %v2583_v11, %v2314_v13 }
  0x7a   : > { %v521_v53 = vmul.f32 %v2587_v22, %v2316_v14  ;;  %v1253_v7 = vadd.f32 %v1221_v27, %v1153_v31  ;;  %v906_v19 = vmul.f32 %v2666_v1, %v2353_v45  ;;  %v621_v6 = vmul.f32 %v2589_v54, %v2318_v15  ;;  %v2775_v54 = vld [vmem:[#allocation2 + $0xb1] sm:$0xff] }
  0x7b   : > { %v738_v26 = vadd.f32 %v706_v5, %v638_v49  ;;  %v1355_v23 = vmin.f32 %v1323_v10, 6.0  ;;  %v1038_v17 = vadd.f32 %v1006_v37, %v937_v44  ;;  %v721_v11 = vmul.f32 %v2680_v16, %v2342_v39  ;;  %v2790_v49 = vld [vmem:[#allocation2 + $0x1a7] sm:$0xff] }
  0x7c   : > { %v553_v28 = vadd.f32 %v521_v53, %v421_v58  ;;  %v1292_v22 = vadd.f32 %v2470_v25, %v1253_v7  ;;  %v1007_v30 = vmul.f32 %v2355_v46, %v2764_v29  ;;  %v1107_v24 = vmul.f32 %v2363_v52, %v2766_v12 }
  0x7d   : > { %v838_v27 = vadd.f32 %v806_v60, %v738_v26  ;;  %1923 = vmatprep.mubr.msk.f32.mxu1 %vm255_vm0, %v1355_v23  ;;  %v1138_v42 = vadd.f32 %v1106_v36, %v1038_v17  ;;  %v1207_v38 = vmul.f32 %v2374_v56, %v2775_v54  ;;  %v821_v47 = vmul.f32 %v2690_v33, %v2344_v40  ;;  %v2792_v60 = vld [vmem:[#allocation2 + $0x1a8] sm:$0xff] }
  0x7e   : > { %v653_v48 = vadd.f32 %v621_v6, %v553_v28  ;;  %v1324_v62 = vmax.f32 %v1292_v22, 0.0  ;;  %v422_v41 = vmul.f32 %v2605_v34, %v2314_v13  ;;  %v522_v57 = vmul.f32 %v2607_v43, %v2316_v14 }
  0x7f   : > { %v938_v9 = vadd.f32 %v906_v19, %v838_v27  ;;  %v1238_v5 = vadd.f32 %v1206_v59, %v1138_v42  ;;  %v921_v18 = vmul.f32 %v2692_v35, %v2353_v45  ;;  %v622_v37 = vmul.f32 %v2617_v61, %v2318_v15  ;;  %v2801_v61 = vld [vmem:[#allocation2 + $0x1a9] sm:$0xff] }
  0x80   : > { %v753_v4 = vadd.f32 %v721_v11, %v653_v48  ;;  %v1356_v36 = vmin.f32 %v1324_v62, 6.0  ;;  %v554_v10 = vadd.f32 %v522_v57, %v422_v41  ;;  %v722_v34 = vmul.f32 %v2712_v21, %v2342_v39  ;;  %v2816_v48 = vld [vmem:[#allocation2 + $0x1af] sm:$0xff] }
  0x81   : > { %v1039_v31 = vadd.f32 %v1007_v30, %v938_v9  ;;  %v1277_v43 = vadd.f32 %v2470_v25, %v1238_v5  ;;  %v1022_v44 = vmul.f32 %v2355_v46, %v2790_v49  ;;  %v1122_v58 = vmul.f32 %v2363_v52, %v2792_v60 }
  0x82   : > { %v853_v59 = vadd.f32 %v821_v47, %v753_v4  ;;  %1924 = vmatmul.mubr.msk.f32.gmra.mrb[4].mxu1 %vm255_vm0, %v1356_v36  ;;  %v1222_v7 = vmul.f32 %v2374_v56, %v2801_v61  ;;  %v654_v26 = vadd.f32 %v622_v37, %v554_v10  ;;  %v822_v19 = vmul.f32 %v2716_v2, %v2344_v40  ;;  %v2818_v47 = vld [vmem:[#allocation2 + $0x1b0] sm:$0xff] }
  0x83   : > { %v1139_v53 = vadd.f32 %v1107_v24, %v1039_v31  ;;  %v1309_v6 = vmax.f32 %v1277_v43, 0.0  ;;  %v407_v17 = vmul.f32 %v2628_v8, %v2314_v13  ;;  %v507_v28 = vmul.f32 %v2638_v20, %v2316_v14 }
  0x84   : > { %v953_v23 = vadd.f32 %v921_v18, %v853_v59  ;;  %v754_v22 = vadd.f32 %v722_v34, %v654_v26  ;;  %v922_v27 = vmul.f32 %v2723_v32, %v2353_v45  ;;  %v607_v30 = vmul.f32 %v2640_v50, %v2318_v15  ;;  %v2827_v50 = vld [vmem:[#allocation2 + $0x1b1] sm:$0xff]  ;;  %v2842_v26 = vld [vmem:[#allocation2 + $0xc7] sm:$0xff] }
  0x85   : > { %v1239_v11 = vadd.f32 %v1207_v38, %v1139_v53  ;;  %v1341_v24 = vmin.f32 %v1309_v6, 6.0  ;;  %v539_v62 = vadd.f32 %v507_v28, %v407_v17  ;;  %v707_v8 = vmul.f32 %v2738_v63, %v2342_v39 }
  0x86   : > { %v1054_v42 = vadd.f32 %v1022_v44, %v953_v23  ;;  %v854_v38 = vadd.f32 %v822_v19, %v754_v22  ;;  %v1023_v9 = vmul.f32 %v2355_v46, %v2816_v48  ;;  %v1123_v41 = vmul.f32 %v2363_v52, %v2818_v47  ;;  %v2844_v19 = vld [vmem:[#allocation2 + $0xc8] sm:$0xff] }
  0x87   : > { %v1278_v20 = vadd.f32 %v2470_v25, %v1239_v11  ;;  %1902 = vmatprep.mubr.msk.f32.mxu0 %vm255_vm0, %v1341_v24  ;;  %v1223_v5 = vmul.f32 %v2374_v56, %v2827_v50  ;;  %v639_v4 = vadd.f32 %v607_v30, %v539_v62  ;;  %v807_v18 = vmul.f32 %v2740_v3, %v2344_v40 }
  0x88   : > { %v1154_v57 = vadd.f32 %v1122_v58, %v1054_v42  ;;  %v954_v36 = vadd.f32 %v922_v27, %v854_v38  ;;  %v408_v31 = vmul.f32 %v2654_v51, %v2314_v13  ;;  %v508_v10 = vmul.f32 %v2664_v0, %v2316_v14 }
  0x89   : > { %v1310_v37 = vmax.f32 %v1278_v20, 0.0  ;;  %v739_v43 = vadd.f32 %v707_v8, %v639_v4  ;;  %v907_v59 = vmul.f32 %v2749_v55, %v2353_v45  ;;  %v608_v44 = vmul.f32 %v2666_v1, %v2318_v15  ;;  %v2853_v1 = vld [vmem:[#allocation2 + $0xc9] sm:$0xff] }
  0x8a   : > { %v1254_v34 = vadd.f32 %v1222_v7, %v1154_v57  ;;  %v1055_v53 = vadd.f32 %v1023_v9, %v954_v36  ;;  %v540_v6 = vadd.f32 %v508_v10, %v408_v31  ;;  %v708_v51 = vmul.f32 %v2764_v29, %v2342_v39  ;;  %v2868_v4 = vld [vmem:[#allocation2 + $0xcf] sm:$0xff] }
  0x8b   : > { %v1342_v58 = vmin.f32 %v1310_v37, 6.0  ;;  %v839_v7 = vadd.f32 %v807_v18, %v739_v43  ;;  %v1008_v23 = vmul.f32 %v2355_v46, %v2842_v26  ;;  %v1108_v17 = vmul.f32 %v2363_v52, %v2844_v19  ;;  %v2870_v18 = vld [vmem:[#allocation2 + $0xd0] sm:$0xff] }
  0x8c   : > { %v1293_v0 = vadd.f32 %v2470_v25, %v1254_v34  ;;  %v1155_v28 = vadd.f32 %v1123_v41, %v1055_v53  ;;  %v1208_v11 = vmul.f32 %v2374_v56, %v2853_v1  ;;  %v640_v22 = vadd.f32 %v608_v44, %v540_v6 }
  0x8d   : > { %1903 = vmatmul.mubr.msk.f32.gmra.mrb[6].mxu0 %vm255_vm0, %v1342_v58  ;;  %v808_v27 = vmul.f32 %v2766_v12, %v2344_v40  ;;  %v939_v24 = vadd.f32 %v907_v59, %v839_v7  ;;  %v423_v42 = vmul.f32 %v2680_v16, %v2314_v13  ;;  %v523_v62 = vmul.f32 %v2690_v33, %v2316_v14 }
  0x8e   : > { %v1325_v30 = vmax.f32 %v1293_v0, 0.0  ;;  %v1255_v8 = vadd.f32 %v1223_v5, %v1155_v28  ;;  %v740_v20 = vadd.f32 %v708_v51, %v640_v22  ;;  %v908_v38 = vmul.f32 %v2775_v54, %v2353_v45  ;;  %v2894_v22 = vld [vmem:[#allocation2 + $0x1c7] sm:$0xff] }
  0x8f   : > { %v623_v9 = vmul.f32 %v2692_v35, %v2318_v15  ;;  %v1040_v57 = vadd.f32 %v1008_v23, %v939_v24  ;;  %v555_v37 = vadd.f32 %v523_v62, %v423_v42  ;;  %v723_v16 = vmul.f32 %v2790_v49, %v2342_v39  ;;  %v2879_v35 = vld [vmem:[#allocation2 + $0xd1] sm:$0xff] }
  0x90   : > { %v1357_v41 = vmin.f32 %v1325_v30, 6.0  ;;  %v1294_v33 = vadd.f32 %v2470_v25, %v1255_v8  ;;  %v840_v5 = vadd.f32 %v808_v27, %v740_v20  ;;  %v1009_v36 = vmul.f32 %v2355_v46, %v2868_v4  ;;  %v2896_v27 = vld [vmem:[#allocation2 + $0x1c8] sm:$0xff] }
  0x91   : > { %v1109_v31 = vmul.f32 %v2363_v52, %v2870_v18  ;;  %v1140_v10 = vadd.f32 %v1108_v17, %v1040_v57  ;;  %v1209_v34 = vmul.f32 %v2374_v56, %v2879_v35  ;;  %v655_v43 = vadd.f32 %v623_v9, %v555_v37 }
  0x92   : > { %1926 = vmatprep.mubr.msk.f32.mxu1 %vm255_vm0, %v1357_v41  ;;  %v823_v59 = vmul.f32 %v2792_v60, %v2344_v40  ;;  %v1326_v44 = vmax.f32 %v1294_v33, 0.0  ;;  %v940_v58 = vadd.f32 %v908_v38, %v840_v5  ;;  %v424_v53 = vmul.f32 %v2712_v21, %v2314_v13 }
  0x93   : > { %v524_v6 = vmul.f32 %v2716_v2, %v2316_v14  ;;  %v1240_v51 = vadd.f32 %v1208_v11, %v1140_v10  ;;  %v755_v0 = vadd.f32 %v723_v16, %v655_v43  ;;  %v923_v7 = vmul.f32 %v2801_v61, %v2353_v45  ;;  %v2920_v43 = vld [vmem:[#allocation2 + $0x1cf] sm:$0xff] }
  0x94   : > { %v624_v23 = vmul.f32 %v2723_v32, %v2318_v15  ;;  %v1358_v17 = vmin.f32 %v1326_v44, 6.0  ;;  %v1041_v28 = vadd.f32 %v1009_v36, %v940_v58  ;;  %v724_v21 = vmul.f32 %v2816_v48, %v2342_v39  ;;  %v2905_v32 = vld [vmem:[#allocation2 + $0x1c9] sm:$0xff] }
  0x95   : > { %v556_v30 = vadd.f32 %v524_v6, %v424_v53  ;;  %v1279_v2 = vadd.f32 %v2470_v25, %v1240_v51  ;;  %v855_v11 = vadd.f32 %v823_v59, %v755_v0  ;;  %v1024_v24 = vmul.f32 %v2355_v46, %v2894_v22  ;;  %v2922_v59 = vld [vmem:[#allocation2 + $0x1d0] sm:$0xff] }
  0x96   : > { %v1124_v42 = vmul.f32 %v2363_v52, %v2896_v27  ;;  %1927 = vmatmul.mubr.msk.f32.gmra.mrb[6].mxu1 %vm255_vm0, %v1358_v17  ;;  %v1141_v62 = vadd.f32 %v1109_v31, %v1041_v28  ;;  %v1224_v8 = vmul.f32 %v2374_v56, %v2905_v32  ;;  %v824_v38 = vmul.f32 %v2818_v47, %v2344_v40 }
  0x97   : > { %v656_v20 = vadd.f32 %v624_v23, %v556_v30  ;;  %v1311_v9 = vmax.f32 %v1279_v2, 0.0  ;;  %v955_v41 = vadd.f32 %v923_v7, %v855_v11  ;;  %v409_v57 = vmul.f32 %v2738_v63, %v2314_v13 }
  0x98   : > { %v509_v37 = vmul.f32 %v2740_v3, %v2316_v14  ;;  %v1241_v16 = vadd.f32 %v1209_v34, %v1141_v62  ;;  %v924_v5 = vmul.f32 %v2827_v50, %v2353_v45  ;;  %v609_v36 = vmul.f32 %v2749_v55, %v2318_v15  ;;  %v2931_v55 = vld [vmem:[#allocation2 + $0x1d1] sm:$0xff]  ;;  %v2946_v62 = vld [vmem:[#allocation2 + $0xe7] sm:$0xff] }
  0x99   : > { %v756_v33 = vadd.f32 %v724_v21, %v656_v20  ;;  %v1343_v31 = vmin.f32 %v1311_v9, 6.0  ;;  %v1056_v10 = vadd.f32 %v1024_v24, %v955_v41  ;;  %v709_v63 = vmul.f32 %v2842_v26, %v2342_v39  ;;  %v2948_v20 = vld [vmem:[#allocation2 + $0xe8] sm:$0xff] }
  0x9a   : > { %v541_v44 = vadd.f32 %v509_v37, %v409_v57  ;;  %v1280_v3 = vadd.f32 %v2470_v25, %v1241_v16  ;;  %v1025_v58 = vmul.f32 %v2355_v46, %v2920_v43  ;;  %v1125_v53 = vmul.f32 %v2363_v52, %v2922_v59  ;;  %v2963_v37 = vld [vmem:[%s3378_s1 + $0x8] ss:$0 sm:$0xff] }
  0x9b   : > { %v856_v34 = vadd.f32 %v824_v38, %v756_v33  ;;  %1905 = vmatprep.mubr.msk.f32.mxu0 %vm255_vm0, %v1343_v31  ;;  %v1156_v6 = vadd.f32 %v1124_v42, %v1056_v10  ;;  %v1225_v51 = vmul.f32 %v2374_v56, %v2931_v55  ;;  %v809_v7 = vmul.f32 %v2844_v19, %v2344_v40 }
  0x9c   : > { %v641_v0 = vadd.f32 %v609_v36, %v541_v44  ;;  %v1312_v23 = vmax.f32 %v1280_v3, 0.0  ;;  %v410_v28 = vmul.f32 %v2764_v29, %v2314_v13  ;;  %v510_v30 = vmul.f32 %v2766_v12, %v2316_v14 }
  0x9d   : > { %v956_v17 = vadd.f32 %v924_v5, %v856_v34  ;;  %v1256_v21 = vadd.f32 %v1224_v8, %v1156_v6  ;;  %v909_v11 = vmul.f32 %v2853_v1, %v2353_v45  ;;  %v610_v56 = vmul.f32 %v2775_v54, %v2318_v15  ;;  %v2957_v54 = vld [vmem:[#allocation2 + $0xe9] sm:$0xff] }
  0x9e   : > { %v741_v2 = vadd.f32 %v709_v63, %v641_v0  ;;  %v1344_v24 = vmin.f32 %v1312_v23, 6.0  ;;  %v542_v38 = vadd.f32 %v510_v30, %v410_v28  ;;  %v710_v29 = vmul.f32 %v2868_v4, %v2342_v39  ;;  %v2977_v0 = vld [vmem:[#allocation2 + $0xef] sm:$0xff] }
  0x9f   : > { %v1057_v42 = vadd.f32 %v1025_v58, %v956_v17  ;;  %v1295_v12 = vadd.f32 %v2470_v25, %v1256_v21  ;;  %v1010_v9 = vmul.f32 %v2355_v46, %v2946_v62  ;;  %v1110_v41 = vmul.f32 %v2363_v52, %v2948_v20 }
  0xa0   : > { %v841_v8 = vadd.f32 %v809_v7, %v741_v2  ;;  %1906 = vmatmul.mubr.msk.f32.gmra.mrb[8].mxu0 %vm255_vm0, %v1344_v24  ;;  %v1210_v16 = vmul.f32 %v2963_v37, %v2957_v54  ;;  %v642_v33 = vadd.f32 %v610_v56, %v542_v38  ;;  %v810_v5 = vmul.f32 %v2870_v18, %v2344_v40  ;;  %v2979_v7 = vld [vmem:[#allocation2 + $0xf0] sm:$0xff] }
  0xa1   : > { %v1157_v57 = vadd.f32 %v1125_v53, %v1057_v42  ;;  %v1327_v36 = vmax.f32 %v1295_v12, 0.0  ;;  %v425_v10 = vmul.f32 %v2790_v49, %v2314_v13  ;;  %v525_v44 = vmul.f32 %v2792_v60, %v2316_v14 }
  0xa2   : > { %v941_v31 = vadd.f32 %v909_v11, %v841_v8  ;;  %v742_v3 = vadd.f32 %v710_v29, %v642_v33  ;;  %v910_v34 = vmul.f32 %v2879_v35, %v2353_v45  ;;  %v625_v58 = vmul.f32 %v2801_v61, %v2318_v15  ;;  %v2988_v61 = vld [vmem:[#allocation2 + $0xf1] sm:$0xff]  ;;  %v3003_v33 = vld [vmem:[#allocation2 + $0x1e7] sm:$0xff] }
  0xa3   : > { %v1257_v63 = vadd.f32 %v1225_v51, %v1157_v57  ;;  %v1359_v53 = vmin.f32 %v1327_v36, 6.0  ;;  %v557_v23 = vadd.f32 %v525_v44, %v425_v10  ;;  %v725_v49 = vmul.f32 %v2894_v22, %v2342_v39 }
  0xa4   : > { %v1042_v6 = vadd.f32 %v1010_v9, %v941_v31  ;;  %v842_v51 = vadd.f32 %v810_v5, %v742_v3  ;;  %v1011_v17 = vmul.f32 %v2355_v46, %v2977_v0  ;;  %v1111_v28 = vmul.f32 %v2363_v52, %v2979_v7  ;;  %v3005_v5 = vld [vmem:[#allocation2 + $0x1e8] sm:$0xff] }
  0xa5   : > { %v1296_v60 = vadd.f32 %v2470_v25, %v1257_v63  ;;  %1929 = vmatprep.mubr.msk.f32.mxu1 %vm255_vm0, %v1359_v53  ;;  %v1211_v21 = vmul.f32 %v2963_v37, %v2988_v61  ;;  %v657_v2 = vadd.f32 %v625_v58, %v557_v23  ;;  %v825_v11 = vmul.f32 %v2896_v27, %v2344_v40 }
  0xa6   : > { %v1142_v30 = vadd.f32 %v1110_v41, %v1042_v6  ;;  %v942_v24 = vadd.f32 %v910_v34, %v842_v51  ;;  %v426_v42 = vmul.f32 %v2816_v48, %v2314_v13  ;;  %v526_v38 = vmul.f32 %v2818_v47, %v2316_v14 }
  0xa7   : > { %v1328_v56 = vmax.f32 %v1296_v60, 0.0  ;;  %v757_v12 = vadd.f32 %v725_v49, %v657_v2  ;;  %v925_v8 = vmul.f32 %v2905_v32, %v2353_v45  ;;  %v626_v9 = vmul.f32 %v2827_v50, %v2318_v15  ;;  %v3014_v50 = vld [vmem:[#allocation2 + $0x1e9] sm:$0xff] }
  0xa8   : > { %v1242_v29 = vadd.f32 %v1210_v16, %v1142_v30  ;;  %v1043_v57 = vadd.f32 %v1011_v17, %v942_v24  ;;  %v558_v36 = vadd.f32 %v526_v38, %v426_v42  ;;  %v726_v48 = vmul.f32 %v2920_v43, %v2342_v39  ;;  %v3029_v30 = vld [vmem:[#allocation2 + $0x1ef] sm:$0xff] }
  0xa9   : > { %v1360_v41 = vmin.f32 %v1328_v56, 6.0  ;;  %v857_v16 = vadd.f32 %v825_v11, %v757_v12  ;;  %v1026_v31 = vmul.f32 %v2355_v46, %v3003_v33  ;;  %v1126_v10 = vmul.f32 %v2363_v52, %v3005_v5  ;;  %v3031_v2 = vld [vmem:[#allocation2 + $0x1f0] sm:$0xff] }
  0xaa   : > { %v1281_v47 = vadd.f32 %v2470_v25, %v1242_v29  ;;  %v1143_v44 = vadd.f32 %v1111_v28, %v1043_v57  ;;  %v1226_v63 = vmul.f32 %v2963_v37, %v3014_v50  ;;  %v658_v3 = vadd.f32 %v626_v9, %v558_v36  ;;  %v3045_v42 = vld [vmem:[#allocation2 + $0x1f1] sm:$0xff] }
  0xab   : > { %1930 = vmatmul.mubr.msk.f32.gmra.mrb[8].mxu1 %vm255_vm0, %v1360_v41  ;;  %v826_v34 = vmul.f32 %v2922_v59, %v2344_v40  ;;  %v957_v58 = vadd.f32 %v925_v8, %v857_v16  ;;  %v411_v53 = vmul.f32 %v2842_v26, %v2314_v13  ;;  %v511_v6 = vmul.f32 %v2844_v19, %v2316_v14  ;;  %v3038_v19 = vld [vmem:[%s3379_s2] ss:$0 sm:$0xff] }
  0xac   : > { %v1313_v25 = vmax.f32 %v1281_v47, 0.0  ;;  %v1243_v23 = vadd.f32 %v1211_v21, %v1143_v44  ;;  %v758_v49 = vadd.f32 %v726_v48, %v658_v3  ;;  %v926_v60 = vmul.f32 %v2931_v55, %v2353_v45  ;;  %v3060_v3 = vld [vmem:[#allocation2 + $0x107] sm:$0xff] }
  0xad   : > { %v611_v51 = vmul.f32 %v2853_v1, %v2318_v15  ;;  %v1058_v28 = vadd.f32 %v1026_v31, %v957_v58  ;;  %v543_v11 = vadd.f32 %v511_v6, %v411_v53  ;;  %v711_v26 = vmul.f32 %v2946_v62, %v2342_v39 }
  0xae   : > { %v1345_v17 = vmin.f32 %v1313_v25, 6.0  ;;  %v1282_v21 = vadd.f32 %v3038_v19, %v1243_v23  ;;  %v858_v56 = vadd.f32 %v826_v34, %v758_v49  ;;  %v1027_v1 = vmul.f32 %v2355_v46, %v3029_v30  ;;  %v3062_v34 = vld [vmem:[#allocation2 + $0x108] sm:$0xff] }
  0xaf   : > { %v1127_v24 = vmul.f32 %v2363_v52, %v3031_v2  ;;  %v1158_v38 = vadd.f32 %v1126_v10, %v1058_v28  ;;  %v1227_v29 = vmul.f32 %v2963_v37, %v3045_v42  ;;  %v643_v12 = vadd.f32 %v611_v51, %v543_v11 }
  0xb0   : > { %1908 = vmatprep.mubr.msk.f32.mxu0 %vm255_vm0, %v1345_v17  ;;  %v811_v8 = vmul.f32 %v2948_v20, %v2344_v40  ;;  %v1314_v9 = vmax.f32 %v1282_v21, 0.0  ;;  %v958_v41 = vadd.f32 %v926_v60, %v858_v56  ;;  %v412_v57 = vmul.f32 %v2868_v4, %v2314_v13 }
  0xb1   : > { %v512_v36 = vmul.f32 %v2870_v18, %v2316_v14  ;;  %v1258_v48 = vadd.f32 %v1226_v63, %v1158_v38  ;;  %v743_v47 = vadd.f32 %v711_v26, %v643_v12  ;;  %v911_v16 = vmul.f32 %v2957_v54, %v2353_v45  ;;  %v3086_v12 = vld [vmem:[#allocation2 + $0x10f] sm:$0xff] }
  0xb2   : > { %v612_v31 = vmul.f32 %v2879_v35, %v2318_v15  ;;  %v1346_v10 = vmin.f32 %v1314_v9, 6.0  ;;  %v1059_v44 = vadd.f32 %v1027_v1, %v958_v41  ;;  %v712_v4 = vmul.f32 %v2977_v0, %v2342_v39  ;;  %v3071_v35 = vld [vmem:[#allocation2 + $0x109] sm:$0xff] }
  0xb3   : > { %v544_v25 = vadd.f32 %v512_v36, %v412_v57  ;;  %v1297_v18 = vadd.f32 %v3038_v19, %v1258_v48  ;;  %v843_v63 = vadd.f32 %v811_v8, %v743_v47  ;;  %v1012_v58 = vmul.f32 %v2355_v46, %v3060_v3  ;;  %v3088_v8 = vld [vmem:[#allocation2 + $0x110] sm:$0xff] }
  0xb4   : > { %v1112_v53 = vmul.f32 %v2363_v52, %v3062_v34  ;;  %1909 = vmatmul.mubr.msk.f32.gmra.mrb[10].mxu0 %vm255_vm0, %v1346_v10  ;;  %v1159_v6 = vadd.f32 %v1127_v24, %v1059_v44  ;;  %v1212_v23 = vmul.f32 %v2963_v37, %v3071_v35  ;;  %v812_v60 = vmul.f32 %v2979_v7, %v2344_v40 }
  0xb5   : > { %v644_v49 = vadd.f32 %v612_v31, %v544_v25  ;;  %v1329_v51 = vmax.f32 %v1297_v18, 0.0  ;;  %v943_v17 = vadd.f32 %v911_v16, %v843_v63  ;;  %v427_v28 = vmul.f32 %v2894_v22, %v2314_v13 }
  0xb6   : > { %v527_v11 = vmul.f32 %v2896_v27, %v2316_v14  ;;  %v1259_v26 = vadd.f32 %v1227_v29, %v1159_v6  ;;  %v912_v56 = vmul.f32 %v2988_v61, %v2353_v45  ;;  %v627_v1 = vmul.f32 %v2905_v32, %v2318_v15  ;;  %v3097_v32 = vld [vmem:[#allocation2 + $0x111] sm:$0xff] }
  0xb7   : > { %v744_v21 = vadd.f32 %v712_v4, %v644_v49  ;;  %v1361_v24 = vmin.f32 %v1329_v51, 6.0  ;;  %v1044_v38 = vadd.f32 %v1012_v58, %v943_v17  ;;  %v727_v22 = vmul.f32 %v3003_v33, %v2342_v39  ;;  %v3112_v49 = vld [vmem:[#allocation2 + $0x207] sm:$0xff] }
  0xb8   : > { %v559_v9 = vadd.f32 %v527_v11, %v427_v28  ;;  %v1298_v27 = vadd.f32 %v3038_v19, %v1259_v26  ;;  %v1013_v41 = vmul.f32 %v2355_v46, %v3086_v12  ;;  %v1113_v57 = vmul.f32 %v2363_v52, %v3088_v8 }
  0xb9   : > { %v844_v29 = vadd.f32 %v812_v60, %v744_v21  ;;  %1932 = vmatprep.mubr.msk.f32.mxu1 %vm255_vm0, %v1361_v24  ;;  %v1144_v36 = vadd.f32 %v1112_v53, %v1044_v38  ;;  %v1213_v48 = vmul.f32 %v2963_v37, %v3097_v32  ;;  %v827_v16 = vmul.f32 %v3005_v5, %v2344_v40  ;;  %v3114_v60 = vld [vmem:[#allocation2 + $0x208] sm:$0xff] }
  0xba   : > { %v659_v47 = vadd.f32 %v627_v1, %v559_v9  ;;  %v1330_v31 = vmax.f32 %v1298_v27, 0.0  ;;  %v428_v44 = vmul.f32 %v2920_v43, %v2314_v13  ;;  %v528_v25 = vmul.f32 %v2922_v59, %v2316_v14 }
  0xbb   : > { %v944_v10 = vadd.f32 %v912_v56, %v844_v29  ;;  %v1244_v4 = vadd.f32 %v1212_v23, %v1144_v36  ;;  %v927_v63 = vmul.f32 %v3014_v50, %v2353_v45  ;;  %v628_v58 = vmul.f32 %v2931_v55, %v2318_v15  ;;  %v3123_v55 = vld [vmem:[#allocation2 + $0x209] sm:$0xff] }
  0xbc   : > { %v759_v18 = vadd.f32 %v727_v22, %v659_v47  ;;  %v1362_v53 = vmin.f32 %v1330_v31, 6.0  ;;  %v560_v51 = vadd.f32 %v528_v25, %v428_v44  ;;  %v728_v43 = vmul.f32 %v3029_v30, %v2342_v39  ;;  %v3138_v47 = vld [vmem:[#allocation2 + $0x20f] sm:$0xff] }
  0xbd   : > { %v1045_v6 = vadd.f32 %v1013_v41, %v944_v10  ;;  %v1283_v59 = vadd.f32 %v3038_v19, %v1244_v4  ;;  %v1028_v17 = vmul.f32 %v2355_v46, %v3112_v49  ;;  %v1128_v28 = vmul.f32 %v2363_v52, %v3114_v60 }
  0xbe   : > { %v859_v23 = vadd.f32 %v827_v16, %v759_v18  ;;  %1933 = vmatmul.mubr.msk.f32.gmra.mrb[10].mxu1 %vm255_vm0, %v1362_v53  ;;  %v1228_v26 = vmul.f32 %v2963_v37, %v3123_v55  ;;  %v660_v21 = vadd.f32 %v628_v58, %v560_v51  ;;  %v828_v56 = vmul.f32 %v3031_v2, %v2344_v40  ;;  %v3140_v16 = vld [vmem:[#allocation2 + $0x210] sm:$0xff]  ;;  %v978_v53 = vld [vmem:[#allocation2 + $0x127] sm:$0xff] }
  0xbf   : > { %v1145_v11 = vadd.f32 %v1113_v57, %v1045_v6  ;;  %v1315_v1 = vmax.f32 %v1283_v59, 0.0  ;;  %v413_v38 = vmul.f32 %v2946_v62, %v2314_v13  ;;  %v513_v9 = vmul.f32 %v2948_v20, %v2316_v14  ;;  %v1078_v6 = vld [vmem:[#allocation2 + $0x128] sm:$0xff] }
  0xc0   : > { %v959_v24 = vadd.f32 %v927_v63, %v859_v23  ;;  %v760_v27 = vadd.f32 %v728_v43, %v660_v21  ;;  %v928_v29 = vmul.f32 %v3045_v42, %v2353_v45  ;;  %v613_v41 = vmul.f32 %v2957_v54, %v2318_v15  ;;  %v3149_v54 = vld [vmem:[#allocation2 + $0x211] sm:$0xff] }
  0xc1   : > { %v1245_v22 = vadd.f32 %v1213_v48, %v1145_v11  ;;  %v1347_v57 = vmin.f32 %v1315_v1, 6.0  ;;  %v545_v31 = vadd.f32 %v513_v9, %v413_v38  ;;  %v713_v62 = vmul.f32 %v3060_v3, %v2342_v39 }
  0xc2   : > { %v1060_v36 = vadd.f32 %v1028_v17, %v959_v24  ;;  %v860_v48 = vadd.f32 %v828_v56, %v760_v27  ;;  %v1029_v10 = vmul.f32 %v2355_v46, %v3138_v47  ;;  %v1129_v44 = vmul.f32 %v2363_v52, %v3140_v16 }
  0xc3   : > { %v1284_v20 = vadd.f32 %v3038_v19, %v1245_v22  ;;  %1911 = vmatprep.mubr.msk.f32.mxu0 %vm255_vm0, %v1347_v57  ;;  %v1229_v4 = vmul.f32 %v2963_v37, %v3149_v54  ;;  %v645_v18 = vadd.f32 %v613_v41, %v545_v31  ;;  %v813_v3 = vmul.f32 %v3062_v34, %v2344_v40 }
  0xc4   : > { %v1160_v25 = vadd.f32 %v1128_v28, %v1060_v36  ;;  %v960_v58 = vadd.f32 %v928_v29, %v860_v48  ;;  %v414_v51 = vmul.f32 %v2977_v0, %v2314_v13  ;;  %v514_v43 = vmul.f32 %v2979_v7, %v2316_v14  ;;  %v1178_v28 = vld [vmem:[#allocation2 + $0x129] sm:$0xff] }
  0xc5   : > { %v1316_v63 = vmax.f32 %v1284_v20, 0.0  ;;  %v745_v23 = vadd.f32 %v713_v62, %v645_v18  ;;  %v913_v17 = vmul.f32 %v3071_v35, %v2353_v45  ;;  %v614_v11 = vmul.f32 %v2988_v61, %v2318_v15  ;;  %v979_v29 = vld [vmem:[#allocation2 + $0x12f] sm:$0xff] }
  0xc6   : > { %v1260_v59 = vadd.f32 %v1228_v26, %v1160_v25  ;;  %v1061_v21 = vadd.f32 %v1029_v10, %v960_v58  ;;  %v546_v56 = vadd.f32 %v514_v43, %v414_v51  ;;  %v714_v1 = vmul.f32 %v3086_v12, %v2342_v39  ;;  %v1079_v12 = vld [vmem:[#allocation2 + $0x130] sm:$0xff] }
  0xc7   : > { %v1348_v34 = vmin.f32 %v1316_v63, 6.0  ;;  %v845_v24 = vadd.f32 %v813_v3, %v745_v23  ;;  %v1014_v7 = vmul.f32 %v2355_v46, %v978_v53  ;;  %v1114_v26 = vmul.f32 %v2363_v52, %v1078_v6  ;;  %v1179_v20 = vld [vmem:[#allocation2 + $0x131] sm:$0xff]  ;;  %v994_v6 = vld [vmem:[#allocation2 + $0x227] sm:$0xff] }
  0xc8   : > { %v1299_v0 = vadd.f32 %v3038_v19, %v1260_v59  ;;  %v1161_v35 = vadd.f32 %v1129_v44, %v1061_v21  ;;  %v1214_v38 = vmul.f32 %v2963_v37, %v1178_v28  ;;  %v646_v9 = vadd.f32 %v614_v11, %v546_v56  ;;  %v1194_v56 = vld [vmem:[#allocation2 + $0x229] sm:$0xff] }
  0xc9   : > { %1912 = vmatmul.mubr.msk.f32.gmra.mrb[12].mxu0 %vm255_vm0, %v1348_v34  ;;  %v814_v61 = vmul.f32 %v3088_v8, %v2344_v40  ;;  %v945_v27 = vadd.f32 %v913_v17, %v845_v24  ;;  %v429_v41 = vmul.f32 %v3003_v33, %v2314_v13  ;;  %v529_v57 = vmul.f32 %v3005_v5, %v2316_v14  ;;  %v995_v24 = vld [vmem:[#allocation2 + $0x22f] sm:$0xff] }
  0xca   : > { %v1331_v22 = vmax.f32 %v1299_v0, 0.0  ;;  %v1261_v36 = vadd.f32 %v1229_v4, %v1161_v35  ;;  %v746_v31 = vadd.f32 %v714_v1, %v646_v9  ;;  %v914_v62 = vmul.f32 %v3097_v32, %v2353_v45  ;;  %v1095_v9 = vld [vmem:[#allocation2 + $0x230] sm:$0xff] }
  0xcb   : > { %v629_v48 = vmul.f32 %v3014_v50, %v2318_v15  ;;  %v1046_v10 = vadd.f32 %v1014_v7, %v945_v27  ;;  %v561_v44 = vadd.f32 %v529_v57, %v429_v41  ;;  %v729_v25 = vmul.f32 %v3112_v49, %v2342_v39  ;;  %v1195_v27 = vld [vmem:[#allocation2 + $0x231] sm:$0xff] }
  0xcc   : > { %v1363_v8 = vmin.f32 %v1331_v22, 6.0  ;;  %v1300_v33 = vadd.f32 %v3038_v19, %v1261_v36  ;;  %v846_v18 = vadd.f32 %v814_v61, %v746_v31  ;;  %v1015_v5 = vmul.f32 %v2355_v46, %v979_v29 }
  0xcd   : > { %v1115_v4 = vmul.f32 %v2363_v52, %v1079_v12  ;;  %v1146_v32 = vadd.f32 %v1114_v26, %v1046_v10  ;;  %v1215_v3 = vmul.f32 %v2963_v37, %v1179_v20  ;;  %v661_v63 = vadd.f32 %v629_v48, %v561_v44 }
  0xce   : > { %1935 = vmatprep.mubr.msk.f32.mxu1 %vm255_vm0, %v1363_v8  ;;  %v829_v50 = vmul.f32 %v3114_v60, %v2344_v40  ;;  %v1332_v58 = vmax.f32 %v1300_v33, 0.0  ;;  %v946_v53 = vadd.f32 %v914_v62, %v846_v18  ;;  %v430_v49 = vmul.f32 %v3029_v30, %v2314_v13  ;;  %v1094_v60 = vld [vmem:[#allocation2 + $0x228] sm:$0xff] }
  0xcf   : > { %v530_v51 = vmul.f32 %v3031_v2, %v2316_v14  ;;  %v1246_v43 = vadd.f32 %v1214_v38, %v1146_v32  ;;  %v761_v59 = vadd.f32 %v729_v25, %v661_v63  ;;  %v929_v23 = vmul.f32 %v3123_v55, %v2353_v45 }
  0xd0   : > { %v630_v17 = vmul.f32 %v3045_v42, %v2318_v15  ;;  %v1364_v28 = vmin.f32 %v1332_v58, 6.0  ;;  %v1047_v11 = vadd.f32 %v1015_v5, %v946_v53  ;;  %v730_v21 = vmul.f32 %v3138_v47, %v2342_v39 }
  0xd1   : > { %v562_v34 = vadd.f32 %v530_v51, %v430_v49  ;;  %v1285_v13 = vadd.f32 %v3038_v19, %v1246_v43  ;;  %v861_v30 = vadd.f32 %v829_v50, %v761_v59  ;;  %v1030_v14 = vmul.f32 %v2355_v46, %v994_v6 }
  0xd2   : > { %1936 = vmatmul.mubr.msk.f32.gmra.mrb[12].mxu1 %vm255_vm0, %v1364_v28  ;;  %v1147_v2 = vadd.f32 %v1115_v4, %v1047_v11  ;;  %v830_v15 = vmul.f32 %v3140_v16, %v2344_v40  ;;  %v1130_v0 = vmul.f32 %v2363_v52, %v1094_v60  ;;  %v930_v47 = vmul.f32 %v3149_v54, %v2353_v45 }
  0xd3   : > { %v662_v55 = vadd.f32 %v630_v17, %v562_v34  ;;  %v1317_v42 = vmax.f32 %v1285_v13, 0.0  ;;  %v961_v1 = vadd.f32 %v929_v23, %v861_v30  ;;  %v1230_v38 = vmul.f32 %v2963_v37, %v1194_v56 }
  0xd4   : > { %v1247_v7 = vadd.f32 %v1215_v3, %v1147_v2  ;;  %v1031_v40 = vmul.f32 %v2355_v46, %v995_v24  ;;  %v1131_v41 = vmul.f32 %v2363_v52, %v1095_v9  ;;  %v1231_v36 = vmul.f32 %v2963_v37, %v1195_v27  ;;  %v3225_v37 = vld [vmem:[%s3381_s4] ss:$0 sm:$0xff] }
  0xd5   : > { %v762_v39 = vadd.f32 %v730_v21, %v662_v55  ;;  %v1349_v26 = vmin.f32 %v1317_v42, 6.0  ;;  %v1062_v35 = vadd.f32 %v1030_v14, %v961_v1 }
  0xd6   : > { %v1286_v61 = vadd.f32 %v3038_v19, %v1247_v7 }
  0xd7   : > { %v862_v22 = vadd.f32 %v830_v15, %v762_v39  ;;  %1914 = vmatprep.mubr.msk.f32.mxu0 %vm255_vm0, %v1349_v26  ;;  %v1162_v16 = vadd.f32 %v1130_v0, %v1062_v35 }
  0xd8   : > { %v1318_v29 = vmax.f32 %v1286_v61, 0.0 }
  0xd9   : > { %v962_v12 = vadd.f32 %v930_v47, %v862_v22  ;;  %v1262_v45 = vadd.f32 %v1230_v38, %v1162_v16 }
  0xda   : > { %v1350_v54 = vmin.f32 %v1318_v29, 6.0 }
  0xdb   : > { %v1063_v57 = vadd.f32 %v1031_v40, %v962_v12  ;;  %v1301_v31 = vadd.f32 %v3038_v19, %v1262_v45 }
  0xdc   : > { %1915 = vmatmul.mubr.msk.f32.gmra.mrb[14].mxu0 %vm255_vm0, %v1350_v54 }
  0xdd   : > { %v1163_v46 = vadd.f32 %v1131_v41, %v1063_v57  ;;  %v1333_v62 = vmax.f32 %v1301_v31, 0.0 }
  0xdf   : > { %v1263_v20 = vadd.f32 %v1231_v36, %v1163_v46  ;;  %v1365_v48 = vmin.f32 %v1333_v62, 6.0 }
  0xe1   : > { %v1302_v8 = vadd.f32 %v3038_v19, %v1263_v20  ;;  %1938 = vmatprep.mubr.msk.f32.mxu1 %vm255_vm0, %v1365_v48 }
  0xe3   : > { %v1334_v52 = vmax.f32 %v1302_v8, 0.0 }
  0xe5   : > { %v1366_v10 = vmin.f32 %v1334_v52, 6.0 }
  0xe7   : > { %1939 = vmatmul.mubr.msk.f32.gmra.mrb[14].mxu1 %vm255_vm0, %v1366_v10 }
 0x124   : > { %v1895_v44 = vpop.f32.mrb[0].mxu0 }
 0x125   : > { %v1544_v25 = vadd.f32 %v1895_v44, %v3225_v37  ;;  %v1538_v33 = vpop.f32.mrb[1].mxu0 }
 0x126   : > { %v1539_v19 = vadd.f32 %v3225_v37, %v1538_v33 }
 0x127   : > { %1699 = vst.msk [vmem:[%s3229_s12 + $0x8] sm:$0xff] %vm1697_vm1, %v1544_v25 }
 0x128   : > { %1698 = vst.msk [vmem:[%s3229_s12] sm:$0xff] %vm1697_vm1, %v1539_v19 }
 0x12d   : > { %v1919_v18 = vpop.f32.mrb[0].mxu1 }
 0x12e   : > { %v1624_v5 = vadd.f32 %v1919_v18, %v3225_v37  ;;  %v1618_v4 = vpop.f32.mrb[1].mxu1 }
 0x12f   : > { %v1619_v32 = vadd.f32 %v3225_v37, %v1618_v4 }
 0x130   : > { %1715 = vst.msk [vmem:[%s3229_s12 + $0x88] sm:$0xff] %vm1697_vm1, %v1624_v5 }
 0x131   : > { %1714 = vst.msk [vmem:[%s3229_s12 + $0x80] sm:$0xff] %vm1697_vm1, %v1619_v32 }
 0x137   : > { %v1898_v3 = vpop.f32.mrb[2].mxu0 }
 0x138   : > { %v1554_v63 = vadd.f32 %v1898_v3, %v3225_v37  ;;  %v1548_v50 = vpop.f32.mrb[3].mxu0 }
 0x139   : > { %v1549_v58 = vadd.f32 %v3225_v37, %v1548_v50 }
 0x13a   : > { %1701 = vst.msk [vmem:[%s3229_s12 + $0x18] sm:$0xff] %vm1697_vm1, %v1554_v63 }
 0x13b   : > { %1700 = vst.msk [vmem:[%s3229_s12 + $0x10] sm:$0xff] %vm1697_vm1, %v1549_v58 }
 0x142   : > { %v1922_v53 = vpop.f32.mrb[2].mxu1 }
 0x143   : > { %v1634_v6 = vadd.f32 %v1922_v53, %v3225_v37  ;;  %v1628_v49 = vpop.f32.mrb[3].mxu1 }
 0x144   : > { %v1629_v51 = vadd.f32 %v3225_v37, %v1628_v49 }
 0x145   : > { %1717 = vst.msk [vmem:[%s3229_s12 + $0x98] sm:$0xff] %vm1697_vm1, %v1634_v6 }
 0x146   : > { %1716 = vst.msk [vmem:[%s3229_s12 + $0x90] sm:$0xff] %vm1697_vm1, %v1629_v51 }
 0x14b   : > { %v1901_v43 = vpop.f32.mrb[4].mxu0 }
 0x14c   : > { %v1564_v59 = vadd.f32 %v1901_v43, %v3225_v37  ;;  %v1558_v23 = vpop.f32.mrb[5].mxu0 }
 0x14d   : > { %v1559_v17 = vadd.f32 %v3225_v37, %v1558_v23 }
 0x14e   : > { %1703 = vst.msk [vmem:[%s3229_s12 + $0x28] sm:$0xff] %vm1697_vm1, %v1564_v59 }
 0x14f   : > { %1702 = vst.msk [vmem:[%s3229_s12 + $0x20] sm:$0xff] %vm1697_vm1, %v1559_v17 }
 0x155   : > { %v1925_v28 = vpop.f32.mrb[4].mxu1 }
 0x156   : > { %v1644_v11 = vadd.f32 %v1925_v28, %v3225_v37  ;;  %v1638_v60 = vpop.f32.mrb[5].mxu1 }
 0x157   : > { %v1639_v34 = vadd.f32 %v3225_v37, %v1638_v60 }
 0x158   : > { %1719 = vst.msk [vmem:[%s3229_s12 + $0xa8] sm:$0xff] %vm1697_vm1, %v1644_v11 }
 0x159   : > { %1718 = vst.msk [vmem:[%s3229_s12 + $0xa0] sm:$0xff] %vm1697_vm1, %v1639_v34 }
 0x160   : > { %v1904_v21 = vpop.f32.mrb[6].mxu0 }
 0x161   : > { %v1574_v13 = vadd.f32 %v1904_v21, %v3225_v37  ;;  %v1568_v30 = vpop.f32.mrb[7].mxu0 }
 0x162   : > { %v1569_v14 = vadd.f32 %v3225_v37, %v1568_v30 }
 0x163   : > { %1705 = vst.msk [vmem:[%s3229_s12 + $0x38] sm:$0xff] %vm1697_vm1, %v1574_v13 }
 0x164   : > { %1704 = vst.msk [vmem:[%s3229_s12 + $0x30] sm:$0xff] %vm1697_vm1, %v1569_v14 }
 0x169   : > { %v1928_v2 = vpop.f32.mrb[6].mxu1 }
 0x16a   : > { %v1654_v56 = vadd.f32 %v1928_v2, %v3225_v37  ;;  %v1648_v55 = vpop.f32.mrb[7].mxu1 }
 0x16b   : > { %v1649_v15 = vadd.f32 %v3225_v37, %v1648_v55 }
 0x16c   : > { %1721 = vst.msk [vmem:[%s3229_s12 + $0xb8] sm:$0xff] %vm1697_vm1, %v1654_v56 }
 0x16d   : > { %1720 = vst.msk [vmem:[%s3229_s12 + $0xb0] sm:$0xff] %vm1697_vm1, %v1649_v15 }
 0x173   : > { %v1907_v42 = vpop.f32.mrb[8].mxu0 }
 0x174   : > { %v1584_v1 = vadd.f32 %v1907_v42, %v3225_v37  ;;  %v1578_v0 = vpop.f32.mrb[9].mxu0 }
 0x175   : > { %v1579_v24 = vadd.f32 %v3225_v37, %v1578_v0 }
 0x176   : > { %1707 = vst.msk [vmem:[%s3229_s12 + $0x48] sm:$0xff] %vm1697_vm1, %v1584_v1 }
 0x177   : > { %1706 = vst.msk [vmem:[%s3229_s12 + $0x40] sm:$0xff] %vm1697_vm1, %v1579_v24 }
 0x17e   : > { %v1931_v7 = vpop.f32.mrb[8].mxu1 }
 0x17f   : > { %v1664_v39 = vadd.f32 %v1931_v7, %v3225_v37  ;;  %v1658_v47 = vpop.f32.mrb[9].mxu1 }
 0x180   : > { %v1659_v26 = vadd.f32 %v3225_v37, %v1658_v47 }
 0x181   : > { %1723 = vst.msk [vmem:[%s3229_s12 + $0xc8] sm:$0xff] %vm1697_vm1, %v1664_v39 }
 0x182   : > { %1722 = vst.msk [vmem:[%s3229_s12 + $0xc0] sm:$0xff] %vm1697_vm1, %v1659_v26 }
 0x187   : > { %v1910_v35 = vpop.f32.mrb[10].mxu0 }
 0x188   : > { %v1594_v38 = vadd.f32 %v1910_v35, %v3225_v37  ;;  %v1588_v9 = vpop.f32.mrb[11].mxu0 }
 0x189   : > { %v1589_v61 = vadd.f32 %v3225_v37, %v1588_v9 }
 0x18a   : > { %1709 = vst.msk [vmem:[%s3229_s12 + $0x58] sm:$0xff] %vm1697_vm1, %v1594_v38 }
 0x18b   : > { %1708 = vst.msk [vmem:[%s3229_s12 + $0x50] sm:$0xff] %vm1697_vm1, %v1589_v61 }
 0x191   : > { %v1934_v22 = vpop.f32.mrb[10].mxu1 }
 0x192   : > { %v1674_v40 = vadd.f32 %v1934_v22, %v3225_v37  ;;  %v1668_v16 = vpop.f32.mrb[11].mxu1 }
 0x193   : > { %v1669_v27 = vadd.f32 %v3225_v37, %v1668_v16 }
 0x194   : > { %1725 = vst.msk [vmem:[%s3229_s12 + $0xd8] sm:$0xff] %vm1697_vm1, %v1674_v40 }
 0x195   : > { %1724 = vst.msk [vmem:[%s3229_s12 + $0xd0] sm:$0xff] %vm1697_vm1, %v1669_v27 }
 0x19c   : > { %v1913_v29 = vpop.f32.mrb[12].mxu0 }
 0x19d   : > { %v1604_v12 = vadd.f32 %v1913_v29, %v3225_v37  ;;  %v1598_v41 = vpop.f32.mrb[13].mxu0 }
 0x19e   : > { %v1599_v45 = vadd.f32 %v3225_v37, %v1598_v41 }
 0x19f   : > { %1711 = vst.msk [vmem:[%s3229_s12 + $0x68] sm:$0xff] %vm1697_vm1, %v1604_v12 }
 0x1a0   : > { %1710 = vst.msk [vmem:[%s3229_s12 + $0x60] sm:$0xff] %vm1697_vm1, %v1599_v45 }
 0x1a5   : > { %v1937_v54 = vpop.f32.mrb[12].mxu1 }
 0x1a6   : > { %v1684_v57 = vadd.f32 %v1937_v54, %v3225_v37  ;;  %v1678_v36 = vpop.f32.mrb[13].mxu1 }
 0x1a7   : > { %v1679_v31 = vadd.f32 %v3225_v37, %v1678_v36 }
 0x1a8   : > { %1727 = vst.msk [vmem:[%s3229_s12 + $0xe8] sm:$0xff] %vm1697_vm1, %v1684_v57 }
 0x1a9   : > { %1726 = vst.msk [vmem:[%s3229_s12 + $0xe0] sm:$0xff] %vm1697_vm1, %v1679_v31 }
 0x1af   : > { %v1916_v46 = vpop.f32.mrb[14].mxu0 }
 0x1b0   : > { %v1614_v62 = vadd.f32 %v1916_v46, %v3225_v37  ;;  %v1608_v20 = vpop.f32.mrb[15].mxu0 }
 0x1b1   : > { %v1609_v48 = vadd.f32 %v3225_v37, %v1608_v20 }
 0x1b2   : > { %1713 = vst.msk [vmem:[%s3229_s12 + $0x78] sm:$0xff] %vm1697_vm1, %v1614_v62 }
 0x1b3   : > { %1712 = vst.msk [vmem:[%s3229_s12 + $0x70] sm:$0xff] %vm1697_vm1, %v1609_v48 }
 0x1ba   : > { %v1940_v8 = vpop.f32.mrb[14].mxu1 }
 0x1bb   : > { %v1694_v52 = vadd.f32 %v1940_v8, %v3225_v37  ;;  %v1688_v10 = vpop.f32.mrb[15].mxu1 }
 0x1bc   : > { %v1689_v44 = vadd.f32 %v3225_v37, %v1688_v10 }
 0x1bd   : > { %1729 = vst.msk [vmem:[%s3229_s12 + $0xf8] sm:$0xff] %vm1697_vm1, %v1694_v52 }
 0x1be   : > { %1728 = vst.msk [vmem:[%s3229_s12 + $0xf0] sm:$0xff] %vm1697_vm1, %v1689_v44 }
 0x1bf   : > { %2004 = shalt.err (!%p2001_p3)
}
 0x1c0   : > { %s2005_s6 = scalar_lea.hbm %s3325_s17, 4096  ;;  %s2009_s9 = scalar_lea.hbm %s3382_s5, 8192 }
 0x1c1   : > { %p2006_p4 = scmp.ne.s32.totalorder %s3325_s17, %s2005_s6  ;;  %p2010_p9 = scmp.lt.u32.totalorder %s3325_s17, %s3382_s5 }
 0x1c2   : > { %p2011_p10 = scmp.lt.u32.totalorder %s2009_s9, %s2005_s6  ;;  %p2013_p12 = scmp.lt.u32.totalorder %s2005_s6, %s3325_s17 }
 0x1c3   : > { %p2007_p7 = pnand %p2006_p4, %p2127_p5 }
 0x1c4   : > { %p2012_p11 = por %p2011_p10, %p2010_p9 }
 0x1c5   : > { %p2008_p8 = pneg %p2007_p7 }
 0x1c6   : > { %p2014_p13 = por %p2013_p12, %p2012_p11 }
 0x1c8   : > { %p2015_p0 = pnand %p2014_p13, %p2008_p8 }
 0x1ca   : > { %2018 = shalt.err (!%p2015_p0)
}
 0x1cb   : > { %s2057_s12 = smov 128   ;;  %s2058_s13 = smov 8  }
 0x1cc   : > { %1947 = dma.vmem_to_hbm [thread:$0]  (%p2127_p5), %s3327_s14, 4096, %s3325_s17, %s3336_s22, %s2057_s12, %s2057_s12, %s2058_s13  }
 0x1cd PF: > { %p1953_p1 = scmp.ge.s32.totalorder %s2053_s21, 2  ;;  %s1759_s15 = sand.u32 1, %s2041_s18  }
 0x1ce   : > { %s1760_s16 = scalar_lea.sflag [#allocation4], %s1759_s15 }
 0x1cf   : > { %p1950_p2 = pnand %p1953_p1, %p2131_p6 }
 0x1d1   : > { %2036 = dma.done.wait (!%p1950_p2), %s1760_s16, 4096  }
 0x1d2   : > { %2038 = vsyncadd (!%p1950_p2), %s1760_s16, 4294963200  ;;  %p15_p3 = scmp.ge.s32.totalorder %s2114_s24, 4   ;;  %s3385_s18 = smov %s2045_s19 }
 0x1d3   : > { %s3386_s19 = smov %s2049_s20  ;;  %s3387_s20 = smov %s2125_s27 }
 0x1d4   : > { %s3388_s21 = smov %s2114_s24  ;;  %17 = sbr.rel (!%p15_p3) target bundleno = 3 (0x3), region = 77 }
 0x1db   :  { %1765 = vsyncpa [#allocation4], 1 }
 0x1dc   :  { %1767 = vsyncpa [#allocation4 + $0x1], 1 }

// kernel: forward.2
= control target key start
LH: loop header
LB: loop body
LE: loop exit
PB: predicated region body
PF: predicated region fallthrough
CT: control target
= control target key end

     0   :  { %s2692_s24 = smov 0   ;;  %s3973_s0 = inlined_call_operand.vmem [shape: f32[2,16,16,16], index: 0, kind: input, shape index: {}]   ;;  %s3974_s1 = inlined_call_operand.vmem [shape: f32[16,96], index: 1, kind: input, shape index: {}]   ;;  %s3975_s2 = inlined_call_operand.vmem [shape: f32[1,96], index: 2, kind: input, shape index: {}]   ;;  %s3976_s3 = inlined_call_operand.vmem [shape: f32[9,96], index: 3, kind: input, shape index: {}]   ;;  %s3977_s4 = inlined_call_operand.vmem [shape: f32[1,96], index: 4, kind: input, shape index: {}]   ;;  %s3978_s5 = inlined_call_operand.vmem [shape: f32[96,16], index: 5, kind: input, shape index: {}]   ;;  %s3979_s6 = inlined_call_operand.vmem [shape: f32[1,16], index: 6, kind: input, shape index: {}]   ;;  %s3980_s7 = inlined_call_operand.vmem [shape: f32[2,16,16,16], index: 7, kind: output, shape index: {}]  }
   0x1 LB: > { %s2277_s25 = sadd.s32 4294967295, %s2649_s24   ;;  %p2281_p0 = scmp.ge.s32.totalorder %s2649_s24, 1  ;;  %s2649_s24 = sphi %s2692_s24, %s17_s24  }
   0x2   : > { %p237_p1 = scmp.lt.s32.totalorder %s2649_s24, 3 }
   0x4   : > { %p238_p2 = pnand %p2281_p0, %p237_p1 }
   0x5   : > { %v384_v0 = vld [vmem:[%s3974_s1] sm:$0xff] (!%p238_p2)  ;;  %v385_v1 = vld [vmem:[%s3974_s1 + $0x8] sm:$0xff] (!%p238_p2)  ;;  %p2708_p3 = scmp.lt.s32.totalorder (!%p238_p2), %s2277_s25, 1  ;;  %vm311_vm0 = vcmask (!%p238_p2), 785408   ;;  %v2651_v3 = vmov (!%p238_p2), 0.0   ;;  %vm393_vm1 = vcmask (!%p238_p2), 130048   ;;  %v846_v54 = vlaneseq (!%p238_p2) }
   0x6   : > { %241 = sbr.rel (%p238_p2) target bundleno = 651 (0x28b), region = 48  ;;  %v2712_v2 = vpack.c.bf16 (!%p238_p2), %v385_v1, %v384_v0  ;;  %318 = vst.msk [vmem:[#allocation2 + $0x30] sm:$0xff] (!%p238_p2), %vm311_vm0, %v2651_v3  ;;  %312 = vst.msk [vmem:[#allocation2] sm:$0xff] (!%p238_p2), %vm311_vm0, %v2651_v3  ;;  %v1818_v36 = vld [vmem:[%s3978_s5] sm:$0xff] (!%p238_p2)  ;;  %v1819_v37 = vld [vmem:[%s3978_s5 + $0x8] sm:$0xff] (!%p238_p2) }
   0x7   : > { %313 = vst.msk [vmem:[#allocation2 + $0x8] sm:$0xff] (!%p238_p2), %vm311_vm0, %v2651_v3  ;;  %314 = vst.msk [vmem:[#allocation2 + $0x10] sm:$0xff] (!%p238_p2), %vm311_vm0, %v2651_v3  ;;  %v2564_v38 = vpack.c.bf16 (!%p238_p2), %v1819_v37, %v1818_v36  ;;  %v1820_v39 = vld [vmem:[%s3978_s5 + $0x10] sm:$0xff] (!%p238_p2)  ;;  %v1821_v40 = vld [vmem:[%s3978_s5 + $0x18] sm:$0xff] (!%p238_p2)  ;;  %v2974_v55 = vshrl.u32 (!%p238_p2), %v846_v54, 7 }
   0x8   : > { %315 = vst.msk [vmem:[#allocation2 + $0x18] sm:$0xff] (!%p238_p2), %vm311_vm0, %v2651_v3  ;;  %316 = vst.msk [vmem:[#allocation2 + $0x20] sm:$0xff] (!%p238_p2), %vm311_vm0, %v2651_v3  ;;  %2561 = vmatprep.subr.bf16.mxu0 (!%p238_p2), %v2712_v2  ;;  %v2568_v41 = vpack.c.bf16 (!%p238_p2), %v1821_v40, %v1820_v39  ;;  %v1822_v42 = vld [vmem:[%s3978_s5 + $0x20] sm:$0xff] (!%p238_p2)  ;;  %v1823_v43 = vld [vmem:[%s3978_s5 + $0x28] sm:$0xff] (!%p238_p2) }
   0x9   : > { %317 = vst.msk [vmem:[#allocation2 + $0x28] sm:$0xff] (!%p238_p2), %vm311_vm0, %v2651_v3  ;;  %319 = vst.msk [vmem:[#allocation2 + $0x38] sm:$0xff] (!%p238_p2), %vm311_vm0, %v2651_v3  ;;  %2563 = vmatpush3.bf16.msra.mxu0 (!%p238_p2), %v2712_v2  ;;  %2588 = vmatprep.subr.bf16.mxu1 (!%p238_p2), %v2564_v38  ;;  %v2572_v44 = vpack.c.bf16 (!%p238_p2), %v1823_v43, %v1822_v42  ;;  %v1824_v45 = vld [vmem:[%s3978_s5 + $0x30] sm:$0xff] (!%p238_p2)  ;;  %v1825_v46 = vld [vmem:[%s3978_s5 + $0x38] sm:$0xff] (!%p238_p2)  ;;  %v848_v56 = vsub.s32 (!%p238_p2), 0, %v2974_v55  ;;  %v948_v58 = vsub.s32 (!%p238_p2), 1, %v2974_v55 }
   0xa   : > { %320 = vst.msk [vmem:[#allocation2 + $0x40] sm:$0xff] (!%p238_p2), %vm311_vm0, %v2651_v3  ;;  %321 = vst.msk [vmem:[#allocation2 + $0x48] sm:$0xff] (!%p238_p2), %vm311_vm0, %v2651_v3  ;;  %2565 = vmatprep.subr.bf16.mxu0 (!%p238_p2), %v2564_v38  ;;  %2594 = vmatpush3.bf16.msra.mxu1 (!%p238_p2), %v2564_v38  ;;  %v2576_v47 = vpack.c.bf16 (!%p238_p2), %v1825_v46, %v1824_v45  ;;  %v1826_v48 = vld [vmem:[%s3978_s5 + $0x40] sm:$0xff] (!%p238_p2)  ;;  %v1827_v49 = vld [vmem:[%s3978_s5 + $0x48] sm:$0xff] (!%p238_p2)  ;;  %v1048_v2 = vsub.s32 (!%p238_p2), 2, %v2974_v55  ;;  %v1449_v36 = vsub.s32 (!%p238_p2), 6, %v2974_v55 }
   0xb   : > { %322 = vst.msk [vmem:[#allocation2 + $0x50] sm:$0xff] (!%p238_p2), %vm311_vm0, %v2651_v3  ;;  %323 = vst.msk [vmem:[#allocation2 + $0x58] sm:$0xff] (!%p238_p2), %vm311_vm0, %v2651_v3  ;;  %2589 = vmatprep.subr.bf16.mxu1 (!%p238_p2), %v2568_v41  ;;  %v2580_v50 = vpack.c.bf16 (!%p238_p2), %v1827_v49, %v1826_v48  ;;  %v1828_v51 = vld [vmem:[%s3978_s5 + $0x50] sm:$0xff] (!%p238_p2)  ;;  %v1829_v52 = vld [vmem:[%s3978_s5 + $0x58] sm:$0xff] (!%p238_p2)  ;;  %v1549_v37 = vsub.s32 (!%p238_p2), 7, %v2974_v55 }
   0xc   : > { %324 = vst.msk [vmem:[#allocation2 + $0x60] sm:$0xff] (!%p238_p2), %vm311_vm0, %v2651_v3  ;;  %325 = vst.msk [vmem:[#allocation2 + $0x68] sm:$0xff] (!%p238_p2), %vm311_vm0, %v2651_v3  ;;  %v2584_v53 = vpack.c.bf16 (!%p238_p2), %v1829_v52, %v1828_v51  ;;  %v2980_v57 = vld [vmem:[%s3976_s3] sm:$0xff] (!%p238_p2) }
   0xd   : > { %326 = vst.msk [vmem:[#allocation2 + $0x70] sm:$0xff] %vm311_vm0, %v2651_v3  ;;  %327 = vst.msk [vmem:[#allocation2 + $0x78] sm:$0xff] %vm311_vm0, %v2651_v3  ;;  %s3983_s25 = smov (!%p2708_p3, %s2277_s25), 1  ;;  %v2986_v59 = vld [vmem:[%s3975_s2] ss:$0 sm:$0xff]  ;;  %v2989_v61 = vrot.slane %v2980_v57, %v848_v56  ;;  %v2993_v1 = vrot.slane %v2980_v57, %v948_v58  ;;  %v3031_v51 = vrot.slane %v2980_v57, %v1449_v36 }
   0xe   : > { %328 = vst.msk [vmem:[#allocation2 + $0x80] sm:$0xff] %vm311_vm0, %v2651_v3  ;;  %329 = vst.msk [vmem:[#allocation2 + $0x88] sm:$0xff] %vm311_vm0, %v2651_v3  ;;  %s2356_s8 = sshll.u32 %s3983_s25, 8  ;;  %2595 = vmatpush3.bf16.msra.mxu1 %v2568_v41  ;;  %v814_v0 = vld [vmem:[#allocation2 + $0x7] sm:$0xff]  ;;  %v3034_v52 = vrot.slane %v2980_v57, %v1549_v37 }
   0xf   : > { %330 = vst.msk [vmem:[#allocation2 + $0x90] sm:$0xff] %vm311_vm0, %v2651_v3  ;;  %331 = vst.msk [vmem:[#allocation2 + $0x98] sm:$0xff] %vm311_vm0, %v2651_v3  ;;  %s2872_s11 = scalar_lea.vmem %s3973_s0, %s2356_s8  ;;  %2590 = vmatprep.subr.bf16.mxu1 %v2572_v44  ;;  %s3841_s14 = scalar_lea.vmem %s3980_s7, %s2356_s8 }
  0x10   : > { %332 = vst.msk [vmem:[#allocation2 + $0xa0] sm:$0xff] %vm311_vm0, %v2651_v3  ;;  %333 = vst.msk [vmem:[#allocation2 + $0xa8] sm:$0xff] %vm311_vm0, %v2651_v3  ;;  %v279_v4 = vld [vmem:[%s2872_s11] sm:$0xff]  ;;  %v280_v5 = vld [vmem:[%s2872_s11 + $0x8] sm:$0xff] }
  0x11   : > { %334 = vst.msk [vmem:[#allocation2 + $0xb0] sm:$0xff] %vm311_vm0, %v2651_v3  ;;  %335 = vst.msk [vmem:[#allocation2 + $0xb8] sm:$0xff] %vm311_vm0, %v2651_v3  ;;  %v281_v6 = vld [vmem:[%s2872_s11 + $0x10] sm:$0xff]  ;;  %2440 = vmatprep.mubr.msk.f32.mxu0 %vm393_vm1, %v279_v4  ;;  %v282_v7 = vld [vmem:[%s2872_s11 + $0x18] sm:$0xff] }
  0x12   : > { %336 = vst.msk [vmem:[#allocation2 + $0xc0] sm:$0xff] %vm311_vm0, %v2651_v3  ;;  %337 = vst.msk [vmem:[#allocation2 + $0xc8] sm:$0xff] %vm311_vm0, %v2651_v3  ;;  %2441 = vmatmul.mubr.msk.f32.vlgmr.msra.gmra.mrb[0].mxu0 %vm393_vm1, %v280_v5  ;;  %v283_v8 = vld [vmem:[%s2872_s11 + $0x20] sm:$0xff]  ;;  %v284_v9 = vld [vmem:[%s2872_s11 + $0x28] sm:$0xff]  ;;  %2596 = vmatpush3.bf16.msra.mxu1 %v2572_v44 }
  0x13   : > { %338 = vst.msk [vmem:[#allocation2 + $0xd0] sm:$0xff] %vm311_vm0, %v2651_v3  ;;  %339 = vst.msk [vmem:[#allocation2 + $0xd8] sm:$0xff] %vm311_vm0, %v2651_v3  ;;  %2443 = vmatprep.mubr.msk.f32.mxu0 %vm393_vm1, %v281_v6  ;;  %v285_v10 = vld [vmem:[%s2872_s11 + $0x30] sm:$0xff]  ;;  %v286_v11 = vld [vmem:[%s2872_s11 + $0x38] sm:$0xff]  ;;  %2567 = vmatpush3.bf16.msra.mxu0 %v2564_v38 }
  0x14   : > { %340 = vst.msk [vmem:[#allocation2 + $0xe0] sm:$0xff] %vm311_vm0, %v2651_v3  ;;  %341 = vst.msk [vmem:[#allocation2 + $0xe8] sm:$0xff] %vm311_vm0, %v2651_v3  ;;  %v287_v12 = vld [vmem:[%s2872_s11 + $0x40] sm:$0xff]  ;;  %v288_v13 = vld [vmem:[%s2872_s11 + $0x48] sm:$0xff]  ;;  %2569 = vmatprep.subr.bf16.mxu0 %v2568_v41  ;;  %2591 = vmatprep.subr.bf16.mxu1 %v2576_v47 }
  0x15   : > { %342 = vst.msk [vmem:[#allocation2 + $0xf0] sm:$0xff] %vm311_vm0, %v2651_v3  ;;  %343 = vst.msk [vmem:[#allocation2 + $0xf8] sm:$0xff] %vm311_vm0, %v2651_v3  ;;  %v289_v14 = vld [vmem:[%s2872_s11 + $0x50] sm:$0xff]  ;;  %v290_v15 = vld [vmem:[%s2872_s11 + $0x58] sm:$0xff] }
  0x16   : > { %344 = vst.msk [vmem:[#allocation2 + $0x100] sm:$0xff] %vm311_vm0, %v2651_v3  ;;  %345 = vst.msk [vmem:[#allocation2 + $0x108] sm:$0xff] %vm311_vm0, %v2651_v3  ;;  %2444 = vmatmul.mubr.msk.f32.gmra.mrb[2].mxu0 %vm393_vm1, %v282_v7  ;;  %v291_v16 = vld [vmem:[%s2872_s11 + $0x60] sm:$0xff]  ;;  %v292_v17 = vld [vmem:[%s2872_s11 + $0x68] sm:$0xff]  ;;  %2597 = vmatpush3.bf16.msra.mxu1 %v2576_v47 }
  0x17   : > { %346 = vst.msk [vmem:[#allocation2 + $0x110] sm:$0xff] %vm311_vm0, %v2651_v3  ;;  %347 = vst.msk [vmem:[#allocation2 + $0x118] sm:$0xff] %vm311_vm0, %v2651_v3  ;;  %2446 = vmatprep.mubr.msk.f32.mxu0 %vm393_vm1, %v283_v8  ;;  %v293_v18 = vld [vmem:[%s2872_s11 + $0x70] sm:$0xff]  ;;  %v294_v19 = vld [vmem:[%s2872_s11 + $0x78] sm:$0xff]  ;;  %2571 = vmatpush3.bf16.msra.mxu0 %v2568_v41  ;;  %v850_v8 = vmul.f32 %v2989_v61, %v814_v0 }
  0x18   : > { %348 = vst.msk [vmem:[#allocation2 + $0x120] sm:$0xff] %vm311_vm0, %v2651_v3  ;;  %349 = vst.msk [vmem:[#allocation2 + $0x128] sm:$0xff] %vm311_vm0, %v2651_v3  ;;  %v295_v20 = vld [vmem:[%s2872_s11 + $0x80] sm:$0xff]  ;;  %v296_v21 = vld [vmem:[%s2872_s11 + $0x88] sm:$0xff]  ;;  %2573 = vmatprep.subr.bf16.mxu0 %v2572_v44  ;;  %2592 = vmatprep.subr.bf16.mxu1 %v2580_v50 }
  0x19   : > { %350 = vst.msk [vmem:[#allocation2 + $0x130] sm:$0xff] %vm311_vm0, %v2651_v3  ;;  %351 = vst.msk [vmem:[#allocation2 + $0x138] sm:$0xff] %vm311_vm0, %v2651_v3  ;;  %v297_v22 = vld [vmem:[%s2872_s11 + $0x90] sm:$0xff]  ;;  %v298_v23 = vld [vmem:[%s2872_s11 + $0x98] sm:$0xff] }
  0x1a   : > { %352 = vst.msk [vmem:[#allocation2 + $0x140] sm:$0xff] %vm311_vm0, %v2651_v3  ;;  %353 = vst.msk [vmem:[#allocation2 + $0x148] sm:$0xff] %vm311_vm0, %v2651_v3  ;;  %2447 = vmatmul.mubr.msk.f32.gmra.mrb[4].mxu0 %vm393_vm1, %v284_v9  ;;  %v299_v24 = vld [vmem:[%s2872_s11 + $0xa0] sm:$0xff]  ;;  %v300_v25 = vld [vmem:[%s2872_s11 + $0xa8] sm:$0xff]  ;;  %2598 = vmatpush3.bf16.msra.mxu1 %v2580_v50  ;;  %v1248_v9 = vsub.s32 4, %v2974_v55 }
  0x1b   : > { %354 = vst.msk [vmem:[#allocation2 + $0x150] sm:$0xff] %vm311_vm0, %v2651_v3  ;;  %355 = vst.msk [vmem:[#allocation2 + $0x158] sm:$0xff] %vm311_vm0, %v2651_v3  ;;  %2449 = vmatprep.mubr.msk.f32.mxu0 %vm393_vm1, %v285_v10  ;;  %v301_v26 = vld [vmem:[%s2872_s11 + $0xb0] sm:$0xff]  ;;  %v302_v27 = vld [vmem:[%s2872_s11 + $0xb8] sm:$0xff]  ;;  %2575 = vmatpush3.bf16.msra.mxu0 %v2572_v44 }
  0x1c   : > { %356 = vst.msk [vmem:[#allocation2 + $0x160] sm:$0xff] %vm311_vm0, %v2651_v3  ;;  %357 = vst.msk [vmem:[#allocation2 + $0x168] sm:$0xff] %vm311_vm0, %v2651_v3  ;;  %v303_v28 = vld [vmem:[%s2872_s11 + $0xc0] sm:$0xff]  ;;  %v304_v29 = vld [vmem:[%s2872_s11 + $0xc8] sm:$0xff]  ;;  %2577 = vmatprep.subr.bf16.mxu0 %v2576_v47  ;;  %2593 = vmatprep.subr.bf16.mxu1 %v2584_v53 }
  0x1d   : > { %358 = vst.msk [vmem:[#allocation2 + $0x170] sm:$0xff] %vm311_vm0, %v2651_v3  ;;  %359 = vst.msk [vmem:[#allocation2 + $0x178] sm:$0xff] %vm311_vm0, %v2651_v3  ;;  %v305_v30 = vld [vmem:[%s2872_s11 + $0xd0] sm:$0xff]  ;;  %v306_v31 = vld [vmem:[%s2872_s11 + $0xd8] sm:$0xff] }
  0x1e   : > { %360 = vst.msk [vmem:[#allocation2 + $0x180] sm:$0xff] %vm311_vm0, %v2651_v3  ;;  %361 = vst.msk [vmem:[#allocation2 + $0x188] sm:$0xff] %vm311_vm0, %v2651_v3  ;;  %2450 = vmatmul.mubr.msk.f32.gmra.mrb[6].mxu0 %vm393_vm1, %v286_v11  ;;  %v307_v32 = vld [vmem:[%s2872_s11 + $0xe0] sm:$0xff]  ;;  %v308_v33 = vld [vmem:[%s2872_s11 + $0xe8] sm:$0xff]  ;;  %2599 = vmatpush3.bf16.msra.mxu1 %v2584_v53 }
  0x1f   : > { %362 = vst.msk [vmem:[#allocation2 + $0x190] sm:$0xff] %vm311_vm0, %v2651_v3  ;;  %363 = vst.msk [vmem:[#allocation2 + $0x198] sm:$0xff] %vm311_vm0, %v2651_v3  ;;  %2452 = vmatprep.mubr.msk.f32.mxu0 %vm393_vm1, %v287_v12  ;;  %v309_v34 = vld [vmem:[%s2872_s11 + $0xf0] sm:$0xff]  ;;  %v310_v35 = vld [vmem:[%s2872_s11 + $0xf8] sm:$0xff]  ;;  %2579 = vmatpush3.bf16.msra.mxu0 %v2576_v47 }
  0x20   : > { %364 = vst.msk [vmem:[#allocation2 + $0x1a0] sm:$0xff] %vm311_vm0, %v2651_v3  ;;  %365 = vst.msk [vmem:[#allocation2 + $0x1a8] sm:$0xff] %vm311_vm0, %v2651_v3  ;;  %2581 = vmatprep.subr.bf16.mxu0 %v2580_v50  ;;  %v914_v4 = vld [vmem:[#allocation2 + $0x8] sm:$0xff]  ;;  %v915_v11 = vld [vmem:[#allocation2 + $0x10] sm:$0xff] }
  0x21   : > { %366 = vst.msk [vmem:[#allocation2 + $0x1b0] sm:$0xff] %vm311_vm0, %v2651_v3  ;;  %367 = vst.msk [vmem:[#allocation2 + $0x1b8] sm:$0xff] %vm311_vm0, %v2651_v3  ;;  %v815_v10 = vld [vmem:[#allocation2 + $0xf] sm:$0xff] }
  0x22   : > { %368 = vst.msk [vmem:[#allocation2 + $0x1c0] sm:$0xff] %vm311_vm0, %v2651_v3  ;;  %369 = vst.msk [vmem:[#allocation2 + $0x1c8] sm:$0xff] %vm311_vm0, %v2651_v3  ;;  %2453 = vmatmul.mubr.msk.f32.gmra.mrb[8].mxu0 %vm393_vm1, %v288_v13 }
  0x23   : > { %370 = vst.msk [vmem:[#allocation2 + $0x1d0] sm:$0xff] %vm311_vm0, %v2651_v3  ;;  %371 = vst.msk [vmem:[#allocation2 + $0x1d8] sm:$0xff] %vm311_vm0, %v2651_v3  ;;  %2455 = vmatprep.mubr.msk.f32.mxu0 %vm393_vm1, %v289_v14  ;;  %2583 = vmatpush3.bf16.msra.mxu0 %v2580_v50 }
  0x24   : > { %372 = vst.msk [vmem:[#allocation2 + $0x1e0] sm:$0xff] %vm311_vm0, %v2651_v3  ;;  %373 = vst.msk [vmem:[#allocation2 + $0x1e8] sm:$0xff] %vm311_vm0, %v2651_v3  ;;  %2585 = vmatprep.subr.bf16.mxu0 %v2584_v53 }
  0x25   : > { %374 = vst.msk [vmem:[#allocation2 + $0x1f0] sm:$0xff] %vm311_vm0, %v2651_v3  ;;  %375 = vst.msk [vmem:[#allocation2 + $0x1f8] sm:$0xff] %vm311_vm0, %v2651_v3 }
  0x26   : > { %376 = vst.msk [vmem:[#allocation2 + $0x200] sm:$0xff] %vm311_vm0, %v2651_v3  ;;  %377 = vst.msk [vmem:[#allocation2 + $0x208] sm:$0xff] %vm311_vm0, %v2651_v3  ;;  %2456 = vmatmul.mubr.msk.f32.gmra.mrb[10].mxu0 %vm393_vm1, %v290_v15  ;;  %v950_v15 = vmul.f32 %v2993_v1, %v914_v4 }
  0x27   : > { %378 = vst.msk [vmem:[#allocation2 + $0x210] sm:$0xff] %vm311_vm0, %v2651_v3  ;;  %379 = vst.msk [vmem:[#allocation2 + $0x218] sm:$0xff] %vm311_vm0, %v2651_v3  ;;  %2458 = vmatprep.mubr.msk.f32.mxu0 %vm393_vm1, %v291_v16  ;;  %2587 = vmatpush3.bf16.msra.mxu0 %v2584_v53  ;;  %v3002_v16 = vrot.slane %v2980_v57, %v1048_v2 }
  0x28   : > { %380 = vst.msk [vmem:[#allocation2 + $0x220] sm:$0xff] %vm311_vm0, %v2651_v3  ;;  %381 = vst.msk [vmem:[#allocation2 + $0x228] sm:$0xff] %vm311_vm0, %v2651_v3 }
  0x29   : > { %382 = vst.msk [vmem:[#allocation2 + $0x230] sm:$0xff] %vm311_vm0, %v2651_v3  ;;  %383 = vst.msk [vmem:[#allocation2 + $0x238] sm:$0xff] %vm311_vm0, %v2651_v3 }
  0x2a   : > { %2459 = vmatmul.mubr.msk.f32.gmra.mrb[12].mxu0 %vm393_vm1, %v292_v17 }
  0x2b   : > { %2461 = vmatprep.mubr.msk.f32.mxu0 %vm393_vm1, %v293_v18 }
  0x2e   : > { %2462 = vmatmul.mubr.msk.f32.gmra.mrb[14].mxu0 %vm393_vm1, %v294_v19  ;;  %v1014_v19 = vld [vmem:[#allocation2 + $0x9] sm:$0xff] }
  0x2f   : > { %2464 = vmatprep.mubr.msk.f32.mxu0 %vm393_vm1, %v295_v20 }
  0x32   : > { %2465 = vmatmul.mubr.msk.f32.gmra.mrb[16].mxu0 %vm393_vm1, %v296_v21  ;;  %v1348_v21 = vsub.s32 5, %v2974_v55 }
  0x33   : > { %2467 = vmatprep.mubr.msk.f32.mxu0 %vm393_vm1, %v297_v22  ;;  %v851_v22 = vmul.f32 %v2989_v61, %v815_v10  ;;  %v3054_v10 = vld [vmem:[%s3976_s3 + $0x8] ss:$0 sm:$0xff] }
  0x34   : > { %v3021_v39 = vrot.slane %v2980_v57, %v1348_v21 }
  0x36   : > { %2468 = vmatmul.mubr.msk.f32.gmra.mrb[18].mxu0 %vm393_vm1, %v298_v23  ;;  %v951_v23 = vmul.f32 %v2993_v1, %v915_v11 }
  0x37   : > { %2470 = vmatprep.mubr.msk.f32.mxu0 %vm393_vm1, %v299_v24 }
  0x38   : > { %v983_v40 = vadd.f32 %v951_v23, %v851_v22 }
  0x3a   : > { %2471 = vmatmul.mubr.msk.f32.gmra.mrb[20].mxu0 %vm393_vm1, %v300_v25 }
  0x3b   : > { %2473 = vmatprep.mubr.msk.f32.mxu0 %vm393_vm1, %v301_v26  ;;  %v1148_v26 = vsub.s32 3, %v2974_v55 }
  0x3d   : > { %v3026_v44 = vrot.slane %v2980_v57, %v1148_v26 }
  0x3e   : > { %2474 = vmatmul.mubr.msk.f32.gmra.mrb[22].mxu0 %vm393_vm1, %v302_v27  ;;  %v3012_v27 = vrot.slane %v2980_v57, %v1248_v9 }
  0x3f   : > { %2476 = vmatprep.mubr.msk.f32.mxu0 %vm393_vm1, %v303_v28  ;;  %v1015_v28 = vld [vmem:[#allocation2 + $0x11] sm:$0xff] }
  0x40   : > { %v1051_v41 = vmul.f32 %v3002_v16, %v1015_v28 }
  0x42   : > { %2477 = vmatmul.mubr.msk.f32.gmra.mrb[24].mxu0 %vm393_vm1, %v304_v29 }
  0x43   : > { %2479 = vmatprep.mubr.msk.f32.mxu0 %vm393_vm1, %v305_v30 }
  0x46   : > { %2480 = vmatmul.mubr.msk.f32.gmra.mrb[26].mxu0 %vm393_vm1, %v306_v31 }
  0x47   : > { %2482 = vmatprep.mubr.msk.f32.mxu0 %vm393_vm1, %v307_v32  ;;  %v982_v32 = vadd.f32 %v950_v15, %v850_v8 }
  0x4a   : > { %2483 = vmatmul.mubr.msk.f32.gmra.mrb[28].mxu0 %vm393_vm1, %v308_v33  ;;  %v1050_v33 = vmul.f32 %v3002_v16, %v1014_v19 }
  0x4b   : > { %2485 = vmatprep.mubr.msk.f32.mxu0 %vm393_vm1, %v309_v34 }
  0x4c   : > { %v1082_v48 = vadd.f32 %v1050_v33, %v982_v32 }
  0x4e   : > { %2486 = vmatmul.mubr.msk.f32.gmra.mrb[30].mxu0 %vm393_vm1, %v310_v35 }
  0xe5   : > { %v2442_v60 = vpop.f32.mrb[0].mxu0 }
  0xe6   : > { %v562_v62 = vadd.f32 %v2442_v60, %v2986_v59  ;;  %v556_v63 = vpop.f32.mrb[1].mxu0 }
  0xe7   : > { %v557_v3 = vadd.f32 %v2986_v59, %v556_v63 }
  0xe8   : > { %v716_v5 = vmax.f32 %v562_v62, 0.0  ;;  %v1083_v62 = vadd.f32 %v1051_v41, %v983_v40 }
  0xe9   : > { %v715_v6 = vmax.f32 %v557_v3, 0.0  ;;  %v2445_v7 = vpop.f32.mrb[2].mxu0 }
  0xea   : > { %v748_v12 = vmin.f32 %v716_v5, 6.0  ;;  %v572_v13 = vadd.f32 %v2445_v7, %v2986_v59  ;;  %v566_v14 = vpop.f32.mrb[3].mxu0 }
  0xeb   : > { %v747_v17 = vmin.f32 %v715_v6, 6.0  ;;  %v567_v18 = vadd.f32 %v2986_v59, %v566_v14 }
  0xec   : > { %781 = vst.msk [vmem:[#allocation2 + $0x30] sm:$0xff] %vm311_vm0, %v748_v12  ;;  %v718_v20 = vmax.f32 %v572_v13, 0.0 }
  0xed   : > { %780 = vst.msk [vmem:[#allocation2 + $0x28] sm:$0xff] %vm311_vm0, %v747_v17  ;;  %v717_v24 = vmax.f32 %v567_v18, 0.0  ;;  %v2448_v25 = vpop.f32.mrb[4].mxu0 }
  0xee   : > { %v750_v29 = vmin.f32 %v718_v20, 6.0  ;;  %v582_v30 = vadd.f32 %v2448_v25, %v2986_v59  ;;  %v576_v31 = vpop.f32.mrb[5].mxu0 }
  0xef   : > { %v749_v34 = vmin.f32 %v717_v24, 6.0  ;;  %v577_v35 = vadd.f32 %v2986_v59, %v576_v31 }
  0xf0   : > { %783 = vst.msk [vmem:[#allocation2 + $0x50] sm:$0xff] %vm311_vm0, %v750_v29  ;;  %v720_v38 = vmax.f32 %v582_v30, 0.0 }
  0xf1   : > { %782 = vst.msk [vmem:[#allocation2 + $0x48] sm:$0xff] %vm311_vm0, %v749_v34  ;;  %v719_v42 = vmax.f32 %v577_v35, 0.0  ;;  %v2451_v43 = vpop.f32.mrb[6].mxu0 }
  0xf2   : > { %v752_v45 = vmin.f32 %v720_v38, 6.0  ;;  %v592_v46 = vadd.f32 %v2451_v43, %v2986_v59  ;;  %v586_v47 = vpop.f32.mrb[7].mxu0 }
  0xf3   : > { %v751_v49 = vmin.f32 %v719_v42, 6.0  ;;  %v587_v50 = vadd.f32 %v2986_v59, %v586_v47  ;;  %v1215_v53 = vld [vmem:[#allocation2 + $0x30] sm:$0xff] }
  0xf4   : > { %v3036_v54 = vld [vmem:[#allocation2 + $0x31] sm:$0xff]  ;;  %785 = vst.msk [vmem:[#allocation2 + $0x70] sm:$0xff] %vm311_vm0, %v752_v45  ;;  %v722_v55 = vmax.f32 %v592_v46, 0.0  ;;  %v1114_v56 = vld [vmem:[#allocation2 + $0x27] sm:$0xff]  ;;  %v1251_v63 = vmul.f32 %v3012_v27, %v1215_v53  ;;  %v3048_v6 = vmul.f32 %v1215_v53, %v2993_v1 }
  0xf5   : > { %v1214_v58 = vld [vmem:[#allocation2 + $0x28] sm:$0xff]  ;;  %v1351_v0 = vmul.f32 %v3021_v39, %v3036_v54  ;;  %784 = vst.msk [vmem:[#allocation2 + $0x68] sm:$0xff] %vm311_vm0, %v751_v49  ;;  %v721_v2 = vmax.f32 %v587_v50, 0.0  ;;  %v2454_v57 = vpop.f32.mrb[8].mxu0  ;;  %v1150_v3 = vmul.f32 %v3026_v44, %v1114_v56  ;;  %v852_v19 = vmul.f32 %v1114_v56, %v2989_v61 }
  0xf6   : > { %v1314_v60 = vld [vmem:[#allocation2 + $0x29] sm:$0xff]  ;;  %v1250_v4 = vmul.f32 %v3012_v27, %v1214_v58  ;;  %v754_v7 = vmin.f32 %v722_v55, 6.0  ;;  %v602_v8 = vadd.f32 %v2454_v57, %v2986_v59  ;;  %v596_v9 = vpop.f32.mrb[9].mxu0  ;;  %v952_v25 = vmul.f32 %v1214_v58, %v2993_v1 }
  0xf7   : > { %v3045_v5 = vld [vmem:[#allocation2 + $0x2f] sm:$0xff]  ;;  %v1350_v11 = vmul.f32 %v3021_v39, %v1314_v60  ;;  %v753_v13 = vmin.f32 %v721_v2, 6.0  ;;  %v597_v14 = vadd.f32 %v2986_v59, %v596_v9  ;;  %v1182_v15 = vadd.f32 %v1150_v3, %v1082_v48 }
  0xf8   : > { %v1151_v12 = vmul.f32 %v3026_v44, %v3045_v5  ;;  %v3060_v17 = vld [vmem:[#allocation2 + $0x50] sm:$0xff]  ;;  %787 = vst.msk [vmem:[#allocation2 + $0x90] sm:$0xff] %vm311_vm0, %v754_v7  ;;  %v724_v20 = vmax.f32 %v602_v8, 0.0  ;;  %v3066_v21 = vld [vmem:[#allocation2 + $0x47] sm:$0xff]  ;;  %v984_v47 = vadd.f32 %v952_v25, %v852_v19  ;;  %v1052_v48 = vmul.f32 %v1314_v60, %v3002_v16 }
  0xf9   : > { %v3062_v18 = vld [vmem:[#allocation2 + $0x51] sm:$0xff]  ;;  %v3068_v22 = vld [vmem:[#allocation2 + $0x48] sm:$0xff]  ;;  %v1552_v24 = vmul.f32 %v3034_v52, %v3060_v17  ;;  %786 = vst.msk [vmem:[#allocation2 + $0x88] sm:$0xff] %vm311_vm0, %v753_v13  ;;  %v723_v26 = vmax.f32 %v597_v14, 0.0  ;;  %v2457_v28 = vpop.f32.mrb[10].mxu0  ;;  %v1282_v29 = vadd.f32 %v1250_v4, %v1182_v15  ;;  %v1451_v30 = vmul.f32 %v3031_v51, %v3066_v21 }
  0xfa   : > { %v1183_v23 = vadd.f32 %v1151_v12, %v1083_v62  ;;  %v3076_v31 = vld [vmem:[#allocation2 + $0x4f] sm:$0xff]  ;;  %v1652_v32 = vmul.f32 %v3054_v10, %v3062_v18  ;;  %v756_v33 = vmin.f32 %v724_v20, 6.0  ;;  %v612_v34 = vadd.f32 %v2457_v28, %v2986_v59  ;;  %v606_v35 = vpop.f32.mrb[11].mxu0 }
  0xfb   : > { %v1551_v36 = vmul.f32 %v3034_v52, %v3068_v22  ;;  %v3083_v37 = vld [vmem:[#allocation2 + $0x49] sm:$0xff]  ;;  %v755_v40 = vmin.f32 %v723_v26, 6.0  ;;  %v607_v41 = vadd.f32 %v2986_v59, %v606_v35  ;;  %v1382_v42 = vadd.f32 %v1350_v11, %v1282_v29  ;;  %v3107_v11 = vld [vmem:[%s3977_s4] ss:$0 sm:$0xff] }
  0xfc   : > { %v1283_v38 = vadd.f32 %v1251_v63, %v1183_v23  ;;  %v1452_v43 = vmul.f32 %v3031_v51, %v3076_v31  ;;  %789 = vst.msk [vmem:[#allocation2 + $0xb0] sm:$0xff] %vm311_vm0, %v756_v33  ;;  %v726_v45 = vmax.f32 %v612_v34, 0.0  ;;  %v1651_v55 = vmul.f32 %v3054_v10, %v3083_v37  ;;  %v3096_v57 = vld [vmem:[#allocation2 + $0x67] sm:$0xff] }
  0xfd   : > { %788 = vst.msk [vmem:[#allocation2 + $0xa8] sm:$0xff] %vm311_vm0, %v755_v40  ;;  %v725_v49 = vmax.f32 %v607_v41, 0.0  ;;  %v2460_v50 = vpop.f32.mrb[12].mxu0  ;;  %v1483_v53 = vadd.f32 %v1451_v30, %v1382_v42  ;;  %v1152_v56 = vmul.f32 %v3066_v21, %v3026_v44  ;;  %v3098_v60 = vld [vmem:[#allocation2 + $0x68] sm:$0xff]  ;;  %v1252_v8 = vmul.f32 %v3068_v22, %v3012_v27 }
  0xfe   : > { %v1383_v46 = vadd.f32 %v1351_v0, %v1283_v38  ;;  %v758_v58 = vmin.f32 %v726_v45, 6.0  ;;  %v622_v62 = vadd.f32 %v2460_v50, %v2986_v59  ;;  %v616_v63 = vpop.f32.mrb[13].mxu0  ;;  %v1084_v0 = vadd.f32 %v1052_v48, %v984_v47 }
  0xff   : > { %v757_v3 = vmin.f32 %v725_v49, 6.0  ;;  %v617_v4 = vadd.f32 %v2986_v59, %v616_v63  ;;  %v1583_v7 = vadd.f32 %v1551_v36, %v1483_v53  ;;  %v1352_v14 = vmul.f32 %v3083_v37, %v3021_v39 }
 0x100   : > { %v1484_v2 = vadd.f32 %v1452_v43, %v1383_v46  ;;  %791 = vst.msk [vmem:[#allocation2 + $0xd0] sm:$0xff] %vm311_vm0, %v758_v58  ;;  %v728_v9 = vmax.f32 %v622_v62, 0.0  ;;  %v1184_v13 = vadd.f32 %v1152_v56, %v1084_v0  ;;  %v1453_v23 = vmul.f32 %v3031_v51, %v3096_v57  ;;  %v3126_v46 = vld [vmem:[#allocation2 + $0x69] sm:$0xff] }
 0x101   : > { %790 = vst.msk [vmem:[#allocation2 + $0xc8] sm:$0xff] %vm311_vm0, %v757_v3  ;;  %v727_v15 = vmax.f32 %v617_v4, 0.0  ;;  %v2463_v19 = vpop.f32.mrb[14].mxu0  ;;  %v1683_v20 = vadd.f32 %v1651_v55, %v1583_v7  ;;  %v1553_v25 = vmul.f32 %v3034_v52, %v3098_v60  ;;  %v853_v36 = vmul.f32 %v3045_v5, %v2989_v61  ;;  %v3136_v3 = vld [vmem:[#allocation2 + $0x6f] sm:$0xff] }
 0x102   : > { %v1584_v12 = vadd.f32 %v1552_v24, %v1484_v2  ;;  %v760_v26 = vmin.f32 %v728_v9, 6.0  ;;  %v632_v28 = vadd.f32 %v2463_v19, %v2986_v59  ;;  %v626_v29 = vpop.f32.mrb[15].mxu0  ;;  %v1284_v30 = vadd.f32 %v1252_v8, %v1184_v13 }
 0x103   : > { %v759_v33 = vmin.f32 %v727_v15, 6.0  ;;  %v627_v34 = vadd.f32 %v2986_v59, %v626_v29  ;;  %v1722_v35 = vadd.f32 %v3107_v11, %v1683_v20  ;;  %v1053_v42 = vmul.f32 %v3036_v54, %v3002_v16 }
 0x104   : > { %v1684_v24 = vadd.f32 %v1652_v32, %v1584_v12  ;;  %793 = vst.msk [vmem:[#allocation2 + $0xf0] sm:$0xff] %vm311_vm0, %v760_v26  ;;  %v730_v38 = vmax.f32 %v632_v28, 0.0  ;;  %v1384_v41 = vadd.f32 %v1352_v14, %v1284_v30  ;;  %v985_v47 = vadd.f32 %v3048_v6, %v853_v36 }
 0x105   : > { %792 = vst.msk [vmem:[#allocation2 + $0xe8] sm:$0xff] %vm311_vm0, %v759_v33  ;;  %v729_v32 = vmax.f32 %v627_v34, 0.0  ;;  %v2466_v43 = vpop.f32.mrb[16].mxu0  ;;  %v1754_v45 = vmax.f32 %v1722_v35, 0.0  ;;  %v1153_v5 = vmul.f32 %v3076_v31, %v3026_v44  ;;  %v1653_v6 = vmul.f32 %v3054_v10, %v3126_v46 }
 0x106   : > { %v1723_v40 = vadd.f32 %v3107_v11, %v1684_v24  ;;  %v762_v48 = vmin.f32 %v730_v38, 6.0  ;;  %v642_v49 = vadd.f32 %v2466_v43, %v2986_v59  ;;  %v636_v50 = vpop.f32.mrb[17].mxu0  ;;  %v1485_v55 = vadd.f32 %v1453_v23, %v1384_v41  ;;  %v3151_v24 = vld [vmem:[#allocation2 + $0x70] sm:$0xff] }
 0x107   : > { %v761_v56 = vmin.f32 %v729_v32, 6.0  ;;  %v637_v54 = vadd.f32 %v2986_v59, %v636_v50  ;;  %v1786_v58 = vmin.f32 %v1754_v45, 6.0  ;;  %v1085_v62 = vadd.f32 %v1053_v42, %v985_v47 }
 0x108   : > { %v1755_v53 = vmax.f32 %v1723_v40, 0.0  ;;  %795 = vst.msk [vmem:[#allocation2 + $0x110] sm:$0xff] %vm311_vm0, %v762_v48  ;;  %v732_v63 = vmax.f32 %v642_v49, 0.0  ;;  %v1585_v0 = vadd.f32 %v1553_v25, %v1485_v55  ;;  %v1253_v9 = vmul.f32 %v3060_v17, %v3012_v27 }
 0x109   : > { %794 = vst.msk [vmem:[#allocation2 + $0x108] sm:$0xff] %vm311_vm0, %v761_v56  ;;  %v731_v4 = vmax.f32 %v637_v54, 0.0  ;;  %v2469_v7 = vpop.f32.mrb[18].mxu0  ;;  %2512 = vmatprep.mubr.msk.f32.mxu0 %vm311_vm0, %v1786_v58  ;;  %v1185_v8 = vadd.f32 %v1153_v5, %v1085_v62  ;;  %v1353_v19 = vmul.f32 %v3062_v18, %v3021_v39  ;;  %v1454_v26 = vmul.f32 %v3031_v51, %v3136_v3 }
 0x10a   : > { %v1787_v2 = vmin.f32 %v1755_v53, 6.0  ;;  %v764_v12 = vmin.f32 %v732_v63, 6.0  ;;  %v652_v13 = vadd.f32 %v2469_v7, %v2986_v59  ;;  %v646_v14 = vpop.f32.mrb[19].mxu0  ;;  %v1685_v15 = vadd.f32 %v1653_v6, %v1585_v0  ;;  %v3176_v0 = vld [vmem:[#allocation2 + $0x87] sm:$0xff] }
 0x10b   : > { %v763_v20 = vmin.f32 %v731_v4, 6.0  ;;  %v647_v23 = vadd.f32 %v2986_v59, %v646_v14  ;;  %v1285_v25 = vadd.f32 %v1253_v9, %v1185_v8  ;;  %v854_v30 = vmul.f32 %v3066_v21, %v2989_v61  ;;  %v3163_v21 = vld [vmem:[#allocation2 + $0x71] sm:$0xff] }
 0x10c   : > { %2513 = vmatmul.mubr.msk.f32.vlgmr.msra.gmra.mrb[32].mxu0 %vm311_vm0, %v1787_v2  ;;  %797 = vst.msk [vmem:[#allocation2 + $0x130] sm:$0xff] %vm311_vm0, %v764_v12  ;;  %v734_v28 = vmax.f32 %v652_v13, 0.0  ;;  %v1724_v29 = vadd.f32 %v3107_v11, %v1685_v15  ;;  %v954_v33 = vmul.f32 %v3068_v22, %v2993_v1  ;;  %v1054_v38 = vmul.f32 %v3083_v37, %v3002_v16  ;;  %v3184_v15 = vld [vmem:[#allocation2 + $0x88] sm:$0xff] }
 0x10d   : > { %796 = vst.msk [vmem:[#allocation2 + $0x128] sm:$0xff] %vm311_vm0, %v763_v20  ;;  %v733_v34 = vmax.f32 %v647_v23, 0.0  ;;  %v2472_v35 = vpop.f32.mrb[20].mxu0  ;;  %v1385_v36 = vadd.f32 %v1353_v19, %v1285_v25  ;;  %v1154_v40 = vmul.f32 %v3096_v57, %v3026_v44  ;;  %v1554_v48 = vmul.f32 %v3034_v52, %v3151_v24  ;;  %v3186_v19 = vld [vmem:[#allocation2 + $0x89] sm:$0xff] }
 0x10e   : > { %v766_v41 = vmin.f32 %v734_v28, 6.0  ;;  %v662_v42 = vadd.f32 %v2472_v35, %v2986_v59  ;;  %v1756_v32 = vmax.f32 %v1724_v29, 0.0  ;;  %v656_v43 = vpop.f32.mrb[21].mxu0  ;;  %v986_v45 = vadd.f32 %v954_v33, %v854_v30 }
 0x10f   : > { %v765_v22 = vmin.f32 %v733_v34, 6.0  ;;  %v657_v47 = vadd.f32 %v2986_v59, %v656_v43  ;;  %v1486_v5 = vadd.f32 %v1454_v26, %v1385_v36  ;;  %v1654_v56 = vmul.f32 %v3054_v10, %v3163_v21  ;;  %v3207_v43 = vld [vmem:[#allocation2 + $0x90] sm:$0xff] }
 0x110   : > { %799 = vst.msk [vmem:[#allocation2 + $0x150] sm:$0xff] %vm311_vm0, %v766_v41  ;;  %v736_v37 = vmax.f32 %v662_v42, 0.0  ;;  %v1788_v49 = vmin.f32 %v1756_v32, 6.0  ;;  %v1086_v50 = vadd.f32 %v1054_v38, %v986_v45  ;;  %v1254_v2 = vmul.f32 %v3098_v60, %v3012_v27  ;;  %v3202_v41 = vld [vmem:[#allocation2 + $0x8f] sm:$0xff] }
 0x111   : > { %798 = vst.msk [vmem:[#allocation2 + $0x148] sm:$0xff] %vm311_vm0, %v765_v22  ;;  %v735_v53 = vmax.f32 %v657_v47, 0.0  ;;  %v1586_v55 = vadd.f32 %v1554_v48, %v1486_v5  ;;  %v2475_v54 = vpop.f32.mrb[22].mxu0  ;;  %v855_v9 = vmul.f32 %v3076_v31, %v2989_v61  ;;  %v1354_v14 = vmul.f32 %v3126_v46, %v3021_v39  ;;  %v3213_v5 = vld [vmem:[#allocation2 + $0x91] sm:$0xff] }
 0x112   : > { %v768_v58 = vmin.f32 %v736_v37, 6.0  ;;  %2515 = vmatprep.mubr.msk.f32.mxu0 %vm311_vm0, %v1788_v49  ;;  %v672_v62 = vadd.f32 %v2475_v54, %v2986_v59  ;;  %v1186_v63 = vadd.f32 %v1154_v40, %v1086_v50  ;;  %v666_v6 = vpop.f32.mrb[23].mxu0  ;;  %v955_v20 = vmul.f32 %v3060_v17, %v2993_v1 }
 0x113   : > { %v767_v4 = vmin.f32 %v735_v53, 6.0  ;;  %v1686_v7 = vadd.f32 %v1654_v56, %v1586_v55  ;;  %v667_v8 = vadd.f32 %v2986_v59, %v666_v6  ;;  %v1455_v31 = vmul.f32 %v3031_v51, %v3176_v0 }
 0x114   : > { %801 = vst.msk [vmem:[#allocation2 + $0x170] sm:$0xff] %vm311_vm0, %v768_v58  ;;  %v738_v12 = vmax.f32 %v672_v62, 0.0  ;;  %v1286_v13 = vadd.f32 %v1254_v2, %v1186_v63  ;;  %v1055_v26 = vmul.f32 %v3062_v18, %v3002_v16  ;;  %v987_v33 = vadd.f32 %v955_v20, %v855_v9 }
 0x115   : > { %800 = vst.msk [vmem:[#allocation2 + $0x168] sm:$0xff] %vm311_vm0, %v767_v4  ;;  %v1725_v23 = vadd.f32 %v3107_v11, %v1686_v7  ;;  %v737_v25 = vmax.f32 %v667_v8, 0.0  ;;  %v2478_v28 = vpop.f32.mrb[24].mxu0  ;;  %v1155_v34 = vmul.f32 %v3136_v3, %v3026_v44  ;;  %v1555_v36 = vmul.f32 %v3034_v52, %v3184_v15  ;;  %v3232_v7 = vld [vmem:[#allocation2 + $0xa7] sm:$0xff] }
 0x116   : > { %v770_v29 = vmin.f32 %v738_v12, 6.0  ;;  %v1386_v30 = vadd.f32 %v1354_v14, %v1286_v13  ;;  %v676_v35 = vpop.f32.mrb[25].mxu0  ;;  %v1655_v38 = vmul.f32 %v3054_v10, %v3186_v19  ;;  %v1087_v42 = vadd.f32 %v1055_v26, %v987_v33 }
 0x117   : > { %v1757_v17 = vmax.f32 %v1725_v23, 0.0  ;;  %v769_v40 = vmin.f32 %v737_v25, 6.0  ;;  %v1255_v32 = vmul.f32 %v3151_v24, %v3012_v27  ;;  %v682_v45 = vadd.f32 %v2478_v28, %v2986_v59  ;;  %v3247_v25 = vld [vmem:[#allocation2 + $0xa9] sm:$0xff] }
 0x118   : > { %803 = vst.msk [vmem:[#allocation2 + $0x190] sm:$0xff] %vm311_vm0, %v770_v29  ;;  %v1487_v18 = vadd.f32 %v1455_v31, %v1386_v30  ;;  %v1355_v47 = vmul.f32 %v3163_v21, %v3021_v39  ;;  %v856_v48 = vmul.f32 %v3096_v57, %v2989_v61  ;;  %v956_v37 = vmul.f32 %v3098_v60, %v2993_v1  ;;  %v3245_v31 = vld [vmem:[#allocation2 + $0xa8] sm:$0xff] }
 0x119   : > { %v1789_v22 = vmin.f32 %v1757_v17, 6.0  ;;  %802 = vst.msk [vmem:[#allocation2 + $0x188] sm:$0xff] %vm311_vm0, %v769_v40  ;;  %v2481_v49 = vpop.f32.mrb[26].mxu0  ;;  %v1187_v53 = vadd.f32 %v1155_v34, %v1087_v42  ;;  %v1456_v55 = vmul.f32 %v3031_v51, %v3202_v41  ;;  %v740_v56 = vmax.f32 %v682_v45, 0.0 }
 0x11a   : > { %v1587_v50 = vadd.f32 %v1555_v36, %v1487_v18  ;;  %v3221_v54 = vpop.f32.mrb[27].mxu0  ;;  %v1556_v58 = vmul.f32 %v3034_v52, %v3207_v43  ;;  %v988_v62 = vadd.f32 %v956_v37, %v856_v48  ;;  %v1056_v57 = vmul.f32 %v3126_v46, %v3002_v16  ;;  %v3270_v37 = vld [vmem:[#allocation2 + $0xaf] sm:$0xff] }
 0x11b   : > { %2516 = vmatmul.mubr.msk.f32.gmra.mrb[34].mxu0 %vm311_vm0, %v1789_v22  ;;  %v1156_v60 = vmul.f32 %v3176_v0, %v3026_v44  ;;  %v1287_v2 = vadd.f32 %v1255_v32, %v1187_v53  ;;  %v1656_v6 = vmul.f32 %v3054_v10, %v3213_v5  ;;  %v772_v4 = vmin.f32 %v740_v56, 6.0 }
 0x11c   : > { %v1687_v63 = vadd.f32 %v1655_v38, %v1587_v50  ;;  %v1088_v8 = vadd.f32 %v1056_v57, %v988_v62  ;;  %v1256_v9 = vmul.f32 %v3184_v15, %v3012_v27  ;;  %v677_v12 = vadd.f32 %v2986_v59, %v676_v35  ;;  %v3272_v50 = vld [vmem:[#allocation2 + $0xb0] sm:$0xff] }
 0x11d   : > { %v857_v46 = vmul.f32 %v3136_v3, %v2989_v61  ;;  %v3239_v13 = vpop.f32.mrb[28].mxu0  ;;  %v1387_v20 = vadd.f32 %v1355_v47, %v1287_v2  ;;  %805 = vst.msk [vmem:[#allocation2 + $0x1b0] sm:$0xff] %vm311_vm0, %v772_v4  ;;  %v1356_v23 = vmul.f32 %v3186_v19, %v3021_v39  ;;  %v957_v26 = vmul.f32 %v3151_v24, %v2993_v1 }
 0x11e   : > { %v1726_v14 = vadd.f32 %v3107_v11, %v1687_v63  ;;  %v3251_v28 = vpop.f32.mrb[29].mxu0  ;;  %v1188_v3 = vadd.f32 %v1156_v60, %v1088_v8  ;;  %v1457_v29 = vmul.f32 %v3031_v51, %v3232_v7  ;;  %v739_v30 = vmax.f32 %v677_v12, 0.0 }
 0x11f   : > { %v1057_v33 = vmul.f32 %v3163_v21, %v3002_v16  ;;  %v1488_v35 = vadd.f32 %v1456_v55, %v1387_v20  ;;  %v989_v17 = vadd.f32 %v957_v26, %v857_v46  ;;  %v1157_v36 = vmul.f32 %v3202_v41, %v3026_v44 }
 0x120   : > { %v1758_v34 = vmax.f32 %v1726_v14, 0.0  ;;  %v1288_v38 = vadd.f32 %v1256_v9, %v1188_v3  ;;  %v1557_v24 = vmul.f32 %v3034_v52, %v3245_v31  ;;  %v1657_v40 = vmul.f32 %v3054_v10, %v3247_v25 }
 0x121   : > { %v771_v18 = vmin.f32 %v739_v30, 6.0  ;;  %v3263_v42 = vpop.f32.mrb[30].mxu0  ;;  %v1588_v45 = vadd.f32 %v1556_v58, %v1488_v35  ;;  %v1089_v22 = vadd.f32 %v1057_v33, %v989_v17  ;;  %v1257_v21 = vmul.f32 %v3207_v43, %v3012_v27 }
 0x122   : > { %v1790_v32 = vmin.f32 %v1758_v34, 6.0  ;;  %v3267_v47 = vpop.f32.mrb[31].mxu0  ;;  %v1388_v48 = vadd.f32 %v1356_v23, %v1288_v38  ;;  %v692_v53 = vadd.f32 %v2481_v49, %v2986_v59  ;;  %v858_v55 = vmul.f32 %v3176_v0, %v2989_v61 }
 0x123   : > { %804 = vst.msk [vmem:[#allocation2 + $0x1a8] sm:$0xff] %vm311_vm0, %v771_v18  ;;  %v958_v56 = vmul.f32 %v3184_v15, %v2993_v1  ;;  %v1688_v58 = vadd.f32 %v1656_v6, %v1588_v45  ;;  %v1189_v62 = vadd.f32 %v1157_v36, %v1089_v22  ;;  %v1357_v57 = vmul.f32 %v3213_v5, %v3021_v39  ;;  %v3304_v36 = vld [vmem:[#allocation2 + $0xc7] sm:$0xff] }
 0x124   : > { %2518 = vmatprep.mubr.msk.f32.mxu1 %vm311_vm0, %v1790_v32  ;;  %v1058_v60 = vmul.f32 %v3186_v19, %v3002_v16  ;;  %v1489_v63 = vadd.f32 %v1457_v29, %v1388_v48  ;;  %v742_v2 = vmax.f32 %v692_v53, 0.0  ;;  %v1158_v49 = vmul.f32 %v3232_v7, %v3026_v44  ;;  %v3297_v29 = vld [vmem:[#allocation2 + $0xb1] sm:$0xff]  ;;  %v3309_v18 = vld [vmem:[#allocation2 + $0xc8] sm:$0xff] }
 0x125   : > { %v990_v4 = vadd.f32 %v958_v56, %v858_v55  ;;  %v1727_v0 = vadd.f32 %v3107_v11, %v1688_v58  ;;  %v1289_v8 = vadd.f32 %v1257_v21, %v1189_v62  ;;  %v1458_v15 = vmul.f32 %v3031_v51, %v3270_v37  ;;  %v3318_v53 = vld [vmem:[#allocation2 + $0xc9] sm:$0xff] }
 0x126   : > { %v1558_v6 = vmul.f32 %v3034_v52, %v3272_v50  ;;  %v1589_v9 = vadd.f32 %v1557_v24, %v1489_v63  ;;  %v774_v12 = vmin.f32 %v742_v2, 6.0  ;;  %v1258_v19 = vmul.f32 %v3245_v31, %v3012_v27 }
 0x127   : > { %v1090_v46 = vadd.f32 %v1058_v60, %v990_v4  ;;  %v1759_v14 = vmax.f32 %v1727_v0, 0.0  ;;  %v1389_v20 = vadd.f32 %v1357_v57, %v1289_v8  ;;  %v1358_v23 = vmul.f32 %v3247_v25, %v3021_v39  ;;  %v3332_v8 = vld [vmem:[#allocation2 + $0xcf] sm:$0xff] }
 0x128   : > { %v687_v26 = vadd.f32 %v2986_v59, %v3221_v54  ;;  %v1689_v3 = vadd.f32 %v1657_v40, %v1589_v9  ;;  %807 = vst.msk [vmem:[#allocation2 + $0x1d0] sm:$0xff] %vm311_vm0, %v774_v12  ;;  %v859_v33 = vmul.f32 %v3202_v41, %v2989_v61  ;;  %v959_v34 = vmul.f32 %v3207_v43, %v2993_v1 }
 0x129   : > { %v1190_v30 = vadd.f32 %v1158_v49, %v1090_v46  ;;  %v1791_v35 = vmin.f32 %v1759_v14, 6.0  ;;  %v1490_v17 = vadd.f32 %v1458_v15, %v1389_v20  ;;  %v1059_v54 = vmul.f32 %v3213_v5, %v3002_v16  ;;  %v3334_v15 = vld [vmem:[#allocation2 + $0xd0] sm:$0xff] }
 0x12a   : > { %v741_v38 = vmax.f32 %v687_v26, 0.0  ;;  %v1728_v24 = vadd.f32 %v3107_v11, %v1689_v3  ;;  %v991_v32 = vadd.f32 %v959_v34, %v859_v33  ;;  %v1159_v41 = vmul.f32 %v3270_v37, %v3026_v44  ;;  %v3341_v46 = vld [vmem:[#allocation2 + $0xd1] sm:$0xff] }
 0x12b   : > { %v1290_v40 = vadd.f32 %v1258_v19, %v1190_v30  ;;  %2519 = vmatmul.mubr.msk.f32.vlgmr.msra.gmra.mrb[0].mxu1 %vm311_vm0, %v1791_v35  ;;  %v1590_v43 = vadd.f32 %v1558_v6, %v1490_v17  ;;  %v1658_v45 = vmul.f32 %v3054_v10, %v3297_v29  ;;  %v1459_v5 = vmul.f32 %v3031_v51, %v3304_v36 }
 0x12c   : > { %v773_v22 = vmin.f32 %v741_v38, 6.0  ;;  %v1760_v21 = vmax.f32 %v1728_v24, 0.0  ;;  %v1091_v55 = vadd.f32 %v1059_v54, %v991_v32  ;;  %v1559_v58 = vmul.f32 %v3034_v52, %v3309_v18 }
 0x12d   : > { %v1390_v48 = vadd.f32 %v1358_v23, %v1290_v40  ;;  %v1690_v56 = vadd.f32 %v1658_v45, %v1590_v43  ;;  %v1259_v62 = vmul.f32 %v3272_v50, %v3012_v27  ;;  %v702_v57 = vadd.f32 %v3239_v13, %v2986_v59  ;;  %v3364_v43 = vld [vmem:[#allocation2 + $0xe7] sm:$0xff] }
 0x12e   : > { %806 = vst.msk [vmem:[#allocation2 + $0x1c8] sm:$0xff] %vm311_vm0, %v773_v22  ;;  %v1792_v60 = vmin.f32 %v1760_v21, 6.0  ;;  %v1191_v2 = vadd.f32 %v1159_v41, %v1091_v55  ;;  %v860_v4 = vmul.f32 %v3232_v7, %v2989_v61  ;;  %v1659_v0 = vmul.f32 %v3054_v10, %v3318_v53 }
 0x12f   : > { %v1491_v63 = vadd.f32 %v1459_v5, %v1390_v48  ;;  %v1729_v49 = vadd.f32 %v3107_v11, %v1690_v56  ;;  %v744_v6 = vmax.f32 %v702_v57, 0.0  ;;  %v960_v9 = vmul.f32 %v3245_v31, %v2993_v1  ;;  %v3368_v48 = vld [vmem:[#allocation2 + $0xe8] sm:$0xff] }
 0x130   : > { %2521 = vmatprep.mubr.msk.f32.mxu1 %vm311_vm0, %v1792_v60  ;;  %v1291_v12 = vadd.f32 %v1259_v62, %v1191_v2  ;;  %v1359_v7 = vmul.f32 %v3297_v29, %v3021_v39  ;;  %v1060_v19 = vmul.f32 %v3247_v25, %v3002_v16  ;;  %v1160_v26 = vmul.f32 %v3304_v36, %v3026_v44 }
 0x131   : > { %v1591_v13 = vadd.f32 %v1559_v58, %v1491_v63  ;;  %v1761_v14 = vmax.f32 %v1729_v49, 0.0  ;;  %v776_v20 = vmin.f32 %v744_v6, 6.0  ;;  %v992_v23 = vadd.f32 %v960_v9, %v860_v4 }
 0x132   : > { %v1391_v31 = vadd.f32 %v1359_v7, %v1291_v12  ;;  %v1460_v30 = vmul.f32 %v3031_v51, %v3332_v8  ;;  %v1560_v33 = vmul.f32 %v3034_v52, %v3334_v15  ;;  %v1660_v35 = vmul.f32 %v3054_v10, %v3341_v46 }
 0x133   : > { %v1691_v3 = vadd.f32 %v1659_v0, %v1591_v13  ;;  %v1793_v34 = vmin.f32 %v1761_v14, 6.0  ;;  %809 = vst.msk [vmem:[#allocation2 + $0x1f0] sm:$0xff] %vm311_vm0, %v776_v20  ;;  %v1092_v25 = vadd.f32 %v1060_v19, %v992_v23  ;;  %v697_v17 = vadd.f32 %v2986_v59, %v3251_v28  ;;  %v3385_v0 = vld [vmem:[#allocation2 + $0xe9] sm:$0xff] }
 0x134   : > { %v1492_v54 = vadd.f32 %v1460_v30, %v1391_v31  ;;  %v861_v24 = vmul.f32 %v3270_v37, %v2989_v61  ;;  %v961_v40 = vmul.f32 %v3272_v50, %v2993_v1  ;;  %v1260_v41 = vmul.f32 %v3309_v18, %v3012_v27  ;;  %v3389_v13 = vld [vmem:[#allocation2 + $0xef] sm:$0xff] }
 0x135   : > { %v1730_v38 = vadd.f32 %v3107_v11, %v1691_v3  ;;  %2522 = vmatmul.mubr.msk.f32.gmra.mrb[2].mxu1 %vm311_vm0, %v1793_v34  ;;  %v1192_v32 = vadd.f32 %v1160_v26, %v1092_v25  ;;  %v743_v45 = vmax.f32 %v697_v17, 0.0  ;;  %v1061_v28 = vmul.f32 %v3297_v29, %v3002_v16 }
 0x136   : > { %v1592_v21 = vadd.f32 %v1560_v33, %v1492_v54  ;;  %v993_v37 = vadd.f32 %v961_v40, %v861_v24  ;;  %v1161_v50 = vmul.f32 %v3332_v8, %v3026_v44  ;;  %v1360_v55 = vmul.f32 %v3318_v53, %v3021_v39 }
 0x137   : > { %v1762_v22 = vmax.f32 %v1730_v38, 0.0  ;;  %v1292_v5 = vadd.f32 %v1260_v41, %v1192_v32  ;;  %v775_v56 = vmin.f32 %v743_v45, 6.0  ;;  %v1461_v57 = vmul.f32 %v3031_v51, %v3364_v43  ;;  %v1626_v38 = vld [vmem:[#allocation2 + $0xf1] sm:$0xff] }
 0x138   : > { %v1692_v62 = vadd.f32 %v1660_v35, %v1592_v21  ;;  %v1093_v60 = vadd.f32 %v1061_v28, %v993_v37  ;;  %v1561_v63 = vmul.f32 %v3034_v52, %v3368_v48  ;;  %v712_v2 = vadd.f32 %v3263_v42, %v2986_v59  ;;  %v3417_v28 = vld [vmem:[#allocation2 + $0x107] sm:$0xff] }
 0x139   : > { %v1794_v58 = vmin.f32 %v1762_v22, 6.0  ;;  %v1392_v29 = vadd.f32 %v1360_v55, %v1292_v5  ;;  %808 = vst.msk [vmem:[#allocation2 + $0x1e8] sm:$0xff] %vm311_vm0, %v775_v56  ;;  %v862_v4 = vmul.f32 %v3304_v36, %v2989_v61  ;;  %v1261_v9 = vmul.f32 %v3334_v15, %v3012_v27  ;;  %v3395_v36 = vld [vmem:[#allocation2 + $0xf0] sm:$0xff] }
 0x13a   : > { %v1731_v49 = vadd.f32 %v3107_v11, %v1692_v62  ;;  %v1193_v6 = vadd.f32 %v1161_v50, %v1093_v60  ;;  %v962_v12 = vmul.f32 %v3309_v18, %v2993_v1  ;;  %v1361_v42 = vmul.f32 %v3341_v46, %v3021_v39 }
 0x13b   : > { %2524 = vmatprep.mubr.msk.f32.mxu1 %vm311_vm0, %v1794_v58  ;;  %v1493_v7 = vadd.f32 %v1461_v57, %v1392_v29  ;;  %v746_v19 = vmax.f32 %v712_v2, 0.0  ;;  %v1062_v14 = vmul.f32 %v3318_v53, %v3002_v16  ;;  %v1162_v3 = vmul.f32 %v3364_v43, %v3026_v44  ;;  %v3431_v58 = vld [vmem:[#allocation2 + $0x109] sm:$0xff] }
 0x13c   : > { %v1763_v20 = vmax.f32 %v1731_v49, 0.0  ;;  %v1293_v23 = vadd.f32 %v1261_v9, %v1193_v6  ;;  %v994_v26 = vadd.f32 %v962_v12, %v862_v4  ;;  %v1661_v18 = vmul.f32 %v3054_v10, %v3385_v0  ;;  %v3440_v9 = vld [vmem:[#allocation2 + $0x10f] sm:$0xff] }
 0x13d   : > { %v1593_v31 = vadd.f32 %v1561_v63, %v1493_v7  ;;  %v1462_v30 = vmul.f32 %v3031_v51, %v3389_v13  ;;  %v778_v33 = vmin.f32 %v746_v19, 6.0  ;;  %v1562_v25 = vmul.f32 %v3034_v52, %v3395_v36  ;;  %v3442_v12 = vld [vmem:[#allocation2 + $0x110] sm:$0xff] }
 0x13e   : > { %v1795_v34 = vmin.f32 %v1763_v20, 6.0  ;;  %v1393_v35 = vadd.f32 %v1361_v42, %v1293_v23  ;;  %v1094_v53 = vadd.f32 %v1062_v14, %v994_v26  ;;  %v707_v54 = vadd.f32 %v2986_v59, %v3267_v47  ;;  %v3422_v47 = vld [vmem:[#allocation2 + $0x108] sm:$0xff] }
 0x13f   : > { %v1693_v17 = vadd.f32 %v1661_v18, %v1593_v31  ;;  %811 = vst.msk [vmem:[#allocation2 + $0x210] sm:$0xff] %vm311_vm0, %v778_v33  ;;  %v863_v24 = vmul.f32 %v3332_v8, %v2989_v61  ;;  %v963_v40 = vmul.f32 %v3334_v15, %v2993_v1  ;;  %v1262_v45 = vmul.f32 %v3368_v48, %v3012_v27 }
 0x140   : > { %2525 = vmatmul.mubr.msk.f32.gmra.mrb[4].mxu1 %vm311_vm0, %v1795_v34  ;;  %v1494_v32 = vadd.f32 %v1462_v30, %v1393_v35  ;;  %v1194_v41 = vadd.f32 %v1162_v3, %v1094_v53  ;;  %v1063_v22 = vmul.f32 %v3341_v46, %v3002_v16  ;;  %v745_v8 = vmax.f32 %v707_v54, 0.0  ;;  %v1628_v34 = vld [vmem:[#allocation2 + $0x111] sm:$0xff] }
 0x141   : > { %v1732_v59 = vadd.f32 %v3107_v11, %v1693_v17  ;;  %v995_v21 = vadd.f32 %v963_v40, %v863_v24  ;;  %v1163_v15 = vmul.f32 %v3389_v13, %v3026_v44  ;;  %v1662_v50 = vmul.f32 %v3054_v10, %v1626_v38  ;;  %v3467_v40 = vld [vmem:[#allocation2 + $0x128] sm:$0xff] }
 0x142   : > { %v1594_v37 = vadd.f32 %v1562_v25, %v1494_v32  ;;  %v1294_v5 = vadd.f32 %v1262_v45, %v1194_v41  ;;  %v1362_v55 = vmul.f32 %v3385_v0, %v3021_v39  ;;  %v1463_v46 = vmul.f32 %v3031_v51, %v3417_v28  ;;  %v3459_v25 = vld [vmem:[#allocation2 + $0x127] sm:$0xff] }
 0x143   : > { %v1764_v56 = vmax.f32 %v1732_v59, 0.0  ;;  %v777_v62 = vmin.f32 %v745_v8, 6.0  ;;  %v1095_v57 = vadd.f32 %v1063_v22, %v995_v21  ;;  %v1563_v63 = vmul.f32 %v3034_v52, %v3422_v47  ;;  %v3470_v22 = vld [vmem:[#allocation2 + $0x129] sm:$0xff] }
 0x144   : > { %v1694_v60 = vadd.f32 %v1662_v50, %v1594_v37  ;;  %v1394_v29 = vadd.f32 %v1362_v55, %v1294_v5  ;;  %v864_v2 = vmul.f32 %v3364_v43, %v2989_v61  ;;  %v1263_v6 = vmul.f32 %v3395_v36, %v3012_v27 }
 0x145   : > { %v1796_v4 = vmin.f32 %v1764_v56, 6.0  ;;  %810 = vst.msk [vmem:[#allocation2 + $0x208] sm:$0xff] %vm311_vm0, %v777_v62  ;;  %v1195_v49 = vadd.f32 %v1163_v15, %v1095_v57  ;;  %v964_v7 = vmul.f32 %v3368_v48, %v2993_v1  ;;  %v1663_v43 = vmul.f32 %v3054_v10, %v3431_v58 }
 0x146   : > { %v1733_v42 = vadd.f32 %v3107_v11, %v1694_v60  ;;  %v1495_v19 = vadd.f32 %v1463_v46, %v1394_v29  ;;  %v1363_v14 = vmul.f32 %v1626_v38, %v3021_v39  ;;  %v1064_v26 = vmul.f32 %v3385_v0, %v3002_v16 }
 0x147   : > { %2527 = vmatprep.mubr.msk.f32.mxu1 %vm311_vm0, %v1796_v4  ;;  %v1295_v20 = vadd.f32 %v1263_v6, %v1195_v49  ;;  %v996_v23 = vadd.f32 %v964_v7, %v864_v2  ;;  %v1164_v3 = vmul.f32 %v3417_v28, %v3026_v44  ;;  %v1464_v18 = vmul.f32 %v3031_v51, %v3440_v9  ;;  %v3491_v2 = vld [vmem:[#allocation2 + $0x12f] sm:$0xff] }
 0x148   : > { %v1765_v31 = vmax.f32 %v1733_v42, 0.0  ;;  %v1595_v48 = vadd.f32 %v1563_v63, %v1495_v19  ;;  %v1564_v30 = vmul.f32 %v3034_v52, %v3442_v12  ;;  %v865_v53 = vmul.f32 %v3389_v13, %v2989_v61  ;;  %v3493_v4 = vld [vmem:[#allocation2 + $0x130] sm:$0xff] }
 0x149   : > { %v1395_v33 = vadd.f32 %v1363_v14, %v1295_v20  ;;  %v1096_v35 = vadd.f32 %v1064_v26, %v996_v23  ;;  %v965_v0 = vmul.f32 %v3395_v36, %v2993_v1  ;;  %v1264_v24 = vmul.f32 %v3422_v47, %v3012_v27 }
 0x14a   : > { %v1797_v17 = vmin.f32 %v1765_v31, 6.0  ;;  %v1695_v54 = vadd.f32 %v1663_v43, %v1595_v48  ;;  %v1065_v32 = vmul.f32 %v1626_v38, %v3002_v16  ;;  %v1165_v13 = vmul.f32 %v3440_v9, %v3026_v44  ;;  %v1630_v48 = vld [vmem:[#allocation2 + $0x131] sm:$0xff] }
 0x14b   : > { %v1496_v41 = vadd.f32 %v1464_v18, %v1395_v33  ;;  %v1196_v45 = vadd.f32 %v1164_v3, %v1096_v35  ;;  %v997_v59 = vadd.f32 %v965_v0, %v865_v53  ;;  %v1664_v8 = vmul.f32 %v3054_v10, %v1628_v34  ;;  %v3508_v18 = vld [vmem:[#allocation2 + $0x147] sm:$0xff] }
 0x14c   : > { %2528 = vmatmul.mubr.msk.f32.gmra.mrb[6].mxu1 %vm311_vm0, %v1797_v17  ;;  %v1734_v36 = vadd.f32 %v3107_v11, %v1695_v54  ;;  %v1364_v21 = vmul.f32 %v3431_v58, %v3021_v39  ;;  %v1465_v38 = vmul.f32 %v3031_v51, %v3459_v25  ;;  %v1565_v50 = vmul.f32 %v3034_v52, %v3467_v40  ;;  %v3514_v53 = vld [vmem:[#allocation2 + $0x148] sm:$0xff] }
 0x14d   : > { %v1596_v15 = vadd.f32 %v1564_v30, %v1496_v41  ;;  %v1296_v37 = vadd.f32 %v1264_v24, %v1196_v45  ;;  %v1097_v5 = vadd.f32 %v1065_v32, %v997_v59  ;;  %v1665_v56 = vmul.f32 %v3054_v10, %v3470_v22  ;;  %v3519_v32 = vld [vmem:[#allocation2 + $0x149] sm:$0xff] }
 0x14e   : > { %v1766_v55 = vmax.f32 %v1734_v36, 0.0  ;;  %v866_v46 = vmul.f32 %v3417_v28, %v2989_v61  ;;  %v966_v62 = vmul.f32 %v3422_v47, %v2993_v1  ;;  %v1265_v63 = vmul.f32 %v3442_v12, %v3012_v27 }
 0x14f   : > { %v1696_v57 = vadd.f32 %v1664_v8, %v1596_v15  ;;  %v1396_v60 = vadd.f32 %v1364_v21, %v1296_v37  ;;  %v1197_v29 = vadd.f32 %v1165_v13, %v1097_v5  ;;  %v1066_v7 = vmul.f32 %v3431_v58, %v3002_v16 }
 0x150   : > { %v1798_v49 = vmin.f32 %v1766_v55, 6.0  ;;  %v998_v6 = vadd.f32 %v966_v62, %v866_v46  ;;  %v1166_v28 = vmul.f32 %v3459_v25, %v3026_v44  ;;  %v1365_v43 = vmul.f32 %v1628_v34, %v3021_v39  ;;  %v3538_v62 = vld [vmem:[#allocation2 + $0x14f] sm:$0xff] }
 0x151   : > { %v1735_v47 = vadd.f32 %v3107_v11, %v1696_v57  ;;  %v1497_v42 = vadd.f32 %v1465_v38, %v1396_v60  ;;  %v1297_v19 = vadd.f32 %v1265_v63, %v1197_v29  ;;  %v1466_v14 = vmul.f32 %v3031_v51, %v3491_v2  ;;  %v3540_v57 = vld [vmem:[#allocation2 + $0x150] sm:$0xff] }
 0x152   : > { %2530 = vmatprep.mubr.msk.f32.mxu1 %vm311_vm0, %v1798_v49  ;;  %v1566_v20 = vmul.f32 %v3034_v52, %v3493_v4  ;;  %v1098_v23 = vadd.f32 %v1066_v7, %v998_v6  ;;  %v867_v58 = vmul.f32 %v3440_v9, %v2989_v61  ;;  %v967_v30 = vmul.f32 %v3442_v12, %v2993_v1 }
 0x153   : > { %v1767_v26 = vmax.f32 %v1735_v47, 0.0  ;;  %v1597_v3 = vadd.f32 %v1565_v50, %v1497_v42  ;;  %v1397_v31 = vadd.f32 %v1365_v43, %v1297_v19  ;;  %v1266_v35 = vmul.f32 %v3467_v40, %v3012_v27  ;;  %v1632_v43 = vld [vmem:[#allocation2 + $0x151] sm:$0xff] }
 0x154   : > { %v1198_v33 = vadd.f32 %v1166_v28, %v1098_v23  ;;  %v1067_v0 = vmul.f32 %v1628_v34, %v3002_v16  ;;  %v1167_v9 = vmul.f32 %v3491_v2, %v3026_v44  ;;  %v999_v41 = vadd.f32 %v967_v30, %v867_v58 }
 0x155   : > { %v1799_v17 = vmin.f32 %v1767_v26, 6.0  ;;  %v1697_v54 = vadd.f32 %v1665_v56, %v1597_v3  ;;  %v1498_v24 = vadd.f32 %v1466_v14, %v1397_v31  ;;  %v1666_v45 = vmul.f32 %v3054_v10, %v1630_v48  ;;  %v3559_v3 = vld [vmem:[#allocation2 + $0x167] sm:$0xff] }
 0x156   : > { %v1298_v12 = vadd.f32 %v1266_v35, %v1198_v33  ;;  %v1366_v59 = vmul.f32 %v3470_v22, %v3021_v39  ;;  %v1467_v13 = vmul.f32 %v3031_v51, %v3508_v18  ;;  %v1567_v8 = vmul.f32 %v3034_v52, %v3514_v53  ;;  %v3561_v31 = vld [vmem:[#allocation2 + $0x168] sm:$0xff] }
 0x157   : > { %2531 = vmatmul.mubr.msk.f32.gmra.mrb[8].mxu1 %vm311_vm0, %v1799_v17  ;;  %v1736_v34 = vadd.f32 %v3107_v11, %v1697_v54  ;;  %v1598_v36 = vadd.f32 %v1566_v20, %v1498_v24  ;;  %v1099_v21 = vadd.f32 %v1067_v0, %v999_v41  ;;  %v1667_v15 = vmul.f32 %v3054_v10, %v3519_v32 }
 0x158   : > { %v1398_v38 = vadd.f32 %v1366_v59, %v1298_v12  ;;  %v868_v37 = vmul.f32 %v3459_v25, %v2989_v61  ;;  %v968_v50 = vmul.f32 %v3467_v40, %v2993_v1  ;;  %v1267_v46 = vmul.f32 %v3493_v4, %v3012_v27 }
 0x159   : > { %v1768_v5 = vmax.f32 %v1736_v34, 0.0  ;;  %v1698_v55 = vadd.f32 %v1666_v45, %v1598_v36  ;;  %v1199_v56 = vadd.f32 %v1167_v9, %v1099_v21  ;;  %v1068_v10 = vmul.f32 %v3470_v22, %v3002_v16  ;;  %v1633_v34 = vld [vmem:[#allocation2 + $0x169] sm:$0xff] }
 0x15a   : > { %v1499_v60 = vadd.f32 %v1467_v13, %v1398_v38  ;;  %v1000_v29 = vadd.f32 %v968_v50, %v868_v37  ;;  %v1168_v25 = vmul.f32 %v3508_v18, %v3026_v44  ;;  %v1367_v6 = vmul.f32 %v1630_v48, %v3021_v39  ;;  %v3586_v37 = vld [vmem:[#allocation2 + $0x16f] sm:$0xff] }
 0x15b   : > { %v1800_v63 = vmin.f32 %v1768_v5, 6.0  ;;  %v1737_v40 = vadd.f32 %v3107_v11, %v1698_v55  ;;  %v1299_v49 = vadd.f32 %v1267_v46, %v1199_v56  ;;  %v1468_v28 = vmul.f32 %v3031_v51, %v3538_v62  ;;  %v3588_v50 = vld [vmem:[#allocation2 + $0x170] sm:$0xff] }
 0x15c   : > { %v1599_v7 = vadd.f32 %v1567_v8, %v1499_v60  ;;  %v1568_v47 = vmul.f32 %v3034_v52, %v3540_v57  ;;  %v1100_v42 = vadd.f32 %v1068_v10, %v1000_v29  ;;  %v869_v14 = vmul.f32 %v3491_v2, %v2989_v61 }
 0x15d   : > { %2533 = vmatprep.mubr.msk.f32.mxu1 %vm311_vm0, %v1800_v63  ;;  %v1769_v22 = vmax.f32 %v1737_v40, 0.0  ;;  %v1399_v19 = vadd.f32 %v1367_v6, %v1299_v49  ;;  %v969_v20 = vmul.f32 %v3493_v4, %v2993_v1  ;;  %v1268_v26 = vmul.f32 %v3514_v53, %v3012_v27  ;;  %v3570_v4 = vld [vmem:[%s3976_s3 + $0x8] ss:$0 sm:$0xff] }
 0x15e   : > { %v1699_v23 = vadd.f32 %v1667_v15, %v1599_v7  ;;  %v1200_v58 = vadd.f32 %v1168_v25, %v1100_v42  ;;  %v1069_v30 = vmul.f32 %v1630_v48, %v3002_v16  ;;  %v1169_v2 = vmul.f32 %v3538_v62, %v3026_v44  ;;  %v1634_v7 = vld [vmem:[#allocation2 + $0x171] sm:$0xff] }
 0x15f   : > { %v1801_v33 = vmin.f32 %v1769_v22, 6.0  ;;  %v1500_v35 = vadd.f32 %v1468_v28, %v1399_v19  ;;  %v1001_v0 = vadd.f32 %v969_v20, %v869_v14  ;;  %v1668_v17 = vmul.f32 %v3570_v4, %v1632_v43  ;;  %v3608_v19 = vld [vmem:[#allocation2 + $0x187] sm:$0xff] }
 0x160   : > { %v1738_v9 = vadd.f32 %v3107_v11, %v1699_v23  ;;  %v1300_v54 = vadd.f32 %v1268_v26, %v1200_v58  ;;  %v1368_v24 = vmul.f32 %v3519_v32, %v3021_v39  ;;  %v1469_v41 = vmul.f32 %v3031_v51, %v3559_v3  ;;  %v3610_v14 = vld [vmem:[#allocation2 + $0x188] sm:$0xff] }
 0x161   : > { %2534 = vmatmul.mubr.msk.f32.gmra.mrb[10].mxu1 %vm311_vm0, %v1801_v33  ;;  %v1600_v48 = vadd.f32 %v1568_v47, %v1500_v35  ;;  %v1569_v45 = vmul.f32 %v3034_v52, %v3561_v31  ;;  %v1101_v12 = vadd.f32 %v1069_v30, %v1001_v0  ;;  %v870_v36 = vmul.f32 %v3508_v18, %v2989_v61 }
 0x162   : > { %v1770_v59 = vmax.f32 %v1738_v9, 0.0  ;;  %v1400_v13 = vadd.f32 %v1368_v24, %v1300_v54  ;;  %v970_v8 = vmul.f32 %v3514_v53, %v2993_v1  ;;  %v1269_v15 = vmul.f32 %v3540_v57, %v3012_v27 }
 0x163   : > { %v1700_v21 = vadd.f32 %v1668_v17, %v1600_v48  ;;  %v1201_v38 = vadd.f32 %v1169_v2, %v1101_v12  ;;  %v1070_v5 = vmul.f32 %v3519_v32, %v3002_v16  ;;  %v1170_v18 = vmul.f32 %v3559_v3, %v3026_v44  ;;  %v1635_v48 = vld [vmem:[#allocation2 + $0x189] sm:$0xff] }
 0x164   : > { %v1802_v55 = vmin.f32 %v1770_v59, 6.0  ;;  %v1501_v56 = vadd.f32 %v1469_v41, %v1400_v13  ;;  %v1002_v46 = vadd.f32 %v970_v8, %v870_v36  ;;  %v1669_v60 = vmul.f32 %v3570_v4, %v1633_v34  ;;  %v3634_v36 = vld [vmem:[#allocation2 + $0x18f] sm:$0xff] }
 0x165   : > { %v1739_v53 = vadd.f32 %v3107_v11, %v1700_v21  ;;  %v1301_v29 = vadd.f32 %v1269_v15, %v1201_v38  ;;  %v1369_v10 = vmul.f32 %v1632_v43, %v3021_v39  ;;  %v1470_v63 = vmul.f32 %v3031_v51, %v3586_v37  ;;  %v3636_v8 = vld [vmem:[#allocation2 + $0x190] sm:$0xff] }
 0x166   : > { %2536 = vmatprep.mubr.msk.f32.mxu1 %vm311_vm0, %v1802_v55  ;;  %v1601_v25 = vadd.f32 %v1569_v45, %v1501_v56  ;;  %v1570_v32 = vmul.f32 %v3034_v52, %v3588_v50  ;;  %v1102_v40 = vadd.f32 %v1070_v5, %v1002_v46  ;;  %v871_v11 = vmul.f32 %v3538_v62, %v2989_v61 }
 0x167   : > { %v1771_v49 = vmax.f32 %v1739_v53, 0.0  ;;  %v1401_v6 = vadd.f32 %v1369_v10, %v1301_v29  ;;  %v971_v28 = vmul.f32 %v3540_v57, %v2993_v1  ;;  %v1270_v22 = vmul.f32 %v3561_v31, %v3012_v27  ;;  %v3618_v57 = vld [vmem:[%s3977_s4] ss:$0 sm:$0xff] }
 0x168   : > { %v1701_v47 = vadd.f32 %v1669_v60, %v1601_v25  ;;  %v1202_v42 = vadd.f32 %v1170_v18, %v1102_v40  ;;  %v1071_v20 = vmul.f32 %v1632_v43, %v3002_v16  ;;  %v1171_v62 = vmul.f32 %v3586_v37, %v3026_v44  ;;  %v1636_v25 = vld [vmem:[#allocation2 + $0x191] sm:$0xff] }
 0x169   : > { %v1803_v23 = vmin.f32 %v1771_v49, 6.0  ;;  %v1502_v58 = vadd.f32 %v1470_v63, %v1401_v6  ;;  %v1003_v26 = vadd.f32 %v971_v28, %v871_v11  ;;  %v1670_v33 = vmul.f32 %v3570_v4, %v1634_v7  ;;  %v3655_v11 = vld [vmem:[#allocation2 + $0x1a7] sm:$0xff] }
 0x16a   : > { %v1740_v30 = vadd.f32 %v3618_v57, %v1701_v47  ;;  %v1302_v35 = vadd.f32 %v1270_v22, %v1202_v42  ;;  %v1370_v0 = vmul.f32 %v1633_v34, %v3021_v39  ;;  %v1471_v2 = vmul.f32 %v3031_v51, %v3608_v19  ;;  %v3657_v28 = vld [vmem:[#allocation2 + $0x1a8] sm:$0xff] }
 0x16b   : > { %2537 = vmatmul.mubr.msk.f32.gmra.mrb[12].mxu1 %vm311_vm0, %v1803_v23  ;;  %v1602_v43 = vadd.f32 %v1570_v32, %v1502_v58  ;;  %v1571_v9 = vmul.f32 %v3034_v52, %v3610_v14  ;;  %v1103_v17 = vadd.f32 %v1071_v20, %v1003_v26  ;;  %v872_v41 = vmul.f32 %v3559_v3, %v2989_v61 }
 0x16c   : > { %v1772_v54 = vmax.f32 %v1740_v30, 0.0  ;;  %v1402_v24 = vadd.f32 %v1370_v0, %v1302_v35  ;;  %v972_v45 = vmul.f32 %v3561_v31, %v2993_v1  ;;  %v1271_v13 = vmul.f32 %v3588_v50, %v3012_v27 }
 0x16d   : > { %v1702_v12 = vadd.f32 %v1670_v33, %v1602_v43  ;;  %v1203_v59 = vadd.f32 %v1171_v62, %v1103_v17  ;;  %v1072_v21 = vmul.f32 %v1633_v34, %v3002_v16  ;;  %v1172_v3 = vmul.f32 %v3608_v19, %v3026_v44  ;;  %v1637_v43 = vld [vmem:[#allocation2 + $0x1a9] sm:$0xff] }
 0x16e   : > { %v1804_v38 = vmin.f32 %v1772_v54, 6.0  ;;  %v1503_v15 = vadd.f32 %v1471_v2, %v1402_v24  ;;  %v1004_v5 = vadd.f32 %v972_v45, %v872_v41  ;;  %v1671_v31 = vmul.f32 %v3570_v4, %v1635_v48  ;;  %v3676_v41 = vld [vmem:[#allocation2 + $0x1af] sm:$0xff] }
 0x16f   : > { %v1741_v55 = vadd.f32 %v3618_v57, %v1702_v12  ;;  %v1303_v56 = vadd.f32 %v1271_v13, %v1203_v59  ;;  %v1371_v46 = vmul.f32 %v1634_v7, %v3021_v39  ;;  %v1472_v53 = vmul.f32 %v3031_v51, %v3634_v36  ;;  %v3678_v45 = vld [vmem:[#allocation2 + $0x1b0] sm:$0xff] }
 0x170   : > { %2539 = vmatprep.mubr.msk.f32.mxu1 %vm311_vm0, %v1804_v38  ;;  %v1603_v18 = vadd.f32 %v1571_v9, %v1503_v15  ;;  %v1572_v34 = vmul.f32 %v3034_v52, %v3636_v8  ;;  %v1104_v60 = vadd.f32 %v1072_v21, %v1004_v5  ;;  %v873_v63 = vmul.f32 %v3586_v37, %v2989_v61 }
 0x171   : > { %v1773_v29 = vmax.f32 %v1741_v55, 0.0  ;;  %v1403_v10 = vadd.f32 %v1371_v46, %v1303_v56  ;;  %v973_v32 = vmul.f32 %v3588_v50, %v2993_v1  ;;  %v1272_v6 = vmul.f32 %v3610_v14, %v3012_v27 }
 0x172   : > { %v1703_v40 = vadd.f32 %v1671_v31, %v1603_v18  ;;  %v1204_v49 = vadd.f32 %v1172_v3, %v1104_v60  ;;  %v1073_v47 = vmul.f32 %v1634_v7, %v3002_v16  ;;  %v1173_v37 = vmul.f32 %v3634_v36, %v3026_v44  ;;  %v1638_v18 = vld [vmem:[#allocation2 + $0x1b1] sm:$0xff] }
 0x173   : > { %v1805_v42 = vmin.f32 %v1773_v29, 6.0  ;;  %v1504_v22 = vadd.f32 %v1472_v53, %v1403_v10  ;;  %v1005_v20 = vadd.f32 %v973_v32, %v873_v63  ;;  %v1672_v50 = vmul.f32 %v3570_v4, %v1636_v25  ;;  %v3697_v63 = vld [vmem:[#allocation2 + $0x1c7] sm:$0xff] }
 0x174   : > { %v1742_v23 = vadd.f32 %v3618_v57, %v1703_v40  ;;  %v1304_v58 = vadd.f32 %v1272_v6, %v1204_v49  ;;  %v1372_v26 = vmul.f32 %v1635_v48, %v3021_v39  ;;  %v1473_v30 = vmul.f32 %v3031_v51, %v3655_v11  ;;  %v3699_v32 = vld [vmem:[#allocation2 + $0x1c8] sm:$0xff] }
 0x175   : > { %2540 = vmatmul.mubr.msk.f32.gmra.mrb[14].mxu1 %vm311_vm0, %v1805_v42  ;;  %v1604_v62 = vadd.f32 %v1572_v34, %v1504_v22  ;;  %v1573_v7 = vmul.f32 %v3034_v52, %v3657_v28  ;;  %v1105_v33 = vadd.f32 %v1073_v47, %v1005_v20  ;;  %v874_v2 = vmul.f32 %v3608_v19, %v2989_v61 }
 0x176   : > { %v1774_v35 = vmax.f32 %v1742_v23, 0.0  ;;  %v1404_v0 = vadd.f32 %v1372_v26, %v1304_v58  ;;  %v974_v9 = vmul.f32 %v3610_v14, %v2993_v1  ;;  %v1273_v24 = vmul.f32 %v3636_v8, %v3012_v27 }
 0x177   : > { %v1704_v17 = vadd.f32 %v1672_v50, %v1604_v62  ;;  %v1205_v54 = vadd.f32 %v1173_v37, %v1105_v33  ;;  %v1074_v12 = vmul.f32 %v1635_v48, %v3002_v16  ;;  %v1174_v19 = vmul.f32 %v3655_v11, %v3026_v44  ;;  %v1639_v62 = vld [vmem:[#allocation2 + $0x1c9] sm:$0xff] }
 0x178   : > { %v1806_v59 = vmin.f32 %v1774_v35, 6.0  ;;  %v1505_v13 = vadd.f32 %v1473_v30, %v1404_v0  ;;  %v1006_v21 = vadd.f32 %v974_v9, %v874_v2  ;;  %v1673_v14 = vmul.f32 %v3570_v4, %v1637_v43  ;;  %v3718_v2 = vld [vmem:[#allocation2 + $0x1cf] sm:$0xff] }
 0x179   : > { %v1743_v38 = vadd.f32 %v3618_v57, %v1704_v17  ;;  %v1305_v15 = vadd.f32 %v1273_v24, %v1205_v54  ;;  %v1373_v5 = vmul.f32 %v1636_v25, %v3021_v39  ;;  %v1474_v55 = vmul.f32 %v3031_v51, %v3676_v41  ;;  %v3720_v9 = vld [vmem:[#allocation2 + $0x1d0] sm:$0xff] }
 0x17a   : > { %2542 = vmatprep.mubr.msk.f32.mxu1 %vm311_vm0, %v1806_v59  ;;  %v1605_v3 = vadd.f32 %v1573_v7, %v1505_v13  ;;  %v1574_v48 = vmul.f32 %v3034_v52, %v3678_v45  ;;  %v1106_v31 = vadd.f32 %v1074_v12, %v1006_v21  ;;  %v875_v53 = vmul.f32 %v3634_v36, %v2989_v61 }
 0x17b   : > { %v1775_v56 = vmax.f32 %v1743_v38, 0.0  ;;  %v1405_v46 = vadd.f32 %v1373_v5, %v1305_v15  ;;  %v975_v34 = vmul.f32 %v3636_v8, %v2993_v1  ;;  %v1274_v10 = vmul.f32 %v3657_v28, %v3012_v27 }
 0x17c   : > { %v1705_v60 = vadd.f32 %v1673_v14, %v1605_v3  ;;  %v1206_v29 = vadd.f32 %v1174_v19, %v1106_v31  ;;  %v1075_v40 = vmul.f32 %v1636_v25, %v3002_v16  ;;  %v1175_v36 = vmul.f32 %v3676_v41, %v3026_v44  ;;  %v1640_v3 = vld [vmem:[#allocation2 + $0x1d1] sm:$0xff] }
 0x17d   : > { %v1807_v49 = vmin.f32 %v1775_v56, 6.0  ;;  %v1506_v6 = vadd.f32 %v1474_v55, %v1405_v46  ;;  %v1007_v47 = vadd.f32 %v975_v34, %v875_v53  ;;  %v1674_v8 = vmul.f32 %v3570_v4, %v1638_v18  ;;  %v3739_v53 = vld [vmem:[#allocation2 + $0x1e7] sm:$0xff] }
 0x17e   : > { %v1744_v42 = vadd.f32 %v3618_v57, %v1705_v60  ;;  %v1306_v22 = vadd.f32 %v1274_v10, %v1206_v29  ;;  %v1374_v20 = vmul.f32 %v1637_v43, %v3021_v39  ;;  %v1475_v23 = vmul.f32 %v3031_v51, %v3697_v63  ;;  %v3741_v34 = vld [vmem:[#allocation2 + $0x1e8] sm:$0xff] }
 0x17f   : > { %2543 = vmatmul.mubr.msk.f32.gmra.mrb[16].mxu1 %vm311_vm0, %v1807_v49  ;;  %v1606_v37 = vadd.f32 %v1574_v48, %v1506_v6  ;;  %v1575_v25 = vmul.f32 %v3034_v52, %v3699_v32  ;;  %v1107_v50 = vadd.f32 %v1075_v40, %v1007_v47  ;;  %v876_v30 = vmul.f32 %v3655_v11, %v2989_v61 }
 0x180   : > { %v1776_v58 = vmax.f32 %v1744_v42, 0.0  ;;  %v1406_v26 = vadd.f32 %v1374_v20, %v1306_v22  ;;  %v976_v7 = vmul.f32 %v3657_v28, %v2993_v1  ;;  %v1275_v0 = vmul.f32 %v3678_v45, %v3012_v27 }
 0x181   : > { %v1706_v33 = vadd.f32 %v1674_v8, %v1606_v37  ;;  %v1207_v35 = vadd.f32 %v1175_v36, %v1107_v50  ;;  %v1076_v17 = vmul.f32 %v1637_v43, %v3002_v16  ;;  %v1176_v11 = vmul.f32 %v3697_v63, %v3026_v44  ;;  %v1641_v37 = vld [vmem:[#allocation2 + $0x1e9] sm:$0xff] }
 0x182   : > { %v1808_v54 = vmin.f32 %v1776_v58, 6.0  ;;  %v1507_v24 = vadd.f32 %v1475_v23, %v1406_v26  ;;  %v1008_v12 = vadd.f32 %v976_v7, %v876_v30  ;;  %v1675_v28 = vmul.f32 %v3570_v4, %v1639_v62  ;;  %v3760_v30 = vld [vmem:[#allocation2 + $0x1ef] sm:$0xff] }
 0x183   : > { %v1745_v59 = vadd.f32 %v3618_v57, %v1706_v33  ;;  %v1307_v13 = vadd.f32 %v1275_v0, %v1207_v35  ;;  %v1375_v21 = vmul.f32 %v1638_v18, %v3021_v39  ;;  %v1476_v38 = vmul.f32 %v3031_v51, %v3718_v2  ;;  %v3762_v7 = vld [vmem:[#allocation2 + $0x1f0] sm:$0xff] }
 0x184   : > { %2545 = vmatprep.mubr.msk.f32.mxu1 %vm311_vm0, %v1808_v54  ;;  %v1607_v19 = vadd.f32 %v1575_v25, %v1507_v24  ;;  %v1576_v43 = vmul.f32 %v3034_v52, %v3720_v9  ;;  %v1108_v14 = vadd.f32 %v1076_v17, %v1008_v12  ;;  %v877_v55 = vmul.f32 %v3676_v41, %v2989_v61 }
 0x185   : > { %v1777_v15 = vmax.f32 %v1745_v59, 0.0  ;;  %v1407_v5 = vadd.f32 %v1375_v21, %v1307_v13  ;;  %v977_v48 = vmul.f32 %v3678_v45, %v2993_v1  ;;  %v1276_v46 = vmul.f32 %v3699_v32, %v3012_v27 }
 0x186   : > { %v1707_v31 = vadd.f32 %v1675_v28, %v1607_v19  ;;  %v1208_v56 = vadd.f32 %v1176_v11, %v1108_v14  ;;  %v1077_v60 = vmul.f32 %v1638_v18, %v3002_v16  ;;  %v1177_v41 = vmul.f32 %v3718_v2, %v3026_v44  ;;  %v1642_v19 = vld [vmem:[#allocation2 + $0x1f1] sm:$0xff] }
 0x187   : > { %v1809_v29 = vmin.f32 %v1777_v15, 6.0  ;;  %v1508_v10 = vadd.f32 %v1476_v38, %v1407_v5  ;;  %v1009_v40 = vadd.f32 %v977_v48, %v877_v55  ;;  %v1676_v45 = vmul.f32 %v3570_v4, %v1640_v3  ;;  %v1443_v55 = vld [vmem:[#allocation2 + $0x207] sm:$0xff] }
 0x188   : > { %v1746_v49 = vadd.f32 %v3618_v57, %v1707_v31  ;;  %v1308_v6 = vadd.f32 %v1276_v46, %v1208_v56  ;;  %v1376_v47 = vmul.f32 %v1639_v62, %v3021_v39  ;;  %v1477_v42 = vmul.f32 %v3031_v51, %v3739_v53  ;;  %v1543_v48 = vld [vmem:[#allocation2 + $0x208] sm:$0xff] }
 0x189   : > { %2546 = vmatmul.mubr.msk.f32.gmra.mrb[18].mxu1 %vm311_vm0, %v1809_v29  ;;  %v1608_v36 = vadd.f32 %v1576_v43, %v1508_v10  ;;  %v1577_v18 = vmul.f32 %v3034_v52, %v3741_v34  ;;  %v1109_v8 = vadd.f32 %v1077_v60, %v1009_v40  ;;  %v878_v23 = vmul.f32 %v3697_v63, %v2989_v61 }
 0x18a   : > { %v1778_v22 = vmax.f32 %v1746_v49, 0.0  ;;  %v1408_v20 = vadd.f32 %v1376_v47, %v1308_v6  ;;  %v978_v25 = vmul.f32 %v3699_v32, %v2993_v1  ;;  %v1277_v26 = vmul.f32 %v3720_v9, %v3012_v27 }
 0x18b   : > { %v1708_v50 = vadd.f32 %v1676_v45, %v1608_v36  ;;  %v1209_v58 = vadd.f32 %v1177_v41, %v1109_v8  ;;  %v1078_v33 = vmul.f32 %v1639_v62, %v3002_v16  ;;  %v1178_v63 = vmul.f32 %v3739_v53, %v3026_v44  ;;  %v1643_v36 = vld [vmem:[#allocation2 + $0x209] sm:$0xff] }
 0x18c   : > { %v1810_v35 = vmin.f32 %v1778_v22, 6.0  ;;  %v1509_v0 = vadd.f32 %v1477_v42, %v1408_v20  ;;  %v1010_v17 = vadd.f32 %v978_v25, %v878_v23  ;;  %v1677_v32 = vmul.f32 %v3570_v4, %v1641_v37  ;;  %v1444_v23 = vld [vmem:[#allocation2 + $0x20f] sm:$0xff] }
 0x18d   : > { %v1747_v54 = vadd.f32 %v3618_v57, %v1708_v50  ;;  %v1309_v24 = vadd.f32 %v1277_v26, %v1209_v58  ;;  %v1377_v12 = vmul.f32 %v1640_v3, %v3021_v39  ;;  %v1478_v59 = vmul.f32 %v3031_v51, %v3760_v30  ;;  %v1544_v25 = vld [vmem:[#allocation2 + $0x210] sm:$0xff] }
 0x18e   : > { %2548 = vmatprep.mubr.msk.f32.mxu1 %vm311_vm0, %v1810_v35  ;;  %v1609_v11 = vadd.f32 %v1577_v18, %v1509_v0  ;;  %v1578_v62 = vmul.f32 %v3034_v52, %v3762_v7  ;;  %v1110_v28 = vadd.f32 %v1078_v33, %v1010_v17  ;;  %v879_v38 = vmul.f32 %v3718_v2, %v2989_v61 }
 0x18f   : > { %v1779_v13 = vmax.f32 %v1747_v54, 0.0  ;;  %v1409_v21 = vadd.f32 %v1377_v12, %v1309_v24  ;;  %v979_v43 = vmul.f32 %v3720_v9, %v2993_v1  ;;  %v1278_v5 = vmul.f32 %v3741_v34, %v3012_v27 }
 0x190   : > { %v1709_v14 = vadd.f32 %v1677_v32, %v1609_v11  ;;  %v1210_v15 = vadd.f32 %v1178_v63, %v1110_v28  ;;  %v1079_v31 = vmul.f32 %v1640_v3, %v3002_v16  ;;  %v1179_v29 = vmul.f32 %v3760_v30, %v3026_v44  ;;  %v1445_v11 = vld [vmem:[#allocation2 + $0x227] sm:$0xff] }
 0x191   : > { %v1811_v56 = vmin.f32 %v1779_v13, 6.0  ;;  %v1510_v46 = vadd.f32 %v1478_v59, %v1409_v21  ;;  %v1011_v60 = vadd.f32 %v979_v43, %v879_v38  ;;  %v1678_v10 = vmul.f32 %v3570_v4, %v1642_v19  ;;  %v1644_v13 = vld [vmem:[#allocation2 + $0x211] sm:$0xff] }
 0x192   : > { %v1748_v2 = vadd.f32 %v3618_v57, %v1709_v14  ;;  %v1310_v9 = vadd.f32 %v1278_v5, %v1210_v15  ;;  %v1378_v40 = vmul.f32 %v1641_v37, %v3021_v39  ;;  %v1479_v49 = vmul.f32 %v3031_v51, %v1443_v55  ;;  %v1545_v5 = vld [vmem:[#allocation2 + $0x228] sm:$0xff] }
 0x193   : > { %2549 = vmatmul.mubr.msk.f32.gmra.mrb[20].mxu1 %vm311_vm0, %v1811_v56  ;;  %v1610_v41 = vadd.f32 %v1578_v62, %v1510_v46  ;;  %v1579_v3 = vmul.f32 %v3034_v52, %v1543_v48  ;;  %v1111_v45 = vadd.f32 %v1079_v31, %v1011_v60  ;;  %v880_v42 = vmul.f32 %v3739_v53, %v2989_v61 }
 0x194   : > { %v1780_v6 = vmax.f32 %v1748_v2, 0.0  ;;  %v1410_v47 = vadd.f32 %v1378_v40, %v1310_v9  ;;  %v980_v18 = vmul.f32 %v3741_v34, %v2993_v1  ;;  %v1279_v20 = vmul.f32 %v3762_v7, %v3012_v27  ;;  %v1446_v2 = vld [vmem:[#allocation2 + $0x22f] sm:$0xff] }
 0x195   : > { %v1710_v8 = vadd.f32 %v1678_v10, %v1610_v41  ;;  %v1211_v22 = vadd.f32 %v1179_v29, %v1111_v45  ;;  %v1080_v50 = vmul.f32 %v1641_v37, %v3002_v16  ;;  %v1180_v35 = vmul.f32 %v1443_v55, %v3026_v44 }
 0x196   : > { %v1812_v58 = vmin.f32 %v1780_v6, 6.0  ;;  %v1511_v26 = vadd.f32 %v1479_v49, %v1410_v47  ;;  %v1012_v33 = vadd.f32 %v980_v18, %v880_v42  ;;  %v1679_v53 = vmul.f32 %v3570_v4, %v1643_v36  ;;  %v1646_v18 = vld [vmem:[#allocation2 + $0x231] sm:$0xff] }
 0x197   : > { %v1749_v0 = vadd.f32 %v3618_v57, %v1710_v8  ;;  %v1311_v17 = vadd.f32 %v1279_v20, %v1211_v22  ;;  %v1379_v34 = vmul.f32 %v1642_v19, %v3021_v39  ;;  %v1480_v54 = vmul.f32 %v3031_v51, %v1444_v23 }
 0x198   : > { %2551 = vmatprep.mubr.msk.f32.mxu1 %vm311_vm0, %v1812_v58  ;;  %v1611_v63 = vadd.f32 %v1579_v3, %v1511_v26  ;;  %v1580_v32 = vmul.f32 %v3034_v52, %v1544_v25  ;;  %v1112_v37 = vadd.f32 %v1080_v50, %v1012_v33  ;;  %v881_v59 = vmul.f32 %v3760_v30, %v2989_v61  ;;  %v1546_v3 = vld [vmem:[#allocation2 + $0x230] sm:$0xff] }
 0x199   : > { %v1781_v24 = vmax.f32 %v1749_v0, 0.0  ;;  %v1411_v12 = vadd.f32 %v1379_v34, %v1311_v17  ;;  %v981_v62 = vmul.f32 %v3762_v7, %v2993_v1  ;;  %v1280_v38 = vmul.f32 %v1543_v48, %v3012_v27  ;;  %v1645_v48 = vld [vmem:[#allocation2 + $0x229] sm:$0xff] }
 0x19a   : > { %v1711_v28 = vadd.f32 %v1679_v53, %v1611_v63  ;;  %v1212_v21 = vadd.f32 %v1180_v35, %v1112_v37  ;;  %v1081_v43 = vmul.f32 %v1642_v19, %v3002_v16  ;;  %v1181_v31 = vmul.f32 %v1444_v23, %v3026_v44  ;;  %v2611_v63 = vld [vmem:[%s2872_s11 + $0x8] sm:$0xff] }
 0x19b   : > { %v1813_v14 = vmin.f32 %v1781_v24, 6.0  ;;  %v1512_v15 = vadd.f32 %v1480_v54, %v1411_v12  ;;  %v1013_v55 = vadd.f32 %v981_v62, %v881_v59  ;;  %v1380_v61 = vmul.f32 %v1643_v36, %v3021_v39  ;;  %v2613_v62 = vld [vmem:[%s2872_s11 + $0x18] sm:$0xff] }
 0x19c   : > { %v1750_v56 = vadd.f32 %v3618_v57, %v1711_v28  ;;  %v1312_v46 = vadd.f32 %v1280_v38, %v1212_v21  ;;  %v1481_v1 = vmul.f32 %v3031_v51, %v1445_v11  ;;  %v1680_v7 = vmul.f32 %v3570_v4, %v1644_v13 }
 0x19d   : > { %2552 = vmatmul.mubr.msk.f32.gmra.mrb[22].mxu1 %vm311_vm0, %v1813_v14  ;;  %v1612_v30 = vadd.f32 %v1580_v32, %v1512_v15  ;;  %v1113_v16 = vadd.f32 %v1081_v43, %v1013_v55  ;;  %v1581_v29 = vmul.f32 %v3034_v52, %v1545_v5  ;;  %v1281_v9 = vmul.f32 %v1544_v25, %v3012_v27  ;;  %v2612_v32 = vld [vmem:[%s2872_s11] sm:$0xff]  ;;  %v2615_v5 = vld [vmem:[%s2872_s11 + $0x28] sm:$0xff] }
 0x19e   : > { %v1782_v19 = vmax.f32 %v1750_v56, 0.0  ;;  %v1412_v60 = vadd.f32 %v1380_v61, %v1312_v46  ;;  %v1681_v49 = vmul.f32 %v3570_v4, %v1645_v48  ;;  %v1381_v47 = vmul.f32 %v1644_v13, %v3021_v39  ;;  %v2614_v13 = vld [vmem:[%s2872_s11 + $0x10] sm:$0xff] }
 0x19f   : > { %v1712_v44 = vadd.f32 %v1680_v7, %v1612_v30  ;;  %v1213_v10 = vadd.f32 %v1181_v31, %v1113_v16  ;;  %v1482_v36 = vmul.f32 %v3031_v51, %v1446_v2  ;;  %v1582_v27 = vmul.f32 %v3034_v52, %v1546_v3  ;;  %v2616_v31 = vld [vmem:[%s2872_s11 + $0x20] sm:$0xff]  ;;  %v2617_v7 = vld [vmem:[%s2872_s11 + $0x38] sm:$0xff]  ;;  %v2618_v16 = vld [vmem:[%s2872_s11 + $0x30] sm:$0xff] }
 0x1a0   : > { %v1814_v40 = vmin.f32 %v1782_v19, 6.0  ;;  %v1513_v41 = vadd.f32 %v1481_v1, %v1412_v60  ;;  %v1682_v50 = vmul.f32 %v3570_v4, %v1646_v18  ;;  %v3833_v4 = vld [vmem:[%s3979_s6] ss:$0 sm:$0xff] }
 0x1a1   : > { %v1751_v45 = vadd.f32 %v3618_v57, %v1712_v44  ;;  %v1313_v6 = vadd.f32 %v1281_v9, %v1213_v10  ;;  %v2619_v10 = vld [vmem:[%s2872_s11 + $0x48] sm:$0xff] }
 0x1a2   : > { %2554 = vmatprep.mubr.msk.f32.mxu1 %vm311_vm0, %v1814_v40  ;;  %v1613_v42 = vadd.f32 %v1581_v29, %v1513_v41  ;;  %v2620_v40 = vld [vmem:[%s2872_s11 + $0x40] sm:$0xff] }
 0x1a3   : > { %v1783_v8 = vmax.f32 %v1751_v45, 0.0  ;;  %v1413_v22 = vadd.f32 %v1381_v47, %v1313_v6  ;;  %v2621_v47 = vld [vmem:[%s2872_s11 + $0x58] sm:$0xff] }
 0x1a4   : > { %v1713_v20 = vadd.f32 %v1681_v49, %v1613_v42  ;;  %v2622_v42 = vld [vmem:[%s2872_s11 + $0x50] sm:$0xff] }
 0x1a5   : > { %v1815_v23 = vmin.f32 %v1783_v8, 6.0  ;;  %v1514_v25 = vadd.f32 %v1482_v36, %v1413_v22 }
 0x1a6   : > { %v1752_v58 = vadd.f32 %v3618_v57, %v1713_v20 }
 0x1a7   : > { %2555 = vmatmul.mubr.msk.f32.gmra.mrb[24].mxu1 %vm311_vm0, %v1815_v23  ;;  %v1614_v39 = vadd.f32 %v1582_v27, %v1514_v25  ;;  %v2623_v23 = vld [vmem:[%s2872_s11 + $0x68] sm:$0xff] }
 0x1a8   : > { %v1784_v51 = vmax.f32 %v1752_v58, 0.0 }
 0x1a9   : > { %v1714_v26 = vadd.f32 %v1682_v50, %v1614_v39  ;;  %v2624_v50 = vld [vmem:[%s2872_s11 + $0x60] sm:$0xff] }
 0x1aa   : > { %v1816_v33 = vmin.f32 %v1784_v51, 6.0 }
 0x1ab   : > { %v1753_v35 = vadd.f32 %v3618_v57, %v1714_v26 }
 0x1ac   : > { %2557 = vmatprep.mubr.msk.f32.mxu1 %vm311_vm0, %v1816_v33 }
 0x1ad   : > { %v1785_v52 = vmax.f32 %v1753_v35, 0.0  ;;  %v2625_v35 = vld [vmem:[%s2872_s11 + $0x78] sm:$0xff] }
 0x1af   : > { %v1817_v0 = vmin.f32 %v1785_v52, 6.0 }
 0x1b1   : > { %2558 = vmatmul.mubr.msk.f32.gmra.mrb[26].mxu1 %vm311_vm0, %v1817_v0  ;;  %v2626_v0 = vld [vmem:[%s2872_s11 + $0x70] sm:$0xff] }
 0x1df   : > { %v2514_v53 = vpop.f32.mrb[32].mxu0 }
 0x1e0   : > { %v2005_v17 = vadd.f32 %v2514_v53, %v3833_v4  ;;  %v1999_v34 = vpop.f32.mrb[33].mxu0 }
 0x1e1   : > { %v2000_v57 = vadd.f32 %v3833_v4, %v1999_v34 }
 0x1e2   : > { %v2159_v54 = vadd.f32 %v2611_v63, %v2005_v17 }
 0x1e3   : > { %v2158_v37 = vadd.f32 %v2612_v32, %v2000_v57 }
 0x1e4   : > { %2191 = vst.msk [vmem:[%s3841_s14 + $0x8] sm:$0xff] %vm393_vm1, %v2159_v54  ;;  %v2627_v54 = vld [vmem:[%s2872_s11 + $0x88] sm:$0xff] }
 0x1e5   : > { %2190 = vst.msk [vmem:[%s3841_s14] sm:$0xff] %vm393_vm1, %v2158_v37  ;;  %v2628_v37 = vld [vmem:[%s2872_s11 + $0x80] sm:$0xff] }
 0x1ee   : > { %v2517_v24 = vpop.f32.mrb[34].mxu0 }
 0x1ef   : > { %v2015_v12 = vadd.f32 %v2517_v24, %v3833_v4  ;;  %v2009_v11 = vpop.f32.mrb[35].mxu0 }
 0x1f0   : > { %v2010_v59 = vadd.f32 %v3833_v4, %v2009_v11 }
 0x1f1   : > { %v2161_v28 = vadd.f32 %v2613_v62, %v2015_v12 }
 0x1f2   : > { %v2160_v21 = vadd.f32 %v2614_v13, %v2010_v59 }
 0x1f3   : > { %2193 = vst.msk [vmem:[%s3841_s14 + $0x18] sm:$0xff] %vm393_vm1, %v2161_v28  ;;  %v2629_v28 = vld [vmem:[%s2872_s11 + $0x98] sm:$0xff] }
 0x1f4   : > { %2192 = vst.msk [vmem:[%s3841_s14 + $0x10] sm:$0xff] %vm393_vm1, %v2160_v21  ;;  %v2630_v21 = vld [vmem:[%s2872_s11 + $0x90] sm:$0xff] }
 0x1fe   : > { %v2520_v38 = vpop.f32.mrb[0].mxu1 }
 0x1ff   : > { %v2025_v43 = vadd.f32 %v2520_v38, %v3833_v4  ;;  %v2019_v14 = vpop.f32.mrb[1].mxu1 }
 0x200   : > { %v2020_v15 = vadd.f32 %v3833_v4, %v2019_v14 }
 0x201   : > { %v2163_v55 = vadd.f32 %v2615_v5, %v2025_v43 }
 0x202   : > { %v2162_v56 = vadd.f32 %v2616_v31, %v2020_v15 }
 0x203   : > { %2195 = vst.msk [vmem:[%s3841_s14 + $0x28] sm:$0xff] %vm393_vm1, %v2163_v55  ;;  %v2631_v55 = vld [vmem:[%s2872_s11 + $0xa8] sm:$0xff] }
 0x204   : > { %2194 = vst.msk [vmem:[%s3841_s14 + $0x20] sm:$0xff] %vm393_vm1, %v2162_v56  ;;  %v2632_v56 = vld [vmem:[%s2872_s11 + $0xa0] sm:$0xff] }
 0x208   : > { %v2523_v46 = vpop.f32.mrb[2].mxu1 }
 0x209   : > { %v2035_v61 = vadd.f32 %v2523_v46, %v3833_v4  ;;  %v2029_v1 = vpop.f32.mrb[3].mxu1 }
 0x20a   : > { %v2030_v30 = vadd.f32 %v3833_v4, %v2029_v1 }
 0x20b   : > { %v2165_v48 = vadd.f32 %v2617_v7, %v2035_v61 }
 0x20c   : > { %v2164_v19 = vadd.f32 %v2618_v16, %v2030_v30 }
 0x20d   : > { %2197 = vst.msk [vmem:[%s3841_s14 + $0x38] sm:$0xff] %vm393_vm1, %v2165_v48  ;;  %v2633_v48 = vld [vmem:[%s2872_s11 + $0xb8] sm:$0xff] }
 0x20e   : > { %2196 = vst.msk [vmem:[%s3841_s14 + $0x30] sm:$0xff] %vm393_vm1, %v2164_v19  ;;  %v2634_v19 = vld [vmem:[%s2872_s11 + $0xb0] sm:$0xff] }
 0x213   : > { %v2526_v60 = vpop.f32.mrb[4].mxu1 }
 0x214   : > { %v2045_v29 = vadd.f32 %v2526_v60, %v3833_v4  ;;  %v2039_v2 = vpop.f32.mrb[5].mxu1 }
 0x215   : > { %v2040_v44 = vadd.f32 %v3833_v4, %v2039_v2 }
 0x216   : > { %v2167_v9 = vadd.f32 %v2619_v10, %v2045_v29 }
 0x217   : > { %v2166_v41 = vadd.f32 %v2620_v40, %v2040_v44 }
 0x218   : > { %2199 = vst.msk [vmem:[%s3841_s14 + $0x48] sm:$0xff] %vm393_vm1, %v2167_v9  ;;  %v2635_v9 = vld [vmem:[%s2872_s11 + $0xc8] sm:$0xff] }
 0x219   : > { %2198 = vst.msk [vmem:[%s3841_s14 + $0x40] sm:$0xff] %vm393_vm1, %v2166_v41  ;;  %v2636_v41 = vld [vmem:[%s2872_s11 + $0xc0] sm:$0xff] }
 0x21f   : > { %v2529_v49 = vpop.f32.mrb[6].mxu1 }
 0x220   : > { %v2055_v3 = vadd.f32 %v2529_v49, %v3833_v4  ;;  %v2049_v45 = vpop.f32.mrb[7].mxu1 }
 0x221   : > { %v2050_v6 = vadd.f32 %v3833_v4, %v2049_v45 }
 0x222   : > { %v2169_v36 = vadd.f32 %v2621_v47, %v2055_v3 }
 0x223   : > { %v2168_v18 = vadd.f32 %v2622_v42, %v2050_v6 }
 0x224   : > { %2201 = vst.msk [vmem:[%s3841_s14 + $0x58] sm:$0xff] %vm393_vm1, %v2169_v36  ;;  %v2637_v36 = vld [vmem:[%s2872_s11 + $0xd8] sm:$0xff] }
 0x225   : > { %2200 = vst.msk [vmem:[%s3841_s14 + $0x50] sm:$0xff] %vm393_vm1, %v2168_v18  ;;  %v2638_v18 = vld [vmem:[%s2872_s11 + $0xd0] sm:$0xff] }
 0x22a   : > { %v2532_v8 = vpop.f32.mrb[8].mxu1 }
 0x22b   : > { %v2065_v22 = vadd.f32 %v2532_v8, %v3833_v4  ;;  %v2059_v27 = vpop.f32.mrb[9].mxu1 }
 0x22c   : > { %v2060_v20 = vadd.f32 %v3833_v4, %v2059_v27 }
 0x22d   : > { %v2171_v25 = vadd.f32 %v2623_v23, %v2065_v22 }
 0x22e   : > { %v2170_v58 = vadd.f32 %v2624_v50, %v2060_v20 }
 0x22f   : > { %2203 = vst.msk [vmem:[%s3841_s14 + $0x68] sm:$0xff] %vm393_vm1, %v2171_v25  ;;  %v2639_v25 = vld [vmem:[%s2872_s11 + $0xe8] sm:$0xff] }
 0x230   : > { %2202 = vst.msk [vmem:[%s3841_s14 + $0x60] sm:$0xff] %vm393_vm1, %v2170_v58  ;;  %v2640_v58 = vld [vmem:[%s2872_s11 + $0xe0] sm:$0xff] }
 0x234   : > { %v2535_v39 = vpop.f32.mrb[10].mxu1 }
 0x235   : > { %v2075_v51 = vadd.f32 %v2535_v39, %v3833_v4  ;;  %v2069_v26 = vpop.f32.mrb[11].mxu1 }
 0x236   : > { %v2070_v33 = vadd.f32 %v3833_v4, %v2069_v26 }
 0x237   : > { %v2173_v52 = vadd.f32 %v2625_v35, %v2075_v51 }
 0x238   : > { %v2172_v53 = vadd.f32 %v2626_v0, %v2070_v33 }
 0x239   : > { %2205 = vst.msk [vmem:[%s3841_s14 + $0x78] sm:$0xff] %vm393_vm1, %v2173_v52  ;;  %v2641_v52 = vld [vmem:[%s2872_s11 + $0xf8] sm:$0xff] }
 0x23a   : > { %2204 = vst.msk [vmem:[%s3841_s14 + $0x70] sm:$0xff] %vm393_vm1, %v2172_v53  ;;  %v2642_v53 = vld [vmem:[%s2872_s11 + $0xf0] sm:$0xff] }
 0x23e   : > { %v2538_v17 = vpop.f32.mrb[12].mxu1 }
 0x23f   : > { %v2085_v34 = vadd.f32 %v2538_v17, %v3833_v4  ;;  %v2079_v57 = vpop.f32.mrb[13].mxu1 }
 0x240   : > { %v2080_v63 = vadd.f32 %v3833_v4, %v2079_v57 }
 0x241   : > { %v2175_v32 = vadd.f32 %v2627_v54, %v2085_v34 }
 0x242   : > { %v2174_v24 = vadd.f32 %v2628_v37, %v2080_v63 }
 0x243   : > { %2207 = vst.msk [vmem:[%s3841_s14 + $0x88] sm:$0xff] %vm393_vm1, %v2175_v32 }
 0x244   : > { %2206 = vst.msk [vmem:[%s3841_s14 + $0x80] sm:$0xff] %vm393_vm1, %v2174_v24 }
 0x248   : > { %v2541_v12 = vpop.f32.mrb[14].mxu1 }
 0x249   : > { %v2095_v11 = vadd.f32 %v2541_v12, %v3833_v4  ;;  %v2089_v59 = vpop.f32.mrb[15].mxu1 }
 0x24a   : > { %v2090_v62 = vadd.f32 %v3833_v4, %v2089_v59 }
 0x24b   : > { %v2177_v13 = vadd.f32 %v2629_v28, %v2095_v11 }
 0x24c   : > { %v2176_v38 = vadd.f32 %v2630_v21, %v2090_v62 }
 0x24d   : > { %2209 = vst.msk [vmem:[%s3841_s14 + $0x98] sm:$0xff] %vm393_vm1, %v2177_v13 }
 0x24e   : > { %2208 = vst.msk [vmem:[%s3841_s14 + $0x90] sm:$0xff] %vm393_vm1, %v2176_v38 }
 0x252   : > { %v2544_v43 = vpop.f32.mrb[16].mxu1 }
 0x253   : > { %v2105_v14 = vadd.f32 %v2544_v43, %v3833_v4  ;;  %v2099_v15 = vpop.f32.mrb[17].mxu1 }
 0x254   : > { %v2100_v5 = vadd.f32 %v3833_v4, %v2099_v15 }
 0x255   : > { %v2179_v31 = vadd.f32 %v2631_v55, %v2105_v14 }
 0x256   : > { %v2178_v46 = vadd.f32 %v2632_v56, %v2100_v5 }
 0x257   : > { %2211 = vst.msk [vmem:[%s3841_s14 + $0xa8] sm:$0xff] %vm393_vm1, %v2179_v31 }
 0x258   : > { %2210 = vst.msk [vmem:[%s3841_s14 + $0xa0] sm:$0xff] %vm393_vm1, %v2178_v46 }
 0x25c   : > { %v2547_v61 = vpop.f32.mrb[18].mxu1 }
 0x25d   : > { %v2115_v1 = vadd.f32 %v2547_v61, %v3833_v4  ;;  %v2109_v30 = vpop.f32.mrb[19].mxu1 }
 0x25e   : > { %v2110_v7 = vadd.f32 %v3833_v4, %v2109_v30 }
 0x25f   : > { %v2181_v16 = vadd.f32 %v2633_v48, %v2115_v1 }
 0x260   : > { %v2180_v60 = vadd.f32 %v2634_v19, %v2110_v7 }
 0x261   : > { %2213 = vst.msk [vmem:[%s3841_s14 + $0xb8] sm:$0xff] %vm393_vm1, %v2181_v16 }
 0x262   : > { %2212 = vst.msk [vmem:[%s3841_s14 + $0xb0] sm:$0xff] %vm393_vm1, %v2180_v60 }
 0x266   : > { %v2550_v29 = vpop.f32.mrb[20].mxu1 }
 0x267   : > { %v2125_v2 = vadd.f32 %v2550_v29, %v3833_v4  ;;  %v2119_v44 = vpop.f32.mrb[21].mxu1 }
 0x268   : > { %v2120_v10 = vadd.f32 %v3833_v4, %v2119_v44 }
 0x269   : > { %v2183_v40 = vadd.f32 %v2635_v9, %v2125_v2 }
 0x26a   : > { %v2182_v49 = vadd.f32 %v2636_v41, %v2120_v10 }
 0x26b   : > { %2215 = vst.msk [vmem:[%s3841_s14 + $0xc8] sm:$0xff] %vm393_vm1, %v2183_v40 }
 0x26c   : > { %2214 = vst.msk [vmem:[%s3841_s14 + $0xc0] sm:$0xff] %vm393_vm1, %v2182_v49 }
 0x270   : > { %v2553_v3 = vpop.f32.mrb[22].mxu1 }
 0x271   : > { %v2135_v45 = vadd.f32 %v2553_v3, %v3833_v4  ;;  %v2129_v6 = vpop.f32.mrb[23].mxu1 }
 0x272   : > { %v2130_v47 = vadd.f32 %v3833_v4, %v2129_v6 }
 0x273   : > { %v2185_v42 = vadd.f32 %v2637_v36, %v2135_v45 }
 0x274   : > { %v2184_v8 = vadd.f32 %v2638_v18, %v2130_v47 }
 0x275   : > { %2217 = vst.msk [vmem:[%s3841_s14 + $0xd8] sm:$0xff] %vm393_vm1, %v2185_v42 }
 0x276   : > { %2216 = vst.msk [vmem:[%s3841_s14 + $0xd0] sm:$0xff] %vm393_vm1, %v2184_v8 }
 0x27a   : > { %v2556_v22 = vpop.f32.mrb[24].mxu1 }
 0x27b   : > { %v2145_v27 = vadd.f32 %v2556_v22, %v3833_v4  ;;  %v2139_v20 = vpop.f32.mrb[25].mxu1 }
 0x27c   : > { %v2140_v23 = vadd.f32 %v3833_v4, %v2139_v20 }
 0x27d   : > { %v2187_v50 = vadd.f32 %v2639_v25, %v2145_v27 }
 0x27e   : > { %v2186_v39 = vadd.f32 %v2640_v58, %v2140_v23 }
 0x27f   : > { %2219 = vst.msk [vmem:[%s3841_s14 + $0xe8] sm:$0xff] %vm393_vm1, %v2187_v50 }
 0x280   : > { %2218 = vst.msk [vmem:[%s3841_s14 + $0xe0] sm:$0xff] %vm393_vm1, %v2186_v39 }
 0x284   : > { %v2559_v51 = vpop.f32.mrb[26].mxu1 }
 0x285   : > { %v2155_v26 = vadd.f32 %v2559_v51, %v3833_v4  ;;  %v2149_v33 = vpop.f32.mrb[27].mxu1 }
 0x286   : > { %v2150_v35 = vadd.f32 %v3833_v4, %v2149_v33 }
 0x287   : > { %v2189_v0 = vadd.f32 %v2641_v52, %v2155_v26 }
 0x288   : > { %v2188_v17 = vadd.f32 %v2642_v53, %v2150_v35 }
 0x289   : > { %2221 = vst.msk [vmem:[%s3841_s14 + $0xf8] sm:$0xff] %vm393_vm1, %v2189_v0 }
 0x28a   : > { %2220 = vst.msk [vmem:[%s3841_s14 + $0xf0] sm:$0xff] %vm393_vm1, %v2188_v17 }
 0x28b PF: > { %s17_s24 = sadd.s32 1, %s2649_s24  }
 0x28c   : > { %p14_p4 = scmp.ge.s32.totalorder %s17_s24, 4  }
 0x28e   :  { %16 = sbr.rel (!%p14_p4) target bundleno = 1 (0x1), region = 80 }

</bundles_post_ra>
